<compile_context>
chip_gen: v7x
topology: tpu7x:2x2x1
jax: 0.10.0
libtpu: 0.0.40
codegen_flags: <defaults>
</compile_context>

<pallas_src>
import jax
import jax.numpy as jnp
from jax.experimental import pallas as pl
from jax.experimental.pallas import tpu as pltpu


_VMEM = pl.BlockSpec(memory_space=pltpu.MemorySpace.VMEM)
_SMEM = pl.BlockSpec(memory_space=pltpu.MemorySpace.SMEM)


# ------------------------------ fused kernel --------------------------------

def decoder_fused_kernel(ids_ref, emb_ref, h_in_ref, c_in_ref, w_ref, b_ref,
                         wfc_ref, bfc_ref,
                         logits_ref, h_out_ref, c_out_ref,
                         xh_ref):
    """Whole Decoder.forward (eval mode) for one decode step.

    ids_ref:   [B]              int32 token ids (SMEM)
    emb_ref:   [V_in, E]        embedding table
    h_in_ref:  [L, B, H]        previous hidden states
    c_in_ref:  [L, B, H]        previous cell states
    w_ref:     [L, In_max+H, 4H] concat [W_ih ; W_hh] per layer (zero padded)
    b_ref:     [L, 1, 4H]       combined bias (b_ih + b_hh) per layer
    wfc_ref:   [H, V_pad]       FC weight (vocab padded to 128 lanes)
    bfc_ref:   [1, V_pad]       FC bias   (vocab padded to 128 lanes)
    logits_ref:[B, V_pad]       output logits (padded)
    h_out_ref: [L, B, H]        new hidden states
    c_out_ref: [L, B, H]        new cell states
    xh_ref:    [B, In_max+H]    VMEM scratch holding [x ; h_prev]
    """
    L, B, H = h_in_ref.shape
    E = emb_ref.shape[1]
    in_max = w_ref.shape[1] - H

    # Zero the concat scratch once so padded columns contribute exactly 0.
    xh_ref[...] = jnp.zeros_like(xh_ref)

    # Embedding lookup (nn.Dropout is identity in eval mode): gather one row
    # per batch element with a dynamic sublane load.
    for bidx in range(B):
        tok = ids_ref[bidx]
        xh_ref[pl.ds(bidx, 1), pl.ds(0, E)] = emb_ref[pl.ds(tok, 1), :]

    h_last = None
    for l in range(L):  # static unroll over layers
        # Previous hidden state goes in the trailing H columns of [x ; h].
        xh_ref[:, pl.ds(in_max, H)] = h_in_ref[l]

        # Single fused matmul: [B, In_max+H] @ [In_max+H, 4H]
        gates = (jnp.dot(xh_ref[...], w_ref[l],
                         preferred_element_type=jnp.float32) + b_ref[l])

        i_g = jax.nn.sigmoid(gates[:, 0 * H:1 * H])
        f_g = jax.nn.sigmoid(gates[:, 1 * H:2 * H])
        g_g = jnp.tanh(gates[:, 2 * H:3 * H])
        o_g = jax.nn.sigmoid(gates[:, 3 * H:4 * H])

        c_new = f_g * c_in_ref[l] + i_g * g_g
        h_new = o_g * jnp.tanh(c_new)

        c_out_ref[l] = c_new
        h_out_ref[l] = h_new
        h_last = h_new

        if l + 1 < L:
            # Next layer's input = this layer's hidden (inter-layer LSTM
            # dropout is identity in eval mode).
            xh_ref[:, pl.ds(0, H)] = h_new

    # Final Linear on the top layer's hidden state (lane-padded vocab).
    logits_ref[...] = (jnp.dot(h_last, wfc_ref[...],
                               preferred_element_type=jnp.float32)
                       + bfc_ref[...])


# -------------------------------- wrappers ----------------------------------

def pack_decoder_params(raw, lane=128):
    """Repack PyTorch-layout params into the fused-kernel layout.

    raw: embedding [V_in, E], w_ih[l] [in_dim, 4H], w_hh[l] [H, 4H],
         b[l] [1, 4H] (= b_ih + b_hh), w_fc [H, V], b_fc [1, V]
    """
    emb = raw["embedding"]
    H = raw["w_hh"][0].shape[0]
    E = emb.shape[1]
    L = len(raw["w_ih"])
    in_max = max(E, H)

    w_cat, b_cat = [], []
    for l in range(L):
        w_ih = raw["w_ih"][l]                       # [in_dim, 4H]
        w_hh = raw["w_hh"][l]                       # [H, 4H]
        in_dim = w_ih.shape[0]
        w_full = jnp.zeros((in_max + H, 4 * H), jnp.float32)
        w_full = w_full.at[:in_dim, :].set(w_ih)
        w_full = w_full.at[in_max:, :].set(w_hh)
        w_cat.append(w_full)
        b_cat.append(raw["b"][l].reshape(1, 4 * H).astype(jnp.float32))

    w_fc = raw["w_fc"]                              # [H, V]
    b_fc = raw["b_fc"].reshape(1, -1)               # [1, V]
    v = w_fc.shape[1]
    v_pad = ((v + lane - 1) // lane) * lane
    w_fc_pad = jnp.zeros((H, v_pad), jnp.float32).at[:, :v].set(w_fc)
    b_fc_pad = jnp.zeros((1, v_pad), jnp.float32).at[:, :v].set(b_fc)

    return {
        "embedding": emb.astype(jnp.float32),
        "w_cat": jnp.stack(w_cat),                  # [L, in_max+H, 4H]
        "b_cat": jnp.stack(b_cat),                  # [L, 1, 4H]
        "w_fc": w_fc_pad,                           # [H, v_pad]
        "b_fc": b_fc_pad,                           # [1, v_pad]
    }


def decoder_forward(x_ids, hidden, cell_state, kparams, out_vocab):
    """Equivalent of Decoder.forward(x, hidden, cellState) in eval mode.

    x_ids:      [B] int32 token ids
    hidden:     [L, B, H]
    cell_state: [L, B, H]
    returns (logits [B, out_vocab], hidden [L, B, H], cell_state [L, B, H])
    """
    L, B, H = hidden.shape
    in_max = kparams["w_cat"].shape[1] - H
    v_pad = kparams["w_fc"].shape[1]

    logits_pad, h_out, c_out = pl.pallas_call(
        decoder_fused_kernel,
        out_shape=(
            jax.ShapeDtypeStruct((B, v_pad), jnp.float32),
            jax.ShapeDtypeStruct((L, B, H), jnp.float32),
            jax.ShapeDtypeStruct((L, B, H), jnp.float32),
        ),
        in_specs=[_SMEM,   # token ids
                  _VMEM,   # embedding table
                  _VMEM,   # hidden
                  _VMEM,   # cell state
                  _VMEM,   # stacked concat LSTM weights
                  _VMEM,   # stacked biases
                  _VMEM,   # FC weight (padded)
                  _VMEM],  # FC bias   (padded)
        out_specs=(_VMEM, _VMEM, _VMEM),
        scratch_shapes=[pltpu.VMEM((B, in_max + H), jnp.float32)],
    )(x_ids, kparams["embedding"], hidden, cell_state,
      kparams["w_cat"], kparams["b_cat"], kparams["w_fc"], kparams["b_fc"])

    return logits_pad[:, :out_vocab], h_out, c_out


# --------------------------- pure-JAX reference -----------------------------

def decoder_forward_ref(x_ids, hidden, cell_state, raw):
    inp = jnp.take(raw["embedding"], x_ids, axis=0)
    H = hidden.shape[-1]
    new_h, new_c = [], []
    for l in range(hidden.shape[0]):
        gates = inp @ raw["w_ih"][l] + hidden[l] @ raw["w_hh"][l] + raw["b"][l]
        i = jax.nn.sigmoid(gates[:, :H])
        f = jax.nn.sigmoid(gates[:, H:2 * H])
        g = jnp.tanh(gates[:, 2 * H:3 * H])
        o = jax.nn.sigmoid(gates[:, 3 * H:])
        c_new = f * cell_state[l] + i * g
        h_new = o * jnp.tanh(c_new)
        new_h.append(h_new)
        new_c.append(c_new)
        inp = h_new
    logits = inp @ raw["w_fc"] + raw["b_fc"]
    return logits, jnp.stack(new_h), jnp.stack(new_c)


# ---------------------------------- main ------------------------------------

if __name__ == "__main__":
    # Shapes consistent with the module (embeddingSize=128, hiddenSize=256),
    # small batch / vocab for the test.
    batch = 8
    embedding_size = 128
    hidden_size = 256            # multiple of 128 -> gate slices lane aligned
    num_layers = 2
    input_vocab = 32
    output_vocab = 24            # padded to 128 inside the kernel

    key = jax.random.PRNGKey(0)
    ks = jax.random.split(key, 16)

    def init(k, shape, scale=0.1):
        return (scale * jax.random.normal(k, shape)).astype(jnp.float32)

    raw = {
        "embedding": init(ks[0], (input_vocab, embedding_size)),
        # layer l weights: W_ih [in, 4H], W_hh [H, 4H], combined bias [1, 4H]
        "w_ih": [init(ks[1], (embedding_size, 4 * hidden_size)),
                 init(ks[2], (hidden_size, 4 * hidden_size))],
        "w_hh": [init(ks[3], (hidden_size, 4 * hidden_size)),
                 init(ks[4], (hidden_size, 4 * hidden_size))],
        "b": [init(ks[5], (1, 4 * hidden_size)) + init(ks[6], (1, 4 * hidden_size)),
              init(ks[7], (1, 4 * hidden_size)) + init(ks[8], (1, 4 * hidden_size))],
        "w_fc": init(ks[9], (hidden_size, output_vocab)),
        "b_fc": init(ks[10], (1, output_vocab)),
    }
    kparams = pack_decoder_params(raw)

    x_ids = jax.random.randint(ks[11], (batch,), 0, input_vocab, dtype=jnp.int32)
    hidden = init(ks[12], (num_layers, batch, hidden_size), scale=0.5)
    cell_state = init(ks[13], (num_layers, batch, hidden_size), scale=0.5)

    logits, h_out, c_out = decoder_forward(x_ids, hidden, cell_state,
                                           kparams, output_vocab)
    jax.block_until_ready((logits, h_out, c_out))

    # silent correctness check against pure-JAX reference
    ref_logits, ref_h, ref_c = decoder_forward_ref(x_ids, hidden, cell_state, raw)
    assert jnp.allclose(logits, ref_logits, atol=1e-4, rtol=1e-4)
    assert jnp.allclose(h_out, ref_h, atol=1e-4, rtol=1e-4)
    assert jnp.allclose(c_out, ref_c, atol=1e-4, rtol=1e-4)
    assert logits.shape == (batch, output_vocab)
    assert h_out.shape == (num_layers, batch, hidden_size)
    assert c_out.shape == (num_layers, batch, hidden_size)

    print("KERNEL_OK")
</pallas_src>

<mosaic_0001>
module attributes {stable_mosaic.version = 11 : i64} {
  func.func @decoder_fused_kernel(%arg0: memref<8xi32, #tpu.memory_space<smem>>, %arg1: memref<32x128xf32, #tpu.memory_space<vmem>>, %arg2: memref<2x8x256xf32, #tpu.memory_space<vmem>>, %arg3: memref<2x8x256xf32, #tpu.memory_space<vmem>>, %arg4: memref<2x512x1024xf32, #tpu.memory_space<vmem>>, %arg5: memref<2x1x1024xf32, #tpu.memory_space<vmem>>, %arg6: memref<256x128xf32, #tpu.memory_space<vmem>>, %arg7: memref<1x128xf32, #tpu.memory_space<vmem>>, %arg8: memref<8x128xf32, #tpu.memory_space<vmem>>, %arg9: memref<2x8x256xf32, #tpu.memory_space<vmem>>, %arg10: memref<2x8x256xf32, #tpu.memory_space<vmem>>, %arg11: memref<8x512xf32, #tpu.memory_space<vmem>>) attributes {dimension_semantics = [], scalar_prefetch = 0 : i64, scratch_operands = 1 : i64, tpu.core_type = #tpu.core_type<tc>} {
    %cst = arith.constant 0.000000e+00 : f32
    %0 = vector.broadcast %cst : f32 to vector<8x512xf32>
    %c0 = arith.constant 0 : index
    %c0_0 = arith.constant 0 : index
    %1 = vector.load %arg11[%c0, %c0_0] : memref<8x512xf32, #tpu.memory_space<vmem>>, vector<8x512xf32>
    tpu.vector_store %arg11[%c0, %c0_0], %0 {strides = array<i32>} : memref<8x512xf32, #tpu.memory_space<vmem>>, vector<8x512xf32>,
    %c0_1 = arith.constant 0 : index
    %2 = memref.load %arg0[%c0_1] : memref<8xi32, #tpu.memory_space<smem>>
    %3 = arith.index_cast %2 : i32 to index
    %c0_2 = arith.constant 0 : index
    %4 = vector.load %arg1[%3, %c0_2] : memref<32x128xf32, #tpu.memory_space<vmem>>, vector<1x128xf32>
    %c0_3 = arith.constant 0 : index
    %c0_4 = arith.constant 0 : index
    %5 = vector.load %arg11[%c0_3, %c0_4] : memref<8x512xf32, #tpu.memory_space<vmem>>, vector<1x128xf32>
    tpu.vector_store %arg11[%c0_3, %c0_4], %4 {strides = array<i32>} : memref<8x512xf32, #tpu.memory_space<vmem>>, vector<1x128xf32>,
    %c1 = arith.constant 1 : index
    %6 = memref.load %arg0[%c1] : memref<8xi32, #tpu.memory_space<smem>>
    %7 = arith.index_cast %6 : i32 to index
    %c0_5 = arith.constant 0 : index
    %8 = vector.load %arg1[%7, %c0_5] : memref<32x128xf32, #tpu.memory_space<vmem>>, vector<1x128xf32>
    %c1_6 = arith.constant 1 : index
    %c0_7 = arith.constant 0 : index
    %9 = vector.load %arg11[%c1_6, %c0_7] : memref<8x512xf32, #tpu.memory_space<vmem>>, vector<1x128xf32>
    tpu.vector_store %arg11[%c1_6, %c0_7], %8 {strides = array<i32>} : memref<8x512xf32, #tpu.memory_space<vmem>>, vector<1x128xf32>,
    %c2 = arith.constant 2 : index
    %10 = memref.load %arg0[%c2] : memref<8xi32, #tpu.memory_space<smem>>
    %11 = arith.index_cast %10 : i32 to index
    %c0_8 = arith.constant 0 : index
    %12 = vector.load %arg1[%11, %c0_8] : memref<32x128xf32, #tpu.memory_space<vmem>>, vector<1x128xf32>
    %c2_9 = arith.constant 2 : index
    %c0_10 = arith.constant 0 : index
    %13 = vector.load %arg11[%c2_9, %c0_10] : memref<8x512xf32, #tpu.memory_space<vmem>>, vector<1x128xf32>
    tpu.vector_store %arg11[%c2_9, %c0_10], %12 {strides = array<i32>} : memref<8x512xf32, #tpu.memory_space<vmem>>, vector<1x128xf32>,
    %c3 = arith.constant 3 : index
    %14 = memref.load %arg0[%c3] : memref<8xi32, #tpu.memory_space<smem>>
    %15 = arith.index_cast %14 : i32 to index
    %c0_11 = arith.constant 0 : index
    %16 = vector.load %arg1[%15, %c0_11] : memref<32x128xf32, #tpu.memory_space<vmem>>, vector<1x128xf32>
    %c3_12 = arith.constant 3 : index
    %c0_13 = arith.constant 0 : index
    %17 = vector.load %arg11[%c3_12, %c0_13] : memref<8x512xf32, #tpu.memory_space<vmem>>, vector<1x128xf32>
    tpu.vector_store %arg11[%c3_12, %c0_13], %16 {strides = array<i32>} : memref<8x512xf32, #tpu.memory_space<vmem>>, vector<1x128xf32>,
    %c4 = arith.constant 4 : index
    %18 = memref.load %arg0[%c4] : memref<8xi32, #tpu.memory_space<smem>>
    %19 = arith.index_cast %18 : i32 to index
    %c0_14 = arith.constant 0 : index
    %20 = vector.load %arg1[%19, %c0_14] : memref<32x128xf32, #tpu.memory_space<vmem>>, vector<1x128xf32>
    %c4_15 = arith.constant 4 : index
    %c0_16 = arith.constant 0 : index
    %21 = vector.load %arg11[%c4_15, %c0_16] : memref<8x512xf32, #tpu.memory_space<vmem>>, vector<1x128xf32>
    tpu.vector_store %arg11[%c4_15, %c0_16], %20 {strides = array<i32>} : memref<8x512xf32, #tpu.memory_space<vmem>>, vector<1x128xf32>,
    %c5 = arith.constant 5 : index
    %22 = memref.load %arg0[%c5] : memref<8xi32, #tpu.memory_space<smem>>
    %23 = arith.index_cast %22 : i32 to index
    %c0_17 = arith.constant 0 : index
    %24 = vector.load %arg1[%23, %c0_17] : memref<32x128xf32, #tpu.memory_space<vmem>>, vector<1x128xf32>
    %c5_18 = arith.constant 5 : index
    %c0_19 = arith.constant 0 : index
    %25 = vector.load %arg11[%c5_18, %c0_19] : memref<8x512xf32, #tpu.memory_space<vmem>>, vector<1x128xf32>
    tpu.vector_store %arg11[%c5_18, %c0_19], %24 {strides = array<i32>} : memref<8x512xf32, #tpu.memory_space<vmem>>, vector<1x128xf32>,
    %c6 = arith.constant 6 : index
    %26 = memref.load %arg0[%c6] : memref<8xi32, #tpu.memory_space<smem>>
    %27 = arith.index_cast %26 : i32 to index
    %c0_20 = arith.constant 0 : index
    %28 = vector.load %arg1[%27, %c0_20] : memref<32x128xf32, #tpu.memory_space<vmem>>, vector<1x128xf32>
    %c6_21 = arith.constant 6 : index
    %c0_22 = arith.constant 0 : index
    %29 = vector.load %arg11[%c6_21, %c0_22] : memref<8x512xf32, #tpu.memory_space<vmem>>, vector<1x128xf32>
    tpu.vector_store %arg11[%c6_21, %c0_22], %28 {strides = array<i32>} : memref<8x512xf32, #tpu.memory_space<vmem>>, vector<1x128xf32>,
    %c7 = arith.constant 7 : index
    %30 = memref.load %arg0[%c7] : memref<8xi32, #tpu.memory_space<smem>>
    %31 = arith.index_cast %30 : i32 to index
    %c0_23 = arith.constant 0 : index
    %32 = vector.load %arg1[%31, %c0_23] : memref<32x128xf32, #tpu.memory_space<vmem>>, vector<1x128xf32>
    %c7_24 = arith.constant 7 : index
    %c0_25 = arith.constant 0 : index
    %33 = vector.load %arg11[%c7_24, %c0_25] : memref<8x512xf32, #tpu.memory_space<vmem>>, vector<1x128xf32>
    tpu.vector_store %arg11[%c7_24, %c0_25], %32 {strides = array<i32>} : memref<8x512xf32, #tpu.memory_space<vmem>>, vector<1x128xf32>,
    %c0_26 = arith.constant 0 : index
    %c0_27 = arith.constant 0 : index
    %c0_28 = arith.constant 0 : index
    %34 = vector.load %arg2[%c0_26, %c0_27, %c0_28] : memref<2x8x256xf32, #tpu.memory_space<vmem>>, vector<1x8x256xf32>
    %35 = vector.shape_cast %34 : vector<1x8x256xf32> to vector<8x256xf32>
    %c0_29 = arith.constant 0 : index
    %c256 = arith.constant 256 : index
    %36 = vector.load %arg11[%c0_29, %c256] : memref<8x512xf32, #tpu.memory_space<vmem>>, vector<8x256xf32>
    tpu.vector_store %arg11[%c0_29, %c256], %35 {strides = array<i32>} : memref<8x512xf32, #tpu.memory_space<vmem>>, vector<8x256xf32>,
    %c0_30 = arith.constant 0 : index
    %c0_31 = arith.constant 0 : index
    %37 = vector.load %arg11[%c0_30, %c0_31] : memref<8x512xf32, #tpu.memory_space<vmem>>, vector<8x512xf32>
    %c0_32 = arith.constant 0 : index
    %c0_33 = arith.constant 0 : index
    %c0_34 = arith.constant 0 : index
    %38 = vector.load %arg4[%c0_32, %c0_33, %c0_34] : memref<2x512x1024xf32, #tpu.memory_space<vmem>>, vector<1x512x1024xf32>
    %39 = vector.shape_cast %38 : vector<1x512x1024xf32> to vector<512x1024xf32>
    %cst_35 = arith.constant dense<0.000000e+00> : vector<8x1024xf32>
    %40 = tpu.matmul %37, %39, %cst_35 {dimension_numbers = #tpu.dot_dimension_numbers<[1], [0], [0], [1], [0, 0, 1, 1], [], []>} : vector<8x512xf32>, vector<512x1024xf32>, vector<8x1024xf32> -> vector<8x1024xf32>
    %c0_36 = arith.constant 0 : index
    %c0_37 = arith.constant 0 : index
    %c0_38 = arith.constant 0 : index
    %41 = vector.load %arg5[%c0_36, %c0_37, %c0_38] : memref<2x1x1024xf32, #tpu.memory_space<vmem>>, vector<1x1x1024xf32>
    %42 = vector.shape_cast %41 : vector<1x1x1024xf32> to vector<1x1024xf32>
    %43 = vector.broadcast %42 : vector<1x1024xf32> to vector<8x1024xf32>
    %44 = arith.addf %40, %43 : vector<8x1024xf32>
    %45 = vector.extract_strided_slice %44 {offsets = [0, 0], sizes = [8, 256], strides = [1, 1]} : vector<8x1024xf32> to vector<8x256xf32>
    %46 = arith.negf %45 : vector<8x256xf32>
    %47 = math.exp %46 : vector<8x256xf32>
    %cst_39 = arith.constant 1.000000e+00 : f32
    %48 = vector.broadcast %cst_39 : f32 to vector<8x256xf32>
    %49 = arith.addf %48, %47 : vector<8x256xf32>
    %50 = arith.divf %48, %49 : vector<8x256xf32>
    %51 = vector.extract_strided_slice %44 {offsets = [0, 256], sizes = [8, 256], strides = [1, 1]} : vector<8x1024xf32> to vector<8x256xf32>
    %52 = arith.negf %51 : vector<8x256xf32>
    %53 = math.exp %52 : vector<8x256xf32>
    %cst_40 = arith.constant 1.000000e+00 : f32
    %54 = vector.broadcast %cst_40 : f32 to vector<8x256xf32>
    %55 = arith.addf %54, %53 : vector<8x256xf32>
    %56 = arith.divf %54, %55 : vector<8x256xf32>
    %57 = vector.extract_strided_slice %44 {offsets = [0, 512], sizes = [8, 256], strides = [1, 1]} : vector<8x1024xf32> to vector<8x256xf32>
    %58 = math.tanh %57 : vector<8x256xf32>
    %59 = vector.extract_strided_slice %44 {offsets = [0, 768], sizes = [8, 256], strides = [1, 1]} : vector<8x1024xf32> to vector<8x256xf32>
    %60 = arith.negf %59 : vector<8x256xf32>
    %61 = math.exp %60 : vector<8x256xf32>
    %cst_41 = arith.constant 1.000000e+00 : f32
    %62 = vector.broadcast %cst_41 : f32 to vector<8x256xf32>
    %63 = arith.addf %62, %61 : vector<8x256xf32>
    %64 = arith.divf %62, %63 : vector<8x256xf32>
    %c0_42 = arith.constant 0 : index
    %c0_43 = arith.constant 0 : index
    %c0_44 = arith.constant 0 : index
    %65 = vector.load %arg3[%c0_42, %c0_43, %c0_44] : memref<2x8x256xf32, #tpu.memory_space<vmem>>, vector<1x8x256xf32>
    %66 = vector.shape_cast %65 : vector<1x8x256xf32> to vector<8x256xf32>
    %67 = arith.mulf %56, %66 : vector<8x256xf32>
    %68 = arith.mulf %50, %58 : vector<8x256xf32>
    %69 = arith.addf %67, %68 : vector<8x256xf32>
    %70 = math.tanh %69 : vector<8x256xf32>
    %71 = arith.mulf %64, %70 : vector<8x256xf32>
    %c0_45 = arith.constant 0 : index
    %c0_46 = arith.constant 0 : index
    %c0_47 = arith.constant 0 : index
    %72 = vector.load %arg10[%c0_45, %c0_46, %c0_47] : memref<2x8x256xf32, #tpu.memory_space<vmem>>, vector<1x8x256xf32>
    %73 = vector.shape_cast %72 : vector<1x8x256xf32> to vector<8x256xf32>
    %74 = vector.shape_cast %69 : vector<8x256xf32> to vector<1x8x256xf32>
    tpu.vector_store %arg10[%c0_45, %c0_46, %c0_47], %74 {strides = array<i32>} : memref<2x8x256xf32, #tpu.memory_space<vmem>>, vector<1x8x256xf32>,
    %c0_48 = arith.constant 0 : index
    %c0_49 = arith.constant 0 : index
    %c0_50 = arith.constant 0 : index
    %75 = vector.load %arg9[%c0_48, %c0_49, %c0_50] : memref<2x8x256xf32, #tpu.memory_space<vmem>>, vector<1x8x256xf32>
    %76 = vector.shape_cast %75 : vector<1x8x256xf32> to vector<8x256xf32>
    %77 = vector.shape_cast %71 : vector<8x256xf32> to vector<1x8x256xf32>
    tpu.vector_store %arg9[%c0_48, %c0_49, %c0_50], %77 {strides = array<i32>} : memref<2x8x256xf32, #tpu.memory_space<vmem>>, vector<1x8x256xf32>,
    %c0_51 = arith.constant 0 : index
    %c0_52 = arith.constant 0 : index
    %78 = vector.load %arg11[%c0_51, %c0_52] : memref<8x512xf32, #tpu.memory_space<vmem>>, vector<8x256xf32>
    tpu.vector_store %arg11[%c0_51, %c0_52], %71 {strides = array<i32>} : memref<8x512xf32, #tpu.memory_space<vmem>>, vector<8x256xf32>,
    %c1_53 = arith.constant 1 : index
    %c0_54 = arith.constant 0 : index
    %c0_55 = arith.constant 0 : index
    %79 = vector.load %arg2[%c1_53, %c0_54, %c0_55] : memref<2x8x256xf32, #tpu.memory_space<vmem>>, vector<1x8x256xf32>
    %80 = vector.shape_cast %79 : vector<1x8x256xf32> to vector<8x256xf32>
    %c0_56 = arith.constant 0 : index
    %c256_57 = arith.constant 256 : index
    %81 = vector.load %arg11[%c0_56, %c256_57] : memref<8x512xf32, #tpu.memory_space<vmem>>, vector<8x256xf32>
    tpu.vector_store %arg11[%c0_56, %c256_57], %80 {strides = array<i32>} : memref<8x512xf32, #tpu.memory_space<vmem>>, vector<8x256xf32>,
    %c0_58 = arith.constant 0 : index
    %c0_59 = arith.constant 0 : index
    %82 = vector.load %arg11[%c0_58, %c0_59] : memref<8x512xf32, #tpu.memory_space<vmem>>, vector<8x512xf32>
    %c1_60 = arith.constant 1 : index
    %c0_61 = arith.constant 0 : index
    %c0_62 = arith.constant 0 : index
    %83 = vector.load %arg4[%c1_60, %c0_61, %c0_62] : memref<2x512x1024xf32, #tpu.memory_space<vmem>>, vector<1x512x1024xf32>
    %84 = vector.shape_cast %83 : vector<1x512x1024xf32> to vector<512x1024xf32>
    %cst_63 = arith.constant dense<0.000000e+00> : vector<8x1024xf32>
    %85 = tpu.matmul %82, %84, %cst_63 {dimension_numbers = #tpu.dot_dimension_numbers<[1], [0], [0], [1], [0, 0, 1, 1], [], []>} : vector<8x512xf32>, vector<512x1024xf32>, vector<8x1024xf32> -> vector<8x1024xf32>
    %c1_64 = arith.constant 1 : index
    %c0_65 = arith.constant 0 : index
    %c0_66 = arith.constant 0 : index
    %86 = vector.load %arg5[%c1_64, %c0_65, %c0_66] : memref<2x1x1024xf32, #tpu.memory_space<vmem>>, vector<1x1x1024xf32>
    %87 = vector.shape_cast %86 : vector<1x1x1024xf32> to vector<1x1024xf32>
    %88 = vector.broadcast %87 : vector<1x1024xf32> to vector<8x1024xf32>
    %89 = arith.addf %85, %88 : vector<8x1024xf32>
    %90 = vector.extract_strided_slice %89 {offsets = [0, 0], sizes = [8, 256], strides = [1, 1]} : vector<8x1024xf32> to vector<8x256xf32>
    %91 = arith.negf %90 : vector<8x256xf32>
    %92 = math.exp %91 : vector<8x256xf32>
    %cst_67 = arith.constant 1.000000e+00 : f32
    %93 = vector.broadcast %cst_67 : f32 to vector<8x256xf32>
    %94 = arith.addf %93, %92 : vector<8x256xf32>
    %95 = arith.divf %93, %94 : vector<8x256xf32>
    %96 = vector.extract_strided_slice %89 {offsets = [0, 256], sizes = [8, 256], strides = [1, 1]} : vector<8x1024xf32> to vector<8x256xf32>
    %97 = arith.negf %96 : vector<8x256xf32>
    %98 = math.exp %97 : vector<8x256xf32>
    %cst_68 = arith.constant 1.000000e+00 : f32
    %99 = vector.broadcast %cst_68 : f32 to vector<8x256xf32>
    %100 = arith.addf %99, %98 : vector<8x256xf32>
    %101 = arith.divf %99, %100 : vector<8x256xf32>
    %102 = vector.extract_strided_slice %89 {offsets = [0, 512], sizes = [8, 256], strides = [1, 1]} : vector<8x1024xf32> to vector<8x256xf32>
    %103 = math.tanh %102 : vector<8x256xf32>
    %104 = vector.extract_strided_slice %89 {offsets = [0, 768], sizes = [8, 256], strides = [1, 1]} : vector<8x1024xf32> to vector<8x256xf32>
    %105 = arith.negf %104 : vector<8x256xf32>
    %106 = math.exp %105 : vector<8x256xf32>
    %cst_69 = arith.constant 1.000000e+00 : f32
    %107 = vector.broadcast %cst_69 : f32 to vector<8x256xf32>
    %108 = arith.addf %107, %106 : vector<8x256xf32>
    %109 = arith.divf %107, %108 : vector<8x256xf32>
    %c1_70 = arith.constant 1 : index
    %c0_71 = arith.constant 0 : index
    %c0_72 = arith.constant 0 : index
    %110 = vector.load %arg3[%c1_70, %c0_71, %c0_72] : memref<2x8x256xf32, #tpu.memory_space<vmem>>, vector<1x8x256xf32>
    %111 = vector.shape_cast %110 : vector<1x8x256xf32> to vector<8x256xf32>
    %112 = arith.mulf %101, %111 : vector<8x256xf32>
    %113 = arith.mulf %95, %103 : vector<8x256xf32>
    %114 = arith.addf %112, %113 : vector<8x256xf32>
    %115 = math.tanh %114 : vector<8x256xf32>
    %116 = arith.mulf %109, %115 : vector<8x256xf32>
    %c1_73 = arith.constant 1 : index
    %c0_74 = arith.constant 0 : index
    %c0_75 = arith.constant 0 : index
    %117 = vector.load %arg10[%c1_73, %c0_74, %c0_75] : memref<2x8x256xf32, #tpu.memory_space<vmem>>, vector<1x8x256xf32>
    %118 = vector.shape_cast %117 : vector<1x8x256xf32> to vector<8x256xf32>
    %119 = vector.shape_cast %114 : vector<8x256xf32> to vector<1x8x256xf32>
    tpu.vector_store %arg10[%c1_73, %c0_74, %c0_75], %119 {strides = array<i32>} : memref<2x8x256xf32, #tpu.memory_space<vmem>>, vector<1x8x256xf32>,
    %c1_76 = arith.constant 1 : index
    %c0_77 = arith.constant 0 : index
    %c0_78 = arith.constant 0 : index
    %120 = vector.load %arg9[%c1_76, %c0_77, %c0_78] : memref<2x8x256xf32, #tpu.memory_space<vmem>>, vector<1x8x256xf32>
    %121 = vector.shape_cast %120 : vector<1x8x256xf32> to vector<8x256xf32>
    %122 = vector.shape_cast %116 : vector<8x256xf32> to vector<1x8x256xf32>
    tpu.vector_store %arg9[%c1_76, %c0_77, %c0_78], %122 {strides = array<i32>} : memref<2x8x256xf32, #tpu.memory_space<vmem>>, vector<1x8x256xf32>,
    %c0_79 = arith.constant 0 : index
    %c0_80 = arith.constant 0 : index
    %123 = vector.load %arg6[%c0_79, %c0_80] : memref<256x128xf32, #tpu.memory_space<vmem>>, vector<256x128xf32>
    %cst_81 = arith.constant dense<0.000000e+00> : vector<8x128xf32>
    %124 = tpu.matmul %116, %123, %cst_81 {dimension_numbers = #tpu.dot_dimension_numbers<[1], [0], [0], [1], [0, 0, 1, 1], [], []>} : vector<8x256xf32>, vector<256x128xf32>, vector<8x128xf32> -> vector<8x128xf32>
    %c0_82 = arith.constant 0 : index
    %c0_83 = arith.constant 0 : index
    %125 = vector.load %arg7[%c0_82, %c0_83] : memref<1x128xf32, #tpu.memory_space<vmem>>, vector<1x128xf32>
    %126 = vector.broadcast %125 : vector<1x128xf32> to vector<8x128xf32>
    %127 = arith.addf %124, %126 : vector<8x128xf32>
    %c0_84 = arith.constant 0 : index
    %c0_85 = arith.constant 0 : index
    %128 = vector.load %arg8[%c0_84, %c0_85] : memref<8x128xf32, #tpu.memory_space<vmem>>, vector<8x128xf32>
    tpu.vector_store %arg8[%c0_84, %c0_85], %127 {strides = array<i32>} : memref<8x128xf32, #tpu.memory_space<vmem>>, vector<8x128xf32>,
    return
  }
}

</mosaic_0001>

<bundles_post_ra>
// kernel: tpu_custom_call.1
= control target key start
LH: loop header
LB: loop body
LE: loop exit
PB: predicated region body
PF: predicated region fallthrough
CT: control target
= control target key end

     0   :  { %16 = vsyncpa [#allocation6], 0  ;;  %s4531_s0 = inlined_call_operand.hbm [shape: s32[8], index: 0, kind: input, shape index: {}]   ;;  %s4532_s1 = inlined_call_operand.hbm [shape: f32[32,128], index: 1, kind: input, shape index: {}]   ;;  %s4533_s2 = inlined_call_operand.hbm [shape: f32[2,8,256], index: 2, kind: input, shape index: {}]   ;;  %s4534_s3 = inlined_call_operand.hbm [shape: f32[2,8,256], index: 3, kind: input, shape index: {}]   ;;  %s4535_s4 = inlined_call_operand.hbm [shape: f32[2,512,1024], index: 4, kind: input, shape index: {}]   ;;  %s4536_s5 = inlined_call_operand.hbm [shape: f32[2,1,1024], index: 5, kind: input, shape index: {}]   ;;  %s4537_s6 = inlined_call_operand.hbm [shape: f32[256,128], index: 6, kind: input, shape index: {}]   ;;  %s4538_s7 = inlined_call_operand.hbm [shape: f32[1,128], index: 7, kind: input, shape index: {}]   ;;  %s4539_s8 = inlined_call_operand.hbm [shape: f32[8,128], index: 8, kind: output, shape index: {0}]   ;;  %s4540_s9 = inlined_call_operand.hbm [shape: f32[2,8,256], index: 9, kind: output, shape index: {1}]   ;;  %s4541_s10 = inlined_call_operand.hbm [shape: f32[2,8,256], index: 10, kind: output, shape index: {2}]  }
   0x1   :  { %17 = vsyncpa [#allocation4], 0 }
   0x2   :  { %18 = vsyncpa [#allocation9], 0 }
   0x3   :  { %19 = vsyncpa [#allocation12], 0 }
   0x4   :  { %20 = vsyncpa [#allocation15], 0 }
   0x5   :  { %21 = vsyncpa [#allocation5], 0 }
   0x6   :  { %22 = vsyncpa [#allocation19], 0  ;;  %s4191_s13 = smov [#allocation8]   ;;  %s3947_s17 = scalar_lea.hbm %s4533_s2, 512 }
   0x7   :  { %s48_s14 = sshll.u32 %s4191_s13, 4  ;;  %p3948_p0 = scmp.ne.s32.totalorder %s4533_s2, %s3947_s17  ;;  %s49_s14 = int_to_ptr.vmem [resolvable:$true] %s48_s14 }
   0x8   :  { %p3951_p1 = scmp.lt.u32.totalorder %s3947_s17, %s4533_s2 }
   0xa   :  { %p3953_p2 = pnand %p3951_p1, %p3948_p0 }
   0xc   :  { %3956 = shalt.err (!%p3953_p2)
}
   0xd   :  { %s3957_s22 = scalar_lea.vmem %s49_s14, 512  ;;  %p3962_p4 = scmp.lt.s32.totalorder %s49_s14, %s49_s14 }
   0xe   :  { %p3958_p3 = scmp.ne.s32.totalorder %s49_s14, %s3957_s22  ;;  %p3963_p5 = scmp.lt.s32.totalorder %s3957_s22, %s3957_s22 }
  0x10   :  { %p3964_p6 = por %p3963_p5, %p3962_p4 }
  0x12   :  { %p3965_p7 = pnand %p3964_p6, %p3958_p3 }
  0x14   :  { %3968 = shalt.err (!%p3965_p7)
}
  0x15   :  { %s4192_s23 = smov 256   ;;  %s4193_s24 = smov 16  }
  0x16   :  { %54 = dma.hbm_to_vmem [thread:$0]  %s4533_s2, 512, %s49_s14, [#allocation9], %s4192_s23, %s4192_s23, %s4193_s24  }
  0x17   :  { %s4194_s27 = smov [#allocation11]   ;;  %s3969_s11 = scalar_lea.hbm %s4535_s4, 131072 }
  0x18   :  { %s72_s28 = sshll.u32 %s4194_s27, 4  ;;  %p3970_p8 = scmp.ne.s32.totalorder %s4535_s4, %s3969_s11  ;;  %s73_s28 = int_to_ptr.vmem [resolvable:$true] %s72_s28 }
  0x19   :  { %p3973_p9 = scmp.lt.u32.totalorder %s3969_s11, %s4535_s4 }
  0x1b   :  { %p3975_p10 = pnand %p3973_p9, %p3970_p8 }
  0x1d   :  { %3978 = shalt.err (!%p3975_p10)
}
  0x1e   :  { %s3979_s17 = scalar_lea.vmem %s73_s28, 131072  ;;  %p3984_p12 = scmp.lt.s32.totalorder %s73_s28, %s73_s28 }
  0x1f   :  { %p3980_p11 = scmp.ne.s32.totalorder %s73_s28, %s3979_s17  ;;  %p3985_p13 = scmp.lt.s32.totalorder %s3979_s17, %s3979_s17 }
  0x21   :  { %p3986_p0 = por %p3985_p13, %p3984_p12 }
  0x23   :  { %p3987_p1 = pnand %p3986_p0, %p3980_p11 }
  0x25   :  { %3990 = shalt.err (!%p3987_p1)
}
  0x26   :  { %s4195_s2 = smov 1024   ;;  %s4196_s14 = smov 64  }
  0x27   :  { %78 = dma.hbm_to_vmem [thread:$0]  %s4535_s4, 131072, %s73_s28, [#allocation12], %s4195_s2, %s4195_s2, %s4196_s14  }
  0x28   :  { %s4197_s20 = smov [#allocation14]   ;;  %s4198_s22 = smov [#allocation7]  }
  0x29   :  { %s96_s21 = sshll.u32 %s4197_s20, 4  ;;  %s36_s25 = sshll.u32 %s4198_s22, 4  ;;  %s97_s21 = int_to_ptr.vmem [resolvable:$true] %s96_s21  ;;  %s37_s25 = int_to_ptr.vmem [resolvable:$true] %s36_s25 }
  0x2a   :  { %s3991_s29 = scalar_lea.hbm %s4537_s6, 4096 }
  0x2b   :  { %p3992_p2 = scmp.ne.s32.totalorder %s4537_s6, %s3991_s29  ;;  %p3995_p3 = scmp.lt.u32.totalorder %s3991_s29, %s4537_s6 }
  0x2d   :  { %p3997_p4 = pnand %p3995_p3, %p3992_p2 }
  0x2f   :  { %4000 = shalt.err (!%p3997_p4)
}
  0x30   :  { %s4001_s4 = scalar_lea.vmem %s97_s21, 4096  ;;  %p4006_p6 = scmp.lt.s32.totalorder %s97_s21, %s97_s21 }
  0x31   :  { %p4002_p5 = scmp.ne.s32.totalorder %s97_s21, %s4001_s4  ;;  %p4007_p7 = scmp.lt.s32.totalorder %s4001_s4, %s4001_s4 }
  0x33   :  { %p4008_p8 = por %p4007_p7, %p4006_p6 }
  0x35   :  { %p4009_p9 = pnand %p4008_p8, %p4002_p5 }
  0x37   :  { %4012 = shalt.err (!%p4009_p9)
}
  0x38   :  { %s4199_s28 = smov 128   ;;  %s4200_s15 = smov 8  }
  0x39   :  { %102 = dma.hbm_to_vmem [thread:$0]  %s4537_s6, 4096, %s97_s21, [#allocation15], %s4199_s28, %s4199_s28, %s4200_s15  }
  0x3a   :  { %s4013_s18 = scalar_lea.hbm %s4531_s0, 16 }
  0x3b   :  { %p4014_p10 = scmp.ne.s32.totalorder %s4531_s0, %s4013_s18  ;;  %p4017_p11 = scmp.lt.u32.totalorder %s4013_s18, %s4531_s0 }
  0x3d   :  { %p4019_p12 = pnand %p4017_p11, %p4014_p10 }
  0x3f   :  { %4022 = shalt.err (!%p4019_p12)
}
  0x40   :  { %s4201_s27 = smov [#allocation3]   ;;  %s4023_s11 = scalar_lea.hbm %s4532_s1, 512 }
  0x41   :  { %30 = dma.hbm_to_smem %s4531_s0, 16, %s4201_s27, [#allocation6]  }
  0x42   :  { %p4024_p13 = scmp.ne.s32.totalorder %s4532_s1, %s4023_s11  ;;  %p4027_p0 = scmp.lt.u32.totalorder %s4023_s11, %s4532_s1 }
  0x44   :  { %p4029_p1 = pnand %p4027_p0, %p4024_p13 }
  0x46   :  { %4032 = shalt.err (!%p4029_p1)
}
  0x47   :  { %s4033_s17 = scalar_lea.vmem %s37_s25, 512  ;;  %p4038_p3 = scmp.lt.s32.totalorder %s37_s25, %s37_s25 }
  0x48   :  { %p4034_p2 = scmp.ne.s32.totalorder %s37_s25, %s4033_s17  ;;  %p4039_p4 = scmp.lt.s32.totalorder %s4033_s17, %s4033_s17 }
  0x4a   :  { %p4040_p5 = por %p4039_p4, %p4038_p3 }
  0x4c   :  { %p4041_p6 = pnand %p4040_p5, %p4034_p2 }
  0x4e   :  { %4044 = shalt.err (!%p4041_p6)
}
  0x4f   :  { %42 = dma.hbm_to_vmem [thread:$0]  %s4532_s1, 512, %s37_s25, [#allocation4], %s4199_s28, %s4199_s28, %s4200_s15  }
  0x50   :  { %s4202_s14 = smov [#allocation10]   ;;  %s4203_s19 = smov [#allocation13]  }
  0x51   :  { %s60_s18 = sshll.u32 %s4202_s14, 4  ;;  %s84_s20 = sshll.u32 %s4203_s19, 4  ;;  %s61_s18 = int_to_ptr.vmem [resolvable:$true] %s60_s18  ;;  %s85_s20 = int_to_ptr.vmem [resolvable:$true] %s84_s20 }
  0x52   :  { %s4045_s27 = scalar_lea.hbm %s4534_s3, 512 }
  0x53   :  { %p4046_p7 = scmp.ne.s32.totalorder %s4534_s3, %s4045_s27  ;;  %p4049_p8 = scmp.lt.u32.totalorder %s4045_s27, %s4534_s3 }
  0x55   :  { %p4051_p9 = pnand %p4049_p8, %p4046_p7 }
  0x57   :  { %4054 = shalt.err (!%p4051_p9)
}
  0x58   :  { %s4055_s1 = scalar_lea.vmem %s61_s18, 512  ;;  %p4060_p11 = scmp.lt.s32.totalorder %s61_s18, %s61_s18 }
  0x59   :  { %p4056_p10 = scmp.ne.s32.totalorder %s61_s18, %s4055_s1  ;;  %p4061_p12 = scmp.lt.s32.totalorder %s4055_s1, %s4055_s1 }
  0x5b   :  { %p4062_p13 = por %p4061_p12, %p4060_p11 }
  0x5d   :  { %p4063_p0 = pnand %p4062_p13, %p4056_p10 }
  0x5f   :  { %4066 = shalt.err (!%p4063_p0)
}
  0x60   :  { %66 = dma.hbm_to_vmem [thread:$0]  %s4534_s3, 512, %s61_s18, [#allocation9], %s4192_s23, %s4192_s23, %s4193_s24  }
  0x61   :  { %s4067_s4 = scalar_lea.hbm %s4536_s5, 256 }
  0x62   :  { %p4068_p1 = scmp.ne.s32.totalorder %s4536_s5, %s4067_s4  ;;  %p4071_p2 = scmp.lt.u32.totalorder %s4067_s4, %s4536_s5 }
  0x64   :  { %p4073_p3 = pnand %p4071_p2, %p4068_p1 }
  0x66   :  { %4076 = shalt.err (!%p4073_p3)
}
  0x67   :  { %s4077_s14 = scalar_lea.vmem %s85_s20, 256  ;;  %p4082_p5 = scmp.lt.s32.totalorder %s85_s20, %s85_s20 }
  0x68   :  { %p4078_p4 = scmp.ne.s32.totalorder %s85_s20, %s4077_s14  ;;  %p4083_p6 = scmp.lt.s32.totalorder %s4077_s14, %s4077_s14 }
  0x6a   :  { %p4084_p7 = por %p4083_p6, %p4082_p5 }
  0x6c   :  { %p4085_p8 = pnand %p4084_p7, %p4078_p4 }
  0x6e   :  { %4088 = shalt.err (!%p4085_p8)
}
  0x6f   :  { %90 = dma.hbm_to_vmem [thread:$0]  %s4536_s5, 256, %s85_s20, [#allocation12], %s4199_s28, %s4199_s28, %s4200_s15  }
  0x70   :  { %s4204_s19 = smov [#allocation16]   ;;  %s4089_s29 = scalar_lea.hbm %s4538_s7, 16 }
  0x71   :  { %s109_s22 = sshll.u32 %s4204_s19, 4  ;;  %p4090_p9 = scmp.ne.s32.totalorder %s4538_s7, %s4089_s29  ;;  %s110_s22 = int_to_ptr.vmem [resolvable:$true] %s109_s22 }
  0x72   :  { %p4093_p10 = scmp.lt.u32.totalorder %s4089_s29, %s4538_s7 }
  0x74   :  { %p4095_p11 = pnand %p4093_p10, %p4090_p9 }
  0x76   :  { %4098 = shalt.err (!%p4095_p11)
}
  0x77   :  { %s4099_s25 = scalar_lea.vmem %s110_s22, 16  ;;  %s4103_s5 = scalar_lea.vmem %s110_s22, 32 }
  0x78   :  { %p4100_p12 = scmp.ne.s32.totalorder %s110_s22, %s4099_s25  ;;  %p4104_p13 = scmp.lt.s32.totalorder %s110_s22, %s110_s22 }
  0x79   :  { %p4105_p0 = scmp.lt.s32.totalorder %s4103_s5, %s4099_s25 }
  0x7b   :  { %p4106_p1 = por %p4105_p0, %p4104_p13 }
  0x7d   :  { %p4107_p2 = pnand %p4106_p1, %p4100_p12 }
  0x7f   :  { %4110 = shalt.err (!%p4107_p2)
}
  0x80   :  { %112 = dma.hbm_to_vmem [thread:$0]  %s4538_s7, 16, %s110_s22, [#allocation15]  }
  0x81   :  { %4177 = dma.done.wait [#allocation6], 16  }
  0x82   :  { %4178 = vsyncadd [#allocation6], 4294967280 }
  0x83   :  { %4179 = dma.done.wait [#allocation4], 512  }
  0x84   :  { %4180 = vsyncadd [#allocation4], 4294966784 }
  0x85   :  { %4181 = dma.done.wait [#allocation9], 1024  }
  0x86   :  { %4182 = vsyncadd [#allocation9], 4294966272 }
  0x87   :  { %4183 = dma.done.wait [#allocation12], 131328  }
  0x88   :  { %4184 = vsyncadd [#allocation12], 4294835968 }
  0x89   :  { %4185 = dma.done.wait [#allocation15], 4112  }
  0x8a   :  { %4186 = vsyncadd [#allocation15], 4294963184 }
  0x8b   :  { %137 = sfence }
  0x8c   :  { %v183_v0 = vld [vmem:[#allocation11 + $0x8] sm:$0xff]  ;;  %v185_v2 = vld [vmem:[#allocation11 + $0x18] sm:$0xff]  ;;  %v182_v5 = vld [vmem:[#allocation11] sm:$0xff]  ;;  %v4205_v7 = vmov 0.0   ;;  %s4378_s7 = sld [smem:[#allocation3]]  ;;  %s4380_s20 = sld [smem:[#allocation3 + $0x1]] }
  0x8d   :  { %v191_v1 = vld [vmem:[#allocation11 + $0x48] sm:$0xff]  ;;  %v193_v4 = vld [vmem:[#allocation11 + $0x58] sm:$0xff]  ;;  %v190_v6 = vld [vmem:[#allocation11 + $0x40] sm:$0xff]  ;;  %138 = vst [vmem:[#allocation2] sm:$0xff] %v4205_v7  ;;  %800 = vmatprep.mubr.f32.mxu0 %v4205_v7  ;;  %942 = vmatprep.mubr.f32.mxu1 %v4205_v7  ;;  %s4382_s11 = sld [smem:[#allocation3 + $0x2]]  ;;  %s4384_s12 = sld [smem:[#allocation3 + $0x3]] }
  0x8e   :  { %v2773_v3 = vpack.c.bf16 %v191_v1, %v183_v0  ;;  %v2901_v8 = vpack.c.bf16 %v193_v4, %v185_v2  ;;  %v2775_v9 = vpack.c.bf16 %v190_v6, %v182_v5  ;;  %v184_v10 = vld [vmem:[#allocation11 + $0x10] sm:$0xff]  ;;  %v199_v12 = vld [vmem:[#allocation11 + $0x88] sm:$0xff]  ;;  %v201_v15 = vld [vmem:[#allocation11 + $0x98] sm:$0xff]  ;;  %s4386_s13 = sld [smem:[#allocation3 + $0x4]]  ;;  %s4388_s4 = sld [smem:[#allocation3 + $0x5]] }
  0x8f   :  { %v192_v11 = vld [vmem:[#allocation11 + $0x50] sm:$0xff]  ;;  %v207_v14 = vld [vmem:[#allocation11 + $0xc8] sm:$0xff]  ;;  %v209_v16 = vld [vmem:[#allocation11 + $0xd8] sm:$0xff]  ;;  %s4390_s16 = sld [smem:[#allocation3 + $0x6]]  ;;  %s4392_s17 = sld [smem:[#allocation3 + $0x7]] }
  0x90   :  { %2774 = vmatprep.subr.bf16.mxu0 %v2773_v3  ;;  %v2903_v13 = vpack.c.bf16 %v192_v11, %v184_v10  ;;  %2902 = vmatprep.subr.bf16.mxu1 %v2901_v8  ;;  %v2777_v17 = vpack.c.bf16 %v207_v14, %v199_v12  ;;  %v2905_v18 = vpack.c.bf16 %v209_v16, %v201_v15  ;;  %v198_v19 = vld [vmem:[#allocation11 + $0x80] sm:$0xff]  ;;  %v200_v21 = vld [vmem:[#allocation11 + $0x90] sm:$0xff]  ;;  %v215_v24 = vld [vmem:[#allocation11 + $0x108] sm:$0xff]  ;;  %s4206_s27 = smov [#allocation18]  }
  0x91   :  { %2776 = vmatpush1.bf16.msra.mxu0 %v2775_v9  ;;  %v206_v20 = vld [vmem:[#allocation11 + $0xc0] sm:$0xff]  ;;  %v208_v23 = vld [vmem:[#allocation11 + $0xd0] sm:$0xff]  ;;  %v223_v25 = vld [vmem:[#allocation11 + $0x148] sm:$0xff]  ;;  %s2675_s29 = sshll.u32 %s4206_s27, 4  ;;  %s2676_s29 = int_to_ptr.vmem [resolvable:$true] %s2675_s29 }
  0x92   :  { %2904 = vmatpush1.bf16.msra.mxu1 %v2903_v13  ;;  %v2779_v22 = vpack.c.bf16 %v206_v20, %v198_v19  ;;  %2778 = vmatprep.subr.bf16.mxu0 %v2777_v17  ;;  %v2907_v26 = vpack.c.bf16 %v208_v23, %v200_v21  ;;  %v2781_v27 = vpack.c.bf16 %v223_v25, %v215_v24  ;;  %v217_v28 = vld [vmem:[#allocation11 + $0x118] sm:$0xff]  ;;  %v214_v30 = vld [vmem:[#allocation11 + $0x100] sm:$0xff]  ;;  %v216_v33 = vld [vmem:[#allocation11 + $0x110] sm:$0xff]  ;;  %s143_s0 = scalar_lea.vmem [#allocation7], %s4378_s7  ;;  %s147_s2 = scalar_lea.vmem [#allocation7], %s4380_s20 }
  0x93   :  { %2906 = vmatprep.subr.bf16.mxu1 %v2905_v18  ;;  %v225_v29 = vld [vmem:[#allocation11 + $0x158] sm:$0xff]  ;;  %v222_v32 = vld [vmem:[#allocation11 + $0x140] sm:$0xff]  ;;  %v224_v34 = vld [vmem:[#allocation11 + $0x150] sm:$0xff]  ;;  %s151_s14 = scalar_lea.vmem [#allocation7], %s4382_s11  ;;  %s155_s3 = scalar_lea.vmem [#allocation7], %s4384_s12 }
  0x94   :  { %v2909_v31 = vpack.c.bf16 %v225_v29, %v217_v28  ;;  %v2783_v35 = vpack.c.bf16 %v222_v32, %v214_v30  ;;  %v231_v36 = vld [vmem:[#allocation11 + $0x188] sm:$0xff]  ;;  %v233_v38 = vld [vmem:[#allocation11 + $0x198] sm:$0xff]  ;;  %v2911_v39 = vpack.c.bf16 %v224_v34, %v216_v33  ;;  %v230_v42 = vld [vmem:[#allocation11 + $0x180] sm:$0xff]  ;;  %s159_s18 = scalar_lea.vmem [#allocation7], %s4386_s13  ;;  %s163_s19 = scalar_lea.vmem [#allocation7], %s4388_s4 }
  0x95   :  { %2780 = vmatpush1.bf16.msra.mxu0 %v2779_v22  ;;  %v239_v37 = vld [vmem:[#allocation11 + $0x1c8] sm:$0xff]  ;;  %v241_v41 = vld [vmem:[#allocation11 + $0x1d8] sm:$0xff]  ;;  %v238_v43 = vld [vmem:[#allocation11 + $0x1c0] sm:$0xff]  ;;  %s167_s22 = scalar_lea.vmem [#allocation7], %s4390_s16  ;;  %s171_s26 = scalar_lea.vmem [#allocation7], %s4392_s17 }
  0x96   :  { %2908 = vmatpush1.bf16.msra.mxu1 %v2907_v26  ;;  %2782 = vmatprep.subr.bf16.mxu0 %v2781_v27  ;;  %v2785_v40 = vpack.c.bf16 %v239_v37, %v231_v36  ;;  %v2913_v44 = vpack.c.bf16 %v241_v41, %v233_v38  ;;  %v232_v45 = vld [vmem:[#allocation11 + $0x190] sm:$0xff]  ;;  %v247_v47 = vld [vmem:[#allocation11 + $0x208] sm:$0xff]  ;;  %v249_v49 = vld [vmem:[#allocation11 + $0x218] sm:$0xff]  ;;  %v2787_v51 = vpack.c.bf16 %v238_v43, %v230_v42  ;;  %s4111_s30 = scalar_lea.vmem %s2676_s29, 512  ;;  %p4116_p4 = scmp.lt.s32.totalorder %s2676_s29, %s2676_s29 }
  0x97   :  { %2910 = vmatprep.subr.bf16.mxu1 %v2909_v31  ;;  %v240_v46 = vld [vmem:[#allocation11 + $0x1d0] sm:$0xff]  ;;  %v255_v48 = vld [vmem:[#allocation11 + $0x248] sm:$0xff]  ;;  %v257_v50 = vld [vmem:[#allocation11 + $0x258] sm:$0xff]  ;;  %p4112_p3 = scmp.ne.s32.totalorder %s2676_s29, %s4111_s30  ;;  %p4117_p5 = scmp.lt.s32.totalorder %s4111_s30, %s4111_s30 }
  0x98   :  { %v2915_v52 = vpack.c.bf16 %v240_v46, %v232_v45  ;;  %v2789_v53 = vpack.c.bf16 %v255_v48, %v247_v47  ;;  %v246_v54 = vld [vmem:[#allocation11 + $0x200] sm:$0xff]  ;;  %v248_v56 = vld [vmem:[#allocation11 + $0x210] sm:$0xff]  ;;  %v2917_v57 = vpack.c.bf16 %v257_v50, %v249_v49  ;;  %v263_v59 = vld [vmem:[#allocation11 + $0x288] sm:$0xff] }
  0x99   :  { %2784 = vmatpush1.bf16.msra.mxu0 %v2783_v35  ;;  %v254_v55 = vld [vmem:[#allocation11 + $0x240] sm:$0xff]  ;;  %v256_v58 = vld [vmem:[#allocation11 + $0x250] sm:$0xff]  ;;  %v271_v60 = vld [vmem:[#allocation11 + $0x2c8] sm:$0xff]  ;;  %p4118_p6 = por %p4117_p5, %p4116_p4 }
  0x9a   :  { %2912 = vmatpush1.bf16.msra.mxu1 %v2911_v39  ;;  %2786 = vmatprep.subr.bf16.mxu0 %v2785_v40  ;;  %v265_v61 = vld [vmem:[#allocation11 + $0x298] sm:$0xff]  ;;  %v2791_v63 = vpack.c.bf16 %v254_v55, %v246_v54  ;;  %v2919_v0 = vpack.c.bf16 %v256_v58, %v248_v56  ;;  %v2793_v1 = vpack.c.bf16 %v271_v60, %v263_v59  ;;  %v262_v2 = vld [vmem:[#allocation11 + $0x280] sm:$0xff]  ;;  %v264_v4 = vld [vmem:[#allocation11 + $0x290] sm:$0xff] }
  0x9b   :  { %2914 = vmatprep.subr.bf16.mxu1 %v2913_v44  ;;  %v273_v62 = vld [vmem:[#allocation11 + $0x2d8] sm:$0xff]  ;;  %v270_v3 = vld [vmem:[#allocation11 + $0x2c0] sm:$0xff]  ;;  %v272_v6 = vld [vmem:[#allocation11 + $0x2d0] sm:$0xff]  ;;  %p4119_p7 = pnand %p4118_p6, %p4112_p3 }
  0x9c   :  { %v2921_v5 = vpack.c.bf16 %v273_v62, %v265_v61  ;;  %v279_v8 = vld [vmem:[#allocation11 + $0x308] sm:$0xff]  ;;  %v281_v10 = vld [vmem:[#allocation11 + $0x318] sm:$0xff]  ;;  %v2795_v12 = vpack.c.bf16 %v270_v3, %v262_v2  ;;  %v2923_v13 = vpack.c.bf16 %v272_v6, %v264_v4  ;;  %v278_v15 = vld [vmem:[#allocation11 + $0x300] sm:$0xff] }
  0x9d   :  { %2788 = vmatpush1.bf16.msra.mxu0 %v2787_v51  ;;  %v287_v9 = vld [vmem:[#allocation11 + $0x348] sm:$0xff]  ;;  %v289_v11 = vld [vmem:[#allocation11 + $0x358] sm:$0xff]  ;;  %v286_v16 = vld [vmem:[#allocation11 + $0x340] sm:$0xff] }
  0x9e   :  { %2916 = vmatpush1.bf16.msra.mxu1 %v2915_v52  ;;  %2790 = vmatprep.subr.bf16.mxu0 %v2789_v53  ;;  %v2797_v14 = vpack.c.bf16 %v287_v9, %v279_v8  ;;  %v280_v17 = vld [vmem:[#allocation11 + $0x310] sm:$0xff]  ;;  %v2925_v18 = vpack.c.bf16 %v289_v11, %v281_v10  ;;  %v295_v20 = vld [vmem:[#allocation11 + $0x388] sm:$0xff]  ;;  %v297_v22 = vld [vmem:[#allocation11 + $0x398] sm:$0xff]  ;;  %v2799_v24 = vpack.c.bf16 %v286_v16, %v278_v15 }
  0x9f   :  { %2918 = vmatprep.subr.bf16.mxu1 %v2917_v57  ;;  %v288_v19 = vld [vmem:[#allocation11 + $0x350] sm:$0xff]  ;;  %v303_v21 = vld [vmem:[#allocation11 + $0x3c8] sm:$0xff]  ;;  %v305_v23 = vld [vmem:[#allocation11 + $0x3d8] sm:$0xff] }
  0xa0   :  { %v2927_v25 = vpack.c.bf16 %v288_v19, %v280_v17  ;;  %v2801_v26 = vpack.c.bf16 %v303_v21, %v295_v20  ;;  %v294_v27 = vld [vmem:[#allocation11 + $0x380] sm:$0xff]  ;;  %v296_v29 = vld [vmem:[#allocation11 + $0x390] sm:$0xff]  ;;  %v2929_v30 = vpack.c.bf16 %v305_v23, %v297_v22  ;;  %v311_v32 = vld [vmem:[#allocation11 + $0x408] sm:$0xff] }
  0xa1   :  { %2792 = vmatpush1.bf16.msra.mxu0 %v2791_v63  ;;  %v302_v28 = vld [vmem:[#allocation11 + $0x3c0] sm:$0xff]  ;;  %v304_v31 = vld [vmem:[#allocation11 + $0x3d0] sm:$0xff]  ;;  %v319_v33 = vld [vmem:[#allocation11 + $0x448] sm:$0xff] }
  0xa2   :  { %2920 = vmatpush1.bf16.msra.mxu1 %v2919_v0  ;;  %2794 = vmatprep.subr.bf16.mxu0 %v2793_v1  ;;  %v313_v34 = vld [vmem:[#allocation11 + $0x418] sm:$0xff]  ;;  %v2803_v36 = vpack.c.bf16 %v302_v28, %v294_v27  ;;  %v2931_v37 = vpack.c.bf16 %v304_v31, %v296_v29  ;;  %v2805_v38 = vpack.c.bf16 %v319_v33, %v311_v32  ;;  %v310_v39 = vld [vmem:[#allocation11 + $0x400] sm:$0xff]  ;;  %v312_v41 = vld [vmem:[#allocation11 + $0x410] sm:$0xff] }
  0xa3   :  { %2922 = vmatprep.subr.bf16.mxu1 %v2921_v5  ;;  %v321_v35 = vld [vmem:[#allocation11 + $0x458] sm:$0xff]  ;;  %v318_v40 = vld [vmem:[#allocation11 + $0x440] sm:$0xff]  ;;  %v320_v43 = vld [vmem:[#allocation11 + $0x450] sm:$0xff] }
  0xa4   :  { %v2933_v42 = vpack.c.bf16 %v321_v35, %v313_v34  ;;  %v327_v44 = vld [vmem:[#allocation11 + $0x488] sm:$0xff]  ;;  %v329_v46 = vld [vmem:[#allocation11 + $0x498] sm:$0xff]  ;;  %v2807_v48 = vpack.c.bf16 %v318_v40, %v310_v39  ;;  %v2935_v49 = vpack.c.bf16 %v320_v43, %v312_v41  ;;  %v326_v51 = vld [vmem:[#allocation11 + $0x480] sm:$0xff] }
  0xa5   :  { %2796 = vmatpush1.bf16.msra.mxu0 %v2795_v12  ;;  %v335_v45 = vld [vmem:[#allocation11 + $0x4c8] sm:$0xff]  ;;  %v337_v47 = vld [vmem:[#allocation11 + $0x4d8] sm:$0xff]  ;;  %v334_v52 = vld [vmem:[#allocation11 + $0x4c0] sm:$0xff] }
  0xa6   :  { %2924 = vmatpush1.bf16.msra.mxu1 %v2923_v13  ;;  %2798 = vmatprep.subr.bf16.mxu0 %v2797_v14  ;;  %v2809_v50 = vpack.c.bf16 %v335_v45, %v327_v44  ;;  %v328_v53 = vld [vmem:[#allocation11 + $0x490] sm:$0xff]  ;;  %v2937_v54 = vpack.c.bf16 %v337_v47, %v329_v46  ;;  %v343_v56 = vld [vmem:[#allocation11 + $0x508] sm:$0xff]  ;;  %v345_v58 = vld [vmem:[#allocation11 + $0x518] sm:$0xff]  ;;  %v2811_v60 = vpack.c.bf16 %v334_v52, %v326_v51 }
  0xa7   :  { %2926 = vmatprep.subr.bf16.mxu1 %v2925_v18  ;;  %v336_v55 = vld [vmem:[#allocation11 + $0x4d0] sm:$0xff]  ;;  %v351_v57 = vld [vmem:[#allocation11 + $0x548] sm:$0xff]  ;;  %v353_v59 = vld [vmem:[#allocation11 + $0x558] sm:$0xff] }
  0xa8   :  { %v2939_v61 = vpack.c.bf16 %v336_v55, %v328_v53  ;;  %v2813_v62 = vpack.c.bf16 %v351_v57, %v343_v56  ;;  %v342_v63 = vld [vmem:[#allocation11 + $0x500] sm:$0xff]  ;;  %v344_v1 = vld [vmem:[#allocation11 + $0x510] sm:$0xff]  ;;  %v2941_v2 = vpack.c.bf16 %v353_v59, %v345_v58  ;;  %v359_v4 = vld [vmem:[#allocation11 + $0x588] sm:$0xff] }
  0xa9   :  { %2800 = vmatpush1.bf16.msra.mxu0 %v2799_v24  ;;  %v350_v0 = vld [vmem:[#allocation11 + $0x540] sm:$0xff]  ;;  %v352_v3 = vld [vmem:[#allocation11 + $0x550] sm:$0xff]  ;;  %v367_v5 = vld [vmem:[#allocation11 + $0x5c8] sm:$0xff] }
  0xaa   :  { %2928 = vmatpush1.bf16.msra.mxu1 %v2927_v25  ;;  %2802 = vmatprep.subr.bf16.mxu0 %v2801_v26  ;;  %v361_v6 = vld [vmem:[#allocation11 + $0x598] sm:$0xff]  ;;  %v2815_v9 = vpack.c.bf16 %v350_v0, %v342_v63  ;;  %v358_v10 = vld [vmem:[#allocation11 + $0x580] sm:$0xff]  ;;  %v2943_v11 = vpack.c.bf16 %v352_v3, %v344_v1  ;;  %v2817_v12 = vpack.c.bf16 %v367_v5, %v359_v4  ;;  %v360_v14 = vld [vmem:[#allocation11 + $0x590] sm:$0xff] }
  0xab   :  { %2930 = vmatprep.subr.bf16.mxu1 %v2929_v30  ;;  %v369_v8 = vld [vmem:[#allocation11 + $0x5d8] sm:$0xff]  ;;  %v366_v13 = vld [vmem:[#allocation11 + $0x5c0] sm:$0xff]  ;;  %v368_v15 = vld [vmem:[#allocation11 + $0x5d0] sm:$0xff] }
  0xac   :  { %v2945_v16 = vpack.c.bf16 %v369_v8, %v361_v6  ;;  %v375_v17 = vld [vmem:[#allocation11 + $0x608] sm:$0xff]  ;;  %v377_v19 = vld [vmem:[#allocation11 + $0x618] sm:$0xff]  ;;  %v374_v21 = vld [vmem:[#allocation11 + $0x600] sm:$0xff]  ;;  %v2819_v23 = vpack.c.bf16 %v366_v13, %v358_v10  ;;  %v2947_v30 = vpack.c.bf16 %v368_v15, %v360_v14 }
  0xad   :  { %2804 = vmatpush1.bf16.msra.mxu0 %v2803_v36  ;;  %v383_v18 = vld [vmem:[#allocation11 + $0x648] sm:$0xff]  ;;  %v385_v20 = vld [vmem:[#allocation11 + $0x658] sm:$0xff]  ;;  %v382_v22 = vld [vmem:[#allocation11 + $0x640] sm:$0xff] }
  0xae   :  { %2932 = vmatpush1.bf16.msra.mxu1 %v2931_v37  ;;  %2806 = vmatprep.subr.bf16.mxu0 %v2805_v38  ;;  %v376_v24 = vld [vmem:[#allocation11 + $0x610] sm:$0xff]  ;;  %v391_v26 = vld [vmem:[#allocation11 + $0x688] sm:$0xff]  ;;  %v144_v27 = vld [vmem:[%s143_s0] sm:$0x1]  ;;  %v2821_v31 = vpack.c.bf16 %v383_v18, %v375_v17  ;;  %v2949_v35 = vpack.c.bf16 %v385_v20, %v377_v19  ;;  %v2823_v41 = vpack.c.bf16 %v382_v22, %v374_v21 }
  0xaf   :  { %2934 = vmatprep.subr.bf16.mxu1 %v2933_v42  ;;  %v384_v25 = vld [vmem:[#allocation11 + $0x650] sm:$0xff]  ;;  %v148_v28 = vld [vmem:[%s147_s2] sm:$0x1]  ;;  %145 = vst [vmem:[#allocation2] sm:$0x1] %v144_v27  ;;  %v399_v36 = vld [vmem:[#allocation11 + $0x6c8] sm:$0xff] }
  0xb0   :  { %v152_v29 = vld [vmem:[%s151_s14] sm:$0x1]  ;;  %149 = vst [vmem:[#allocation2 + $0x1] sm:$0x1] %v148_v28  ;;  %v393_v39 = vld [vmem:[#allocation11 + $0x698] sm:$0xff]  ;;  %v2951_v42 = vpack.c.bf16 %v384_v25, %v376_v24  ;;  %v2825_v43 = vpack.c.bf16 %v399_v36, %v391_v26  ;;  %v392_v46 = vld [vmem:[#allocation11 + $0x690] sm:$0xff] }
  0xb1   :  { %2808 = vmatpush1.bf16.msra.mxu0 %v2807_v48  ;;  %153 = vst [vmem:[#allocation2 + $0x2] sm:$0x1] %v152_v29  ;;  %v156_v32 = vld [vmem:[%s155_s3] sm:$0x1]  ;;  %v401_v40 = vld [vmem:[#allocation11 + $0x6d8] sm:$0xff]  ;;  %v400_v48 = vld [vmem:[#allocation11 + $0x6d0] sm:$0xff] }
  0xb2   :  { %2936 = vmatpush1.bf16.msra.mxu1 %v2935_v49  ;;  %2810 = vmatprep.subr.bf16.mxu0 %v2809_v50  ;;  %v160_v33 = vld [vmem:[%s159_s18] sm:$0x1]  ;;  %157 = vst [vmem:[#allocation2 + $0x3] sm:$0x1] %v156_v32  ;;  %v2953_v47 = vpack.c.bf16 %v401_v40, %v393_v39  ;;  %v407_v49 = vld [vmem:[#allocation11 + $0x708] sm:$0xff]  ;;  %v409_v51 = vld [vmem:[#allocation11 + $0x718] sm:$0xff] }
  0xb3   :  { %2938 = vmatprep.subr.bf16.mxu1 %v2937_v54  ;;  %v164_v34 = vld [vmem:[%s163_s19] sm:$0x1]  ;;  %161 = vst [vmem:[#allocation2 + $0x4] sm:$0x1] %v160_v33  ;;  %v415_v50 = vld [vmem:[#allocation11 + $0x748] sm:$0xff]  ;;  %v417_v52 = vld [vmem:[#allocation11 + $0x758] sm:$0xff]  ;;  %v2955_v54 = vpack.c.bf16 %v400_v48, %v392_v46 }
  0xb4   :  { %165 = vst [vmem:[#allocation2 + $0x5] sm:$0x1] %v164_v34  ;;  %v168_v37 = vld [vmem:[%s167_s22] sm:$0x1]  ;;  %v2829_v55 = vpack.c.bf16 %v415_v50, %v407_v49  ;;  %v408_v58 = vld [vmem:[#allocation11 + $0x710] sm:$0xff]  ;;  %v2957_v59 = vpack.c.bf16 %v417_v52, %v409_v51  ;;  %v425_v63 = vld [vmem:[#allocation11 + $0x798] sm:$0xff] }
  0xb5   :  { %2812 = vmatpush1.bf16.msra.mxu0 %v2811_v60  ;;  %v172_v38 = vld [vmem:[%s171_s26] sm:$0x1]  ;;  %169 = vst [vmem:[#allocation2 + $0x6] sm:$0x1] %v168_v37  ;;  %v416_v60 = vld [vmem:[#allocation11 + $0x750] sm:$0xff]  ;;  %v433_v0 = vld [vmem:[#allocation11 + $0x7d8] sm:$0xff] }
  0xb6   :  { %2940 = vmatpush1.bf16.msra.mxu1 %v2939_v61  ;;  %2814 = vmatprep.subr.bf16.mxu0 %v2813_v62  ;;  %173 = vst [vmem:[#allocation2 + $0x7] sm:$0x1] %v172_v38  ;;  %v390_v44 = vld [vmem:[#allocation11 + $0x680] sm:$0xff]  ;;  %v423_v61 = vld [vmem:[#allocation11 + $0x788] sm:$0xff]  ;;  %v424_v6 = vld [vmem:[#allocation11 + $0x790] sm:$0xff]  ;;  %v2961_v8 = vpack.c.bf16 %v433_v0, %v425_v63 }
  0xb7   :  { %2942 = vmatprep.subr.bf16.mxu1 %v2941_v2  ;;  %v398_v45 = vld [vmem:[#allocation11 + $0x6c0] sm:$0xff]  ;;  %v431_v62 = vld [vmem:[#allocation11 + $0x7c8] sm:$0xff]  ;;  %v2959_v2 = vpack.c.bf16 %v416_v60, %v408_v58  ;;  %v449_v13 = vld [vmem:[#allocation11 + $0x858] sm:$0xff] }
  0xb8   :  { %v2827_v53 = vpack.c.bf16 %v398_v45, %v390_v44  ;;  %v406_v56 = vld [vmem:[#allocation11 + $0x700] sm:$0xff]  ;;  %v2833_v3 = vpack.c.bf16 %v431_v62, %v423_v61  ;;  %v439_v10 = vld [vmem:[#allocation11 + $0x808] sm:$0xff]  ;;  %v440_v19 = vld [vmem:[#allocation11 + $0x810] sm:$0xff] }
  0xb9   :  { %2816 = vmatpush1.bf16.msra.mxu0 %v2815_v9  ;;  %v414_v57 = vld [vmem:[#allocation11 + $0x740] sm:$0xff]  ;;  %v432_v9 = vld [vmem:[#allocation11 + $0x7d0] sm:$0xff]  ;;  %v455_v22 = vld [vmem:[#allocation11 + $0x888] sm:$0xff] }
  0xba   :  { %2944 = vmatpush1.bf16.msra.mxu1 %v2943_v11  ;;  %2818 = vmatprep.subr.bf16.mxu0 %v2817_v12  ;;  %v2831_v1 = vpack.c.bf16 %v414_v57, %v406_v56  ;;  %v422_v4 = vld [vmem:[#allocation11 + $0x780] sm:$0xff]  ;;  %v447_v11 = vld [vmem:[#allocation11 + $0x848] sm:$0xff]  ;;  %v441_v12 = vld [vmem:[#allocation11 + $0x818] sm:$0xff]  ;;  %v2963_v15 = vpack.c.bf16 %v432_v9, %v424_v6 }
  0xbb   :  { %2946 = vmatprep.subr.bf16.mxu1 %v2945_v16  ;;  %v430_v5 = vld [vmem:[#allocation11 + $0x7c0] sm:$0xff]  ;;  %v2837_v16 = vpack.c.bf16 %v447_v11, %v439_v10  ;;  %v2965_v20 = vpack.c.bf16 %v449_v13, %v441_v12  ;;  %v448_v21 = vld [vmem:[#allocation11 + $0x850] sm:$0xff]  ;;  %v457_v24 = vld [vmem:[#allocation11 + $0x898] sm:$0xff] }
  0xbc   :  { %v2835_v14 = vpack.c.bf16 %v430_v5, %v422_v4  ;;  %v438_v17 = vld [vmem:[#allocation11 + $0x800] sm:$0xff]  ;;  %v465_v25 = vld [vmem:[#allocation11 + $0x8d8] sm:$0xff]  ;;  %v2967_v28 = vpack.c.bf16 %v448_v21, %v440_v19  ;;  %v456_v32 = vld [vmem:[#allocation11 + $0x890] sm:$0xff] }
  0xbd   :  { %2820 = vmatpush1.bf16.msra.mxu0 %v2819_v23  ;;  %v446_v18 = vld [vmem:[#allocation11 + $0x840] sm:$0xff]  ;;  %v463_v23 = vld [vmem:[#allocation11 + $0x8c8] sm:$0xff]  ;;  %v2969_v33 = vpack.c.bf16 %v465_v25, %v457_v24  ;;  %v464_v34 = vld [vmem:[#allocation11 + $0x8d0] sm:$0xff] }
  0xbe   :  { %2948 = vmatpush1.bf16.msra.mxu1 %v2947_v30  ;;  %2822 = vmatprep.subr.bf16.mxu0 %v2821_v31  ;;  %v178_v26 = vld [vmem:[#allocation2] sm:$0xff]  ;;  %v2839_v27 = vpack.c.bf16 %v446_v18, %v438_v17  ;;  %v2841_v29 = vpack.c.bf16 %v463_v23, %v455_v22  ;;  %v479_v36 = vld [vmem:[#allocation11 + $0x948] sm:$0xff]  ;;  %v473_v37 = vld [vmem:[#allocation11 + $0x918] sm:$0xff]  ;;  %v2971_v40 = vpack.c.bf16 %v464_v34, %v456_v32 }
  0xbf   :  { %2950 = vmatprep.subr.bf16.mxu1 %v2949_v35  ;;  %v454_v30 = vld [vmem:[#allocation11 + $0x880] sm:$0xff]  ;;  %v471_v35 = vld [vmem:[#allocation11 + $0x908] sm:$0xff]  ;;  %v481_v38 = vld [vmem:[#allocation11 + $0x958] sm:$0xff] }
  0xc0   :  { %v462_v31 = vld [vmem:[#allocation11 + $0x8c0] sm:$0xff]  ;;  %v472_v44 = vld [vmem:[#allocation11 + $0x910] sm:$0xff]  ;;  %v2973_v45 = vpack.c.bf16 %v481_v38, %v473_v37  ;;  %v495_v48 = vld [vmem:[#allocation11 + $0x9c8] sm:$0xff] }
  0xc1   :  { %2824 = vmatpush1.bf16.msra.mxu0 %v2823_v41  ;;  %v2843_v39 = vpack.c.bf16 %v462_v31, %v454_v30  ;;  %v2845_v41 = vpack.c.bf16 %v479_v36, %v471_v35  ;;  %v480_v46 = vld [vmem:[#allocation11 + $0x950] sm:$0xff]  ;;  %v489_v49 = vld [vmem:[#allocation11 + $0x998] sm:$0xff]  ;;  %v511_v60 = vld [vmem:[#allocation11 + $0xa48] sm:$0xff] }
  0xc2   :  { %2952 = vmatpush1.bf16.msra.mxu1 %v2951_v42  ;;  %2826 = vmatprep.subr.bf16.mxu0 %v2825_v43  ;;  %v470_v42 = vld [vmem:[#allocation11 + $0x900] sm:$0xff]  ;;  %v497_v50 = vld [vmem:[#allocation11 + $0x9d8] sm:$0xff]  ;;  %v2975_v52 = vpack.c.bf16 %v480_v46, %v472_v44  ;;  %v488_v56 = vld [vmem:[#allocation11 + $0x990] sm:$0xff] }
  0xc3   :  { %2954 = vmatprep.subr.bf16.mxu1 %v2953_v47  ;;  %v478_v43 = vld [vmem:[#allocation11 + $0x940] sm:$0xff]  ;;  %v487_v47 = vld [vmem:[#allocation11 + $0x988] sm:$0xff]  ;;  %v2977_v57 = vpack.c.bf16 %v497_v50, %v489_v49  ;;  %v496_v58 = vld [vmem:[#allocation11 + $0x9d0] sm:$0xff] }
  0xc4   :  { %v2847_v51 = vpack.c.bf16 %v478_v43, %v470_v42  ;;  %v505_v61 = vld [vmem:[#allocation11 + $0xa18] sm:$0xff]  ;;  %v2979_v0 = vpack.c.bf16 %v496_v58, %v488_v56  ;;  %v504_v4 = vld [vmem:[#allocation11 + $0xa10] sm:$0xff]  ;;  %v527_v9 = vld [vmem:[#allocation11 + $0xac8] sm:$0xff] }
  0xc5   :  { %2828 = vmatpush1.bf16.msra.mxu0 %v2827_v53  ;;  %v2849_v53 = vpack.c.bf16 %v495_v48, %v487_v47  ;;  %v513_v62 = vld [vmem:[#allocation11 + $0xa58] sm:$0xff]  ;;  %v512_v6 = vld [vmem:[#allocation11 + $0xa50] sm:$0xff]  ;;  %v543_v21 = vld [vmem:[#allocation11 + $0xb48] sm:$0xff] }
  0xc6   :  { %2956 = vmatpush1.bf16.msra.mxu1 %v2955_v54  ;;  %2830 = vmatprep.subr.bf16.mxu0 %v2829_v55  ;;  %v486_v54 = vld [vmem:[#allocation11 + $0x980] sm:$0xff]  ;;  %v2981_v5 = vpack.c.bf16 %v513_v62, %v505_v61  ;;  %v521_v10 = vld [vmem:[#allocation11 + $0xa98] sm:$0xff]  ;;  %v2983_v13 = vpack.c.bf16 %v512_v6, %v504_v4  ;;  %v520_v17 = vld [vmem:[#allocation11 + $0xa90] sm:$0xff] }
  0xc7   :  { %2958 = vmatprep.subr.bf16.mxu1 %v2957_v59  ;;  %v494_v55 = vld [vmem:[#allocation11 + $0x9c0] sm:$0xff]  ;;  %v503_v59 = vld [vmem:[#allocation11 + $0xa08] sm:$0xff]  ;;  %v529_v11 = vld [vmem:[#allocation11 + $0xad8] sm:$0xff] }
  0xc8   :  { %v2851_v63 = vpack.c.bf16 %v494_v55, %v486_v54  ;;  %v2985_v18 = vpack.c.bf16 %v529_v11, %v521_v10  ;;  %v528_v19 = vld [vmem:[#allocation11 + $0xad0] sm:$0xff]  ;;  %v537_v22 = vld [vmem:[#allocation11 + $0xb18] sm:$0xff]  ;;  %v551_v32 = vld [vmem:[#allocation11 + $0xb88] sm:$0xff] }
  0xc9   :  { %2832 = vmatpush1.bf16.msra.mxu0 %v2831_v1  ;;  %v2853_v1 = vpack.c.bf16 %v511_v60, %v503_v59  ;;  %v545_v23 = vld [vmem:[#allocation11 + $0xb58] sm:$0xff]  ;;  %v2987_v25 = vpack.c.bf16 %v528_v19, %v520_v17  ;;  %v544_v31 = vld [vmem:[#allocation11 + $0xb50] sm:$0xff]  ;;  %v550_v37 = vld [vmem:[#allocation11 + $0xb80] sm:$0xff] }
  0xca   :  { %2960 = vmatpush1.bf16.msra.mxu1 %v2959_v2  ;;  %2834 = vmatprep.subr.bf16.mxu0 %v2833_v3  ;;  %v502_v2 = vld [vmem:[#allocation11 + $0xa00] sm:$0xff]  ;;  %v2989_v30 = vpack.c.bf16 %v545_v23, %v537_v22  ;;  %v553_v34 = vld [vmem:[#allocation11 + $0xb98] sm:$0xff]  ;;  %v4402_v38 = vld [vmem:[#allocation8 + $0x8] sm:$0xff] }
  0xcb   :  { %2962 = vmatprep.subr.bf16.mxu1 %v2961_v8  ;;  %v510_v3 = vld [vmem:[#allocation11 + $0xa40] sm:$0xff]  ;;  %v519_v8 = vld [vmem:[#allocation11 + $0xa88] sm:$0xff]  ;;  %v561_v35 = vld [vmem:[#allocation11 + $0xbd8] sm:$0xff] }
  0xcc   :  { %v2855_v12 = vpack.c.bf16 %v510_v3, %v502_v2  ;;  %v558_v42 = vld [vmem:[#allocation11 + $0xbc0] sm:$0xff]  ;;  %v552_v43 = vld [vmem:[#allocation11 + $0xb90] sm:$0xff]  ;;  %v567_v47 = vld [vmem:[#allocation11 + $0xc08] sm:$0xff] }
  0xcd   :  { %2836 = vmatpush1.bf16.msra.mxu0 %v2835_v14  ;;  %v2857_v14 = vpack.c.bf16 %v527_v9, %v519_v8  ;;  %v1361_v44 = vld [vmem:[#allocation8 + $0x10] sm:$0xff]  ;;  %v575_v48 = vld [vmem:[#allocation11 + $0xc48] sm:$0xff]  ;;  %v569_v49 = vld [vmem:[#allocation11 + $0xc18] sm:$0xff] }
  0xce   :  { %2964 = vmatpush1.bf16.msra.mxu1 %v2963_v15  ;;  %2838 = vmatprep.subr.bf16.mxu0 %v2837_v16  ;;  %v518_v15 = vld [vmem:[#allocation11 + $0xa80] sm:$0xff]  ;;  %v560_v46 = vld [vmem:[#allocation11 + $0xbd0] sm:$0xff]  ;;  %1363 = vst [vmem:[#allocation2 + $0x10] sm:$0xff] %v1361_v44  ;;  %v577_v50 = vld [vmem:[#allocation11 + $0xc58] sm:$0xff] }
  0xcf   :  { %2966 = vmatprep.subr.bf16.mxu1 %v2965_v20  ;;  %v526_v16 = vld [vmem:[#allocation11 + $0xac0] sm:$0xff]  ;;  %v535_v20 = vld [vmem:[#allocation11 + $0xb08] sm:$0xff]  ;;  %v568_v56 = vld [vmem:[#allocation11 + $0xc10] sm:$0xff] }
  0xd0   :  { %801 = vmatmul.mubr.f32.vlgmr.msra.gmra.mrb[0].mxu0 %v178_v26  ;;  %v2859_v24 = vpack.c.bf16 %v526_v16, %v518_v15  ;;  %v566_v54 = vld [vmem:[#allocation11 + $0xc00] sm:$0xff]  ;;  %v576_v58 = vld [vmem:[#allocation11 + $0xc50] sm:$0xff]  ;;  %v583_v59 = vld [vmem:[#allocation11 + $0xc88] sm:$0xff] }
  0xd1   :  { %2840 = vmatpush1.bf16.msra.mxu0 %v2839_v27  ;;  %943 = vmatmul.mubr.f32.vlgmr.msra.gmra.mrb[0].mxu1 %v178_v26  ;;  %v2861_v26 = vpack.c.bf16 %v543_v21, %v535_v20  ;;  %v534_v27 = vld [vmem:[#allocation11 + $0xb00] sm:$0xff]  ;;  %v591_v60 = vld [vmem:[#allocation11 + $0xcc8] sm:$0xff]  ;;  %v585_v61 = vld [vmem:[#allocation11 + $0xc98] sm:$0xff] }
  0xd2   :  { %2968 = vmatpush1.bf16.msra.mxu1 %v2967_v28  ;;  %2842 = vmatprep.subr.bf16.mxu0 %v2841_v29  ;;  %v542_v28 = vld [vmem:[#allocation11 + $0xb40] sm:$0xff]  ;;  %v536_v29 = vld [vmem:[#allocation11 + $0xb10] sm:$0xff]  ;;  %v593_v62 = vld [vmem:[#allocation11 + $0xcd8] sm:$0xff] }
  0xd3   :  { %2970 = vmatprep.subr.bf16.mxu1 %v2969_v33  ;;  %v559_v33 = vld [vmem:[#allocation11 + $0xbc8] sm:$0xff]  ;;  %v2863_v36 = vpack.c.bf16 %v542_v28, %v534_v27  ;;  %871 = vmatprep.mubr.f32.mxu0 %v4402_v38  ;;  %v574_v55 = vld [vmem:[#allocation11 + $0xc40] sm:$0xff]  ;;  %v584_v4 = vld [vmem:[#allocation11 + $0xc90] sm:$0xff] }
  0xd4   :  { %1013 = vmatprep.mubr.f32.mxu1 %v4402_v38  ;;  %v582_v2 = vld [vmem:[#allocation11 + $0xc80] sm:$0xff]  ;;  %v592_v6 = vld [vmem:[#allocation11 + $0xcd0] sm:$0xff]  ;;  %v599_v8 = vld [vmem:[#allocation11 + $0xd08] sm:$0xff] }
  0xd5   :  { %2844 = vmatpush1.bf16.msra.mxu0 %v2843_v39  ;;  %v1362_v39 = vld [vmem:[#allocation8 + $0x18] sm:$0xff]  ;;  %v590_v3 = vld [vmem:[#allocation11 + $0xcc0] sm:$0xff]  ;;  %v607_v9 = vld [vmem:[#allocation11 + $0xd48] sm:$0xff] }
  0xd6   :  { %2972 = vmatpush1.bf16.msra.mxu1 %v2971_v40  ;;  %2846 = vmatprep.subr.bf16.mxu0 %v2845_v41  ;;  %v2991_v40 = vpack.c.bf16 %v544_v31, %v536_v29  ;;  %v2865_v41 = vpack.c.bf16 %v559_v33, %v551_v32  ;;  %1364 = vst [vmem:[#allocation2 + $0x18] sm:$0xff] %v1362_v39  ;;  %v601_v10 = vld [vmem:[#allocation11 + $0xd18] sm:$0xff]  ;;  %v598_v15 = vld [vmem:[#allocation11 + $0xd00] sm:$0xff]  ;;  %v600_v17 = vld [vmem:[#allocation11 + $0xd10] sm:$0xff] }
  0xd7   :  { %2974 = vmatprep.subr.bf16.mxu1 %v2973_v45  ;;  %v2993_v45 = vpack.c.bf16 %v561_v35, %v553_v34  ;;  %v609_v11 = vld [vmem:[#allocation11 + $0xd58] sm:$0xff]  ;;  %v606_v16 = vld [vmem:[#allocation11 + $0xd40] sm:$0xff]  ;;  %v608_v19 = vld [vmem:[#allocation11 + $0xd50] sm:$0xff] }
  0xd8   :  { %v615_v20 = vld [vmem:[#allocation11 + $0xd88] sm:$0xff]  ;;  %v617_v22 = vld [vmem:[#allocation11 + $0xd98] sm:$0xff]  ;;  %v614_v27 = vld [vmem:[#allocation11 + $0xd80] sm:$0xff] }
  0xd9   :  { %2848 = vmatpush1.bf16.msra.mxu0 %v2847_v51  ;;  %v2867_v51 = vpack.c.bf16 %v558_v42, %v550_v37  ;;  %v623_v21 = vld [vmem:[#allocation11 + $0xdc8] sm:$0xff]  ;;  %v625_v23 = vld [vmem:[#allocation11 + $0xdd8] sm:$0xff]  ;;  %v622_v28 = vld [vmem:[#allocation11 + $0xdc0] sm:$0xff] }
  0xda   :  { %2976 = vmatpush1.bf16.msra.mxu1 %v2975_v52  ;;  %2850 = vmatprep.subr.bf16.mxu0 %v2849_v53  ;;  %v2995_v52 = vpack.c.bf16 %v560_v46, %v552_v43  ;;  %v2869_v53 = vpack.c.bf16 %v575_v48, %v567_v47  ;;  %v616_v29 = vld [vmem:[#allocation11 + $0xd90] sm:$0xff]  ;;  %v631_v32 = vld [vmem:[#allocation11 + $0xe08] sm:$0xff]  ;;  %v633_v34 = vld [vmem:[#allocation11 + $0xe18] sm:$0xff] }
  0xdb   :  { %2978 = vmatprep.subr.bf16.mxu1 %v2977_v57  ;;  %v2997_v57 = vpack.c.bf16 %v577_v50, %v569_v49  ;;  %v624_v31 = vld [vmem:[#allocation11 + $0xdd0] sm:$0xff]  ;;  %v639_v33 = vld [vmem:[#allocation11 + $0xe48] sm:$0xff]  ;;  %v641_v35 = vld [vmem:[#allocation11 + $0xe58] sm:$0xff] }
  0xdc   :  { %v3011_v37 = vpack.c.bf16 %v624_v31, %v616_v29  ;;  %v2885_v39 = vpack.c.bf16 %v639_v33, %v631_v32  ;;  %v632_v42 = vld [vmem:[#allocation11 + $0xe10] sm:$0xff]  ;;  %v3013_v43 = vpack.c.bf16 %v641_v35, %v633_v34  ;;  %v655_v46 = vld [vmem:[#allocation11 + $0xec8] sm:$0xff]  ;;  %v649_v47 = vld [vmem:[#allocation11 + $0xe98] sm:$0xff] }
  0xdd   :  { %2852 = vmatpush1.bf16.msra.mxu0 %v2851_v63  ;;  %v2871_v63 = vpack.c.bf16 %v574_v55, %v566_v54  ;;  %v640_v44 = vld [vmem:[#allocation11 + $0xe50] sm:$0xff]  ;;  %v657_v48 = vld [vmem:[#allocation11 + $0xed8] sm:$0xff]  ;;  %v211_v31 = vld [vmem:[#allocation11 + $0xe8] sm:$0xff] }
  0xde   :  { %2980 = vmatpush1.bf16.msra.mxu1 %v2979_v0  ;;  %2854 = vmatprep.subr.bf16.mxu0 %v2853_v1  ;;  %v2999_v0 = vpack.c.bf16 %v576_v58, %v568_v56  ;;  %v2873_v1 = vpack.c.bf16 %v591_v60, %v583_v59  ;;  %v3015_v50 = vpack.c.bf16 %v640_v44, %v632_v42  ;;  %v648_v54 = vld [vmem:[#allocation11 + $0xe90] sm:$0xff]  ;;  %v671_v58 = vld [vmem:[#allocation11 + $0xf48] sm:$0xff]  ;;  %v665_v59 = vld [vmem:[#allocation11 + $0xf18] sm:$0xff] }
  0xdf   :  { %2982 = vmatprep.subr.bf16.mxu1 %v2981_v5  ;;  %v3001_v5 = vpack.c.bf16 %v593_v62, %v585_v61  ;;  %v3017_v55 = vpack.c.bf16 %v657_v48, %v649_v47  ;;  %v656_v56 = vld [vmem:[#allocation11 + $0xed0] sm:$0xff]  ;;  %v673_v60 = vld [vmem:[#allocation11 + $0xf58] sm:$0xff]  ;;  %v174_v34 = vld [vmem:[#allocation8] sm:$0xff] }
  0xe0   :  { %v3019_v62 = vpack.c.bf16 %v656_v56, %v648_v54  ;;  %v196_v29 = vld [vmem:[#allocation11 + $0x70] sm:$0xff]  ;;  %v205_v32 = vld [vmem:[#allocation11 + $0xb8] sm:$0xff]  ;;  %v219_v44 = vld [vmem:[#allocation11 + $0x128] sm:$0xff] }
  0xe1   :  { %2856 = vmatpush1.bf16.msra.mxu0 %v2855_v12  ;;  %v2875_v12 = vpack.c.bf16 %v590_v3, %v582_v2  ;;  %v664_v2 = vld [vmem:[#allocation11 + $0xf10] sm:$0xff]  ;;  %v3021_v3 = vpack.c.bf16 %v673_v60, %v665_v59  ;;  %v213_v33 = vld [vmem:[#allocation11 + $0xf8] sm:$0xff]  ;;  %v235_v56 = vld [vmem:[#allocation11 + $0x1a8] sm:$0xff] }
  0xe2   :  { %2984 = vmatpush1.bf16.msra.mxu1 %v2983_v13  ;;  %2858 = vmatprep.subr.bf16.mxu0 %v2857_v14  ;;  %v3003_v13 = vpack.c.bf16 %v592_v6, %v584_v4  ;;  %v2877_v14 = vpack.c.bf16 %v607_v9, %v599_v8  ;;  %v672_v4 = vld [vmem:[#allocation11 + $0xf50] sm:$0xff]  ;;  %v687_v6 = vld [vmem:[#allocation11 + $0xfc8] sm:$0xff]  ;;  %v681_v8 = vld [vmem:[#allocation11 + $0xf98] sm:$0xff]  ;;  %v3161_v42 = vpack.c.bf16 %v213_v33, %v205_v32 }
  0xe3   :  { %2986 = vmatprep.subr.bf16.mxu1 %v2985_v18  ;;  %v3005_v18 = vpack.c.bf16 %v609_v11, %v601_v10  ;;  %v689_v9 = vld [vmem:[#allocation11 + $0xfd8] sm:$0xff]  ;;  %v3023_v11 = vpack.c.bf16 %v672_v4, %v664_v2  ;;  %v251_v4 = vld [vmem:[#allocation11 + $0x228] sm:$0xff] }
  0xe4   :  { %v229_v47 = vld [vmem:[#allocation11 + $0x178] sm:$0xff] }
  0xe5   :  { %2860 = vmatpush1.bf16.msra.mxu0 %v2859_v24  ;;  %v2879_v24 = vpack.c.bf16 %v606_v16, %v598_v15  ;;  %v680_v15 = vld [vmem:[#allocation11 + $0xf90] sm:$0xff]  ;;  %v3025_v16 = vpack.c.bf16 %v689_v9, %v681_v8  ;;  %v245_v59 = vld [vmem:[#allocation11 + $0x1f8] sm:$0xff] }
  0xe6   :  { %2988 = vmatpush1.bf16.msra.mxu1 %v2987_v25  ;;  %2862 = vmatprep.subr.bf16.mxu0 %v2861_v26  ;;  %v3007_v25 = vpack.c.bf16 %v608_v19, %v600_v17  ;;  %v2881_v26 = vpack.c.bf16 %v623_v21, %v615_v20  ;;  %v688_v17 = vld [vmem:[#allocation11 + $0xfd0] sm:$0xff]  ;;  %v195_v19 = vld [vmem:[#allocation11 + $0x68] sm:$0xff]  ;;  %v189_v20 = vld [vmem:[#allocation11 + $0x38] sm:$0xff] }
  0xe7   :  { %2990 = vmatprep.subr.bf16.mxu1 %v2989_v30  ;;  %v3009_v30 = vpack.c.bf16 %v625_v23, %v617_v22  ;;  %v197_v21 = vld [vmem:[#allocation11 + $0x78] sm:$0xff]  ;;  %v3027_v23 = vpack.c.bf16 %v688_v17, %v680_v15  ;;  %v260_v15 = vld [vmem:[#allocation11 + $0x270] sm:$0xff]  ;;  %v275_v17 = vld [vmem:[#allocation11 + $0x2e8] sm:$0xff] }
  0xe8   :  { %v261_v8 = vld [vmem:[#allocation11 + $0x278] sm:$0xff] }
  0xe9   :  { %2864 = vmatpush1.bf16.msra.mxu0 %v2863_v36  ;;  %v2883_v36 = vpack.c.bf16 %v622_v28, %v614_v27  ;;  %v188_v27 = vld [vmem:[#allocation11 + $0x30] sm:$0xff]  ;;  %v3157_v28 = vpack.c.bf16 %v197_v21, %v189_v20 }
  0xea   :  { %2992 = vmatpush1.bf16.msra.mxu1 %v2991_v40  ;;  %2866 = vmatprep.subr.bf16.mxu0 %v2865_v41  ;;  %v630_v40 = vld [vmem:[#allocation11 + $0xe00] sm:$0xff] }
  0xeb   :  { %2994 = vmatprep.subr.bf16.mxu1 %v2993_v45  ;;  %v638_v41 = vld [vmem:[#allocation11 + $0xe40] sm:$0xff]  ;;  %v647_v45 = vld [vmem:[#allocation11 + $0xe88] sm:$0xff] }
  0xec   :  { %v2887_v49 = vpack.c.bf16 %v638_v41, %v630_v40  ;;  %v210_v40 = vld [vmem:[#allocation11 + $0xe0] sm:$0xff]  ;;  %v204_v41 = vld [vmem:[#allocation11 + $0xb0] sm:$0xff] }
  0xed   :  { %2868 = vmatpush1.bf16.msra.mxu0 %v2867_v51  ;;  %v2889_v51 = vpack.c.bf16 %v655_v46, %v647_v45  ;;  %v227_v45 = vld [vmem:[#allocation11 + $0x168] sm:$0xff]  ;;  %v221_v46 = vld [vmem:[#allocation11 + $0x138] sm:$0xff] }
  0xee   :  { %2996 = vmatpush1.bf16.msra.mxu1 %v2995_v52  ;;  %2870 = vmatprep.subr.bf16.mxu0 %v2869_v53  ;;  %v646_v52 = vld [vmem:[#allocation11 + $0xe80] sm:$0xff]  ;;  %v3165_v54 = vpack.c.bf16 %v229_v47, %v221_v46 }
  0xef   :  { %2998 = vmatprep.subr.bf16.mxu1 %v2997_v57  ;;  %v654_v53 = vld [vmem:[#allocation11 + $0xec0] sm:$0xff]  ;;  %v663_v57 = vld [vmem:[#allocation11 + $0xf08] sm:$0xff] }
  0xf0   :  { %v2891_v61 = vpack.c.bf16 %v654_v53, %v646_v52  ;;  %v226_v52 = vld [vmem:[#allocation11 + $0x160] sm:$0xff]  ;;  %v220_v53 = vld [vmem:[#allocation11 + $0x130] sm:$0xff] }
  0xf1   :  { %2872 = vmatpush1.bf16.msra.mxu0 %v2871_v63  ;;  %v2893_v63 = vpack.c.bf16 %v671_v58, %v663_v57  ;;  %v243_v57 = vld [vmem:[#allocation11 + $0x1e8] sm:$0xff]  ;;  %v237_v58 = vld [vmem:[#allocation11 + $0x1b8] sm:$0xff] }
  0xf2   :  { %3000 = vmatpush1.bf16.msra.mxu1 %v2999_v0  ;;  %2874 = vmatprep.subr.bf16.mxu0 %v2873_v1  ;;  %v662_v0 = vld [vmem:[#allocation11 + $0xf00] sm:$0xff]  ;;  %v3169_v2 = vpack.c.bf16 %v245_v59, %v237_v58 }
  0xf3   :  { %3002 = vmatprep.subr.bf16.mxu1 %v3001_v5  ;;  %v670_v1 = vld [vmem:[#allocation11 + $0xf40] sm:$0xff]  ;;  %v679_v5 = vld [vmem:[#allocation11 + $0xf88] sm:$0xff] }
  0xf4   :  { %v2895_v10 = vpack.c.bf16 %v670_v1, %v662_v0  ;;  %v242_v0 = vld [vmem:[#allocation11 + $0x1e0] sm:$0xff]  ;;  %v236_v1 = vld [vmem:[#allocation11 + $0x1b0] sm:$0xff] }
  0xf5   :  { %2876 = vmatpush1.bf16.msra.mxu0 %v2875_v12  ;;  %v2897_v12 = vpack.c.bf16 %v687_v6, %v679_v5  ;;  %v259_v5 = vld [vmem:[#allocation11 + $0x268] sm:$0xff]  ;;  %v253_v6 = vld [vmem:[#allocation11 + $0x238] sm:$0xff] }
  0xf6   :  { %3004 = vmatpush1.bf16.msra.mxu1 %v3003_v13  ;;  %2878 = vmatprep.subr.bf16.mxu0 %v2877_v14  ;;  %v678_v13 = vld [vmem:[#allocation11 + $0xf80] sm:$0xff] }
  0xf7   :  { %3006 = vmatprep.subr.bf16.mxu1 %v3005_v18  ;;  %v686_v14 = vld [vmem:[#allocation11 + $0xfc0] sm:$0xff]  ;;  %v187_v18 = vld [vmem:[#allocation11 + $0x28] sm:$0xff] }
  0xf8   :  { %v2899_v22 = vpack.c.bf16 %v686_v14, %v678_v13  ;;  %v252_v13 = vld [vmem:[#allocation11 + $0x230] sm:$0xff]  ;;  %v3173_v14 = vpack.c.bf16 %v261_v8, %v253_v6 }
  0xf9   :  { %2880 = vmatpush1.bf16.msra.mxu0 %v2879_v24  ;;  %v3029_v24 = vpack.c.bf16 %v195_v19, %v187_v18  ;;  %v269_v18 = vld [vmem:[#allocation11 + $0x2b8] sm:$0xff]  ;;  %v3175_v21 = vpack.c.bf16 %v260_v15, %v252_v13  ;;  %v347_v13 = vld [vmem:[#allocation11 + $0x528] sm:$0xff] }
  0xfa   :  { %3008 = vmatpush1.bf16.msra.mxu1 %v3007_v25  ;;  %2882 = vmatprep.subr.bf16.mxu0 %v2881_v26  ;;  %v186_v25 = vld [vmem:[#allocation11 + $0x20] sm:$0xff]  ;;  %v277_v19 = vld [vmem:[#allocation11 + $0x2f8] sm:$0xff] }
  0xfb   :  { %3010 = vmatprep.subr.bf16.mxu1 %v3009_v30  ;;  %v194_v26 = vld [vmem:[#allocation11 + $0x60] sm:$0xff]  ;;  %v203_v30 = vld [vmem:[#allocation11 + $0xa8] sm:$0xff]  ;;  %v349_v15 = vld [vmem:[#allocation11 + $0x538] sm:$0xff] }
  0xfc   :  { %v3031_v35 = vpack.c.bf16 %v194_v26, %v186_v25  ;;  %v268_v25 = vld [vmem:[#allocation11 + $0x2b0] sm:$0xff]  ;;  %v3177_v26 = vpack.c.bf16 %v277_v19, %v269_v18 }
  0xfd   :  { %2884 = vmatpush1.bf16.msra.mxu0 %v2883_v36  ;;  %v3159_v36 = vpack.c.bf16 %v196_v29, %v188_v27  ;;  %v276_v27 = vld [vmem:[#allocation11 + $0x2f0] sm:$0xff]  ;;  %v291_v29 = vld [vmem:[#allocation11 + $0x368] sm:$0xff] }
  0xfe   :  { %3012 = vmatpush1.bf16.msra.mxu1 %v3011_v37  ;;  %2886 = vmatprep.subr.bf16.mxu0 %v2885_v39  ;;  %v3033_v37 = vpack.c.bf16 %v211_v31, %v203_v30  ;;  %v202_v39 = vld [vmem:[#allocation11 + $0xa0] sm:$0xff]  ;;  %v285_v30 = vld [vmem:[#allocation11 + $0x338] sm:$0xff]  ;;  %v3179_v33 = vpack.c.bf16 %v276_v27, %v268_v25  ;;  %v363_v25 = vld [vmem:[#allocation11 + $0x5a8] sm:$0xff] }
  0xff   :  { %3014 = vmatprep.subr.bf16.mxu1 %v3013_v43  ;;  %v212_v43 = vld [vmem:[#allocation11 + $0xf0] sm:$0xff]  ;;  %v3035_v48 = vpack.c.bf16 %v210_v40, %v202_v39  ;;  %v293_v31 = vld [vmem:[#allocation11 + $0x378] sm:$0xff] }
 0x100   :  { %v3181_v39 = vpack.c.bf16 %v293_v31, %v285_v30  ;;  %v292_v40 = vld [vmem:[#allocation11 + $0x370] sm:$0xff]  ;;  %v365_v27 = vld [vmem:[#allocation11 + $0x5b8] sm:$0xff] }
 0x101   :  { %2888 = vmatpush1.bf16.msra.mxu0 %v2887_v49  ;;  %v3163_v49 = vpack.c.bf16 %v212_v43, %v204_v41  ;;  %v299_v41 = vld [vmem:[#allocation11 + $0x3a8] sm:$0xff]  ;;  %v301_v43 = vld [vmem:[#allocation11 + $0x3b8] sm:$0xff] }
 0x102   :  { %3016 = vmatpush1.bf16.msra.mxu1 %v3015_v50  ;;  %2890 = vmatprep.subr.bf16.mxu0 %v2889_v51  ;;  %v3037_v50 = vpack.c.bf16 %v227_v45, %v219_v44  ;;  %v218_v51 = vld [vmem:[#allocation11 + $0x120] sm:$0xff]  ;;  %v309_v44 = vld [vmem:[#allocation11 + $0x3f8] sm:$0xff] }
 0x103   :  { %3018 = vmatprep.subr.bf16.mxu1 %v3017_v55  ;;  %v228_v55 = vld [vmem:[#allocation11 + $0x170] sm:$0xff]  ;;  %v3039_v60 = vpack.c.bf16 %v226_v52, %v218_v51  ;;  %v3185_v51 = vpack.c.bf16 %v309_v44, %v301_v43 }
 0x104   :  { %v308_v52 = vld [vmem:[#allocation11 + $0x3f0] sm:$0xff] }
 0x105   :  { %2892 = vmatpush1.bf16.msra.mxu0 %v2891_v61  ;;  %v3167_v61 = vpack.c.bf16 %v228_v55, %v220_v53  ;;  %v315_v53 = vld [vmem:[#allocation11 + $0x428] sm:$0xff]  ;;  %v317_v55 = vld [vmem:[#allocation11 + $0x438] sm:$0xff] }
 0x106   :  { %3020 = vmatpush1.bf16.msra.mxu1 %v3019_v62  ;;  %2894 = vmatprep.subr.bf16.mxu0 %v2893_v63  ;;  %v3041_v62 = vpack.c.bf16 %v243_v57, %v235_v56  ;;  %v234_v63 = vld [vmem:[#allocation11 + $0x1a0] sm:$0xff]  ;;  %v325_v56 = vld [vmem:[#allocation11 + $0x478] sm:$0xff] }
 0x107   :  { %3022 = vmatprep.subr.bf16.mxu1 %v3021_v3  ;;  %v244_v3 = vld [vmem:[#allocation11 + $0x1f0] sm:$0xff]  ;;  %v3043_v9 = vpack.c.bf16 %v242_v0, %v234_v63  ;;  %v3189_v63 = vpack.c.bf16 %v325_v56, %v317_v55 }
 0x108   :  { %v324_v0 = vld [vmem:[#allocation11 + $0x470] sm:$0xff] }
 0x109   :  { %2896 = vmatpush1.bf16.msra.mxu0 %v2895_v10  ;;  %v3045_v10 = vpack.c.bf16 %v259_v5, %v251_v4  ;;  %v341_v4 = vld [vmem:[#allocation11 + $0x4f8] sm:$0xff] }
 0x10a   :  { %3024 = vmatpush1.bf16.msra.mxu1 %v3023_v11  ;;  %2898 = vmatprep.subr.bf16.mxu0 %v2897_v12  ;;  %v250_v11 = vld [vmem:[#allocation11 + $0x220] sm:$0xff] }
 0x10b   :  { %3026 = vmatprep.subr.bf16.mxu1 %v3025_v16  ;;  %v258_v12 = vld [vmem:[#allocation11 + $0x260] sm:$0xff]  ;;  %v267_v16 = vld [vmem:[#allocation11 + $0x2a8] sm:$0xff] }
 0x10c   :  { %v3047_v20 = vpack.c.bf16 %v258_v12, %v250_v11  ;;  %v340_v12 = vld [vmem:[#allocation11 + $0x4f0] sm:$0xff] }
 0x10d   :  { %2900 = vmatpush1.bf16.msra.mxu0 %v2899_v22  ;;  %v3049_v22 = vpack.c.bf16 %v275_v17, %v267_v16  ;;  %v357_v16 = vld [vmem:[#allocation11 + $0x578] sm:$0xff] }
 0x10e   :  { %3028 = vmatpush1.bf16.msra.mxu1 %v3027_v23  ;;  %3030 = vmatprep.subr.bf16.mxu0 %v3029_v24  ;;  %v266_v23 = vld [vmem:[#allocation11 + $0x2a0] sm:$0xff] }
 0x10f   :  { %3158 = vmatprep.subr.bf16.mxu1 %v3157_v28  ;;  %v274_v24 = vld [vmem:[#allocation11 + $0x2e0] sm:$0xff]  ;;  %v283_v28 = vld [vmem:[#allocation11 + $0x328] sm:$0xff] }
 0x110   :  { %872 = vmatmul.mubr.f32.vlgmr.msra.gmra.mrb[0].mxu0 %v174_v34  ;;  %v3051_v32 = vpack.c.bf16 %v274_v24, %v266_v23  ;;  %v3197_v23 = vpack.c.bf16 %v357_v16, %v349_v15  ;;  %v356_v24 = vld [vmem:[#allocation11 + $0x570] sm:$0xff] }
 0x111   :  { %1014 = vmatmul.mubr.f32.vlgmr.msra.gmra.mrb[0].mxu1 %v174_v34  ;;  %3032 = vmatpush1.bf16.msra.mxu0 %v3031_v35  ;;  %v3053_v34 = vpack.c.bf16 %v291_v29, %v283_v28  ;;  %v282_v35 = vld [vmem:[#allocation11 + $0x320] sm:$0xff]  ;;  %v373_v28 = vld [vmem:[#allocation11 + $0x5f8] sm:$0xff] }
 0x112   :  { %3160 = vmatpush1.bf16.msra.mxu1 %v3159_v36  ;;  %3034 = vmatprep.subr.bf16.mxu0 %v3033_v37  ;;  %v290_v36 = vld [vmem:[#allocation11 + $0x360] sm:$0xff]  ;;  %v284_v37 = vld [vmem:[#allocation11 + $0x330] sm:$0xff] }
 0x113   :  { %3162 = vmatprep.subr.bf16.mxu1 %v3161_v42  ;;  %1084 = vmatprep.mubr.f32.mxu0 %v4205_v7  ;;  %v307_v42 = vld [vmem:[#allocation11 + $0x3e8] sm:$0xff]  ;;  %v3055_v45 = vpack.c.bf16 %v290_v36, %v282_v35  ;;  %v3183_v46 = vpack.c.bf16 %v292_v40, %v284_v37  ;;  %v3201_v35 = vpack.c.bf16 %v373_v28, %v365_v27  ;;  %v372_v36 = vld [vmem:[#allocation11 + $0x5f0] sm:$0xff]  ;;  %v381_v40 = vld [vmem:[#allocation11 + $0x638] sm:$0xff] }
 0x114   :  { %1226 = vmatprep.mubr.f32.mxu1 %v4205_v7  ;;  %v3171_v7 = vpack.c.bf16 %v244_v3, %v236_v1  ;;  %v3057_v47 = vpack.c.bf16 %v307_v42, %v299_v41  ;;  %v331_v1 = vld [vmem:[#allocation11 + $0x4a8] sm:$0xff]  ;;  %v333_v3 = vld [vmem:[#allocation11 + $0x4b8] sm:$0xff] }
 0x115   :  { %3036 = vmatpush1.bf16.msra.mxu0 %v3035_v48  ;;  %v298_v48 = vld [vmem:[#allocation11 + $0x3a0] sm:$0xff]  ;;  %v3193_v11 = vpack.c.bf16 %v341_v4, %v333_v3  ;;  %v379_v37 = vld [vmem:[#allocation11 + $0x628] sm:$0xff]  ;;  %v389_v41 = vld [vmem:[#allocation11 + $0x678] sm:$0xff] }
 0x116   :  { %3164 = vmatpush1.bf16.msra.mxu1 %v3163_v49  ;;  %3038 = vmatprep.subr.bf16.mxu0 %v3037_v50  ;;  %v306_v49 = vld [vmem:[#allocation11 + $0x3e0] sm:$0xff]  ;;  %v300_v50 = vld [vmem:[#allocation11 + $0x3b0] sm:$0xff] }
 0x117   :  { %3166 = vmatprep.subr.bf16.mxu1 %v3165_v54  ;;  %v323_v54 = vld [vmem:[#allocation11 + $0x468] sm:$0xff]  ;;  %v3059_v57 = vpack.c.bf16 %v306_v49, %v298_v48  ;;  %v3187_v58 = vpack.c.bf16 %v308_v52, %v300_v50  ;;  %v3205_v48 = vpack.c.bf16 %v389_v41, %v381_v40  ;;  %v388_v49 = vld [vmem:[#allocation11 + $0x670] sm:$0xff]  ;;  %v397_v52 = vld [vmem:[#allocation11 + $0x6b8] sm:$0xff] }
 0x118   :  { %v3061_v59 = vpack.c.bf16 %v323_v54, %v315_v53  ;;  %v395_v50 = vld [vmem:[#allocation11 + $0x6a8] sm:$0xff]  ;;  %v405_v53 = vld [vmem:[#allocation11 + $0x6f8] sm:$0xff] }
 0x119   :  { %3040 = vmatpush1.bf16.msra.mxu0 %v3039_v60  ;;  %v314_v60 = vld [vmem:[#allocation11 + $0x420] sm:$0xff] }
 0x11a   :  { %3168 = vmatpush1.bf16.msra.mxu1 %v3167_v61  ;;  %3042 = vmatprep.subr.bf16.mxu0 %v3041_v62  ;;  %v322_v61 = vld [vmem:[#allocation11 + $0x460] sm:$0xff]  ;;  %v316_v62 = vld [vmem:[#allocation11 + $0x430] sm:$0xff] }
 0x11b   :  { %3170 = vmatprep.subr.bf16.mxu1 %v3169_v2  ;;  %v339_v2 = vld [vmem:[#allocation11 + $0x4e8] sm:$0xff]  ;;  %v3063_v5 = vpack.c.bf16 %v322_v61, %v314_v60  ;;  %v3191_v6 = vpack.c.bf16 %v324_v0, %v316_v62  ;;  %v3209_v60 = vpack.c.bf16 %v405_v53, %v397_v52  ;;  %v404_v61 = vld [vmem:[#allocation11 + $0x6f0] sm:$0xff]  ;;  %v413_v0 = vld [vmem:[#allocation11 + $0x738] sm:$0xff] }
 0x11c   :  { %v3065_v8 = vpack.c.bf16 %v339_v2, %v331_v1  ;;  %v411_v62 = vld [vmem:[#allocation11 + $0x728] sm:$0xff]  ;;  %v421_v1 = vld [vmem:[#allocation11 + $0x778] sm:$0xff] }
 0x11d   :  { %3044 = vmatpush1.bf16.msra.mxu0 %v3043_v9  ;;  %v330_v9 = vld [vmem:[#allocation11 + $0x4a0] sm:$0xff] }
 0x11e   :  { %3172 = vmatpush1.bf16.msra.mxu1 %v3171_v7  ;;  %3046 = vmatprep.subr.bf16.mxu0 %v3045_v10  ;;  %v338_v7 = vld [vmem:[#allocation11 + $0x4e0] sm:$0xff]  ;;  %v332_v10 = vld [vmem:[#allocation11 + $0x4b0] sm:$0xff] }
 0x11f   :  { %3174 = vmatprep.subr.bf16.mxu1 %v3173_v14  ;;  %v355_v14 = vld [vmem:[#allocation11 + $0x568] sm:$0xff]  ;;  %v3067_v17 = vpack.c.bf16 %v338_v7, %v330_v9  ;;  %v3195_v18 = vpack.c.bf16 %v340_v12, %v332_v10  ;;  %v3213_v9 = vpack.c.bf16 %v421_v1, %v413_v0  ;;  %v420_v7 = vld [vmem:[#allocation11 + $0x770] sm:$0xff]  ;;  %v429_v12 = vld [vmem:[#allocation11 + $0x7b8] sm:$0xff] }
 0x120   :  { %v3069_v19 = vpack.c.bf16 %v355_v14, %v347_v13  ;;  %v427_v10 = vld [vmem:[#allocation11 + $0x7a8] sm:$0xff]  ;;  %v437_v13 = vld [vmem:[#allocation11 + $0x7f8] sm:$0xff] }
 0x121   :  { %3048 = vmatpush1.bf16.msra.mxu0 %v3047_v20  ;;  %v346_v20 = vld [vmem:[#allocation11 + $0x520] sm:$0xff] }
 0x122   :  { %3176 = vmatpush1.bf16.msra.mxu1 %v3175_v21  ;;  %3050 = vmatprep.subr.bf16.mxu0 %v3049_v22  ;;  %v354_v21 = vld [vmem:[#allocation11 + $0x560] sm:$0xff]  ;;  %v348_v22 = vld [vmem:[#allocation11 + $0x530] sm:$0xff] }
 0x123   :  { %3178 = vmatprep.subr.bf16.mxu1 %v3177_v26  ;;  %v371_v26 = vld [vmem:[#allocation11 + $0x5e8] sm:$0xff]  ;;  %v3071_v29 = vpack.c.bf16 %v354_v21, %v346_v20  ;;  %v3199_v30 = vpack.c.bf16 %v356_v24, %v348_v22  ;;  %v3217_v20 = vpack.c.bf16 %v437_v13, %v429_v12  ;;  %v436_v21 = vld [vmem:[#allocation11 + $0x7f0] sm:$0xff]  ;;  %v445_v24 = vld [vmem:[#allocation11 + $0x838] sm:$0xff] }
 0x124   :  { %v3073_v31 = vpack.c.bf16 %v371_v26, %v363_v25  ;;  %v443_v22 = vld [vmem:[#allocation11 + $0x828] sm:$0xff]  ;;  %v453_v25 = vld [vmem:[#allocation11 + $0x878] sm:$0xff] }
 0x125   :  { %3052 = vmatpush1.bf16.msra.mxu0 %v3051_v32  ;;  %v362_v32 = vld [vmem:[#allocation11 + $0x5a0] sm:$0xff] }
 0x126   :  { %3180 = vmatpush1.bf16.msra.mxu1 %v3179_v33  ;;  %3054 = vmatprep.subr.bf16.mxu0 %v3053_v34  ;;  %v370_v33 = vld [vmem:[#allocation11 + $0x5e0] sm:$0xff]  ;;  %v364_v34 = vld [vmem:[#allocation11 + $0x5b0] sm:$0xff] }
 0x127   :  { %3182 = vmatprep.subr.bf16.mxu1 %v3181_v39  ;;  %v387_v39 = vld [vmem:[#allocation11 + $0x668] sm:$0xff]  ;;  %v3075_v42 = vpack.c.bf16 %v370_v33, %v362_v32  ;;  %v3203_v43 = vpack.c.bf16 %v372_v36, %v364_v34  ;;  %v3221_v32 = vpack.c.bf16 %v453_v25, %v445_v24  ;;  %v452_v33 = vld [vmem:[#allocation11 + $0x870] sm:$0xff]  ;;  %v461_v36 = vld [vmem:[#allocation11 + $0x8b8] sm:$0xff] }
 0x128   :  { %v3077_v44 = vpack.c.bf16 %v387_v39, %v379_v37  ;;  %v459_v34 = vld [vmem:[#allocation11 + $0x8a8] sm:$0xff]  ;;  %v469_v37 = vld [vmem:[#allocation11 + $0x8f8] sm:$0xff] }
 0x129   :  { %3056 = vmatpush1.bf16.msra.mxu0 %v3055_v45  ;;  %v378_v45 = vld [vmem:[#allocation11 + $0x620] sm:$0xff] }
 0x12a   :  { %3184 = vmatpush1.bf16.msra.mxu1 %v3183_v46  ;;  %3058 = vmatprep.subr.bf16.mxu0 %v3057_v47  ;;  %v386_v46 = vld [vmem:[#allocation11 + $0x660] sm:$0xff]  ;;  %v380_v47 = vld [vmem:[#allocation11 + $0x630] sm:$0xff] }
 0x12b   :  { %3186 = vmatprep.subr.bf16.mxu1 %v3185_v51  ;;  %v403_v51 = vld [vmem:[#allocation11 + $0x6e8] sm:$0xff]  ;;  %v3079_v54 = vpack.c.bf16 %v386_v46, %v378_v45  ;;  %v3207_v55 = vpack.c.bf16 %v388_v49, %v380_v47  ;;  %v3225_v45 = vpack.c.bf16 %v469_v37, %v461_v36  ;;  %v468_v46 = vld [vmem:[#allocation11 + $0x8f0] sm:$0xff]  ;;  %v3943_v49 = vld [vmem:[#allocation2] sm:$0xff] }
 0x12c   :  { %v3081_v56 = vpack.c.bf16 %v403_v51, %v395_v50  ;;  %v475_v47 = vld [vmem:[#allocation11 + $0x928] sm:$0xff]  ;;  %v477_v50 = vld [vmem:[#allocation11 + $0x938] sm:$0xff] }
 0x12d   :  { %3060 = vmatpush1.bf16.msra.mxu0 %v3059_v57  ;;  %v394_v57 = vld [vmem:[#allocation11 + $0x6a0] sm:$0xff]  ;;  %v485_v51 = vld [vmem:[#allocation11 + $0x978] sm:$0xff] }
 0x12e   :  { %3188 = vmatpush1.bf16.msra.mxu1 %v3187_v58  ;;  %3062 = vmatprep.subr.bf16.mxu0 %v3061_v59  ;;  %v402_v58 = vld [vmem:[#allocation11 + $0x6e0] sm:$0xff]  ;;  %v396_v59 = vld [vmem:[#allocation11 + $0x6b0] sm:$0xff] }
 0x12f   :  { %3190 = vmatprep.subr.bf16.mxu1 %v3189_v63  ;;  %v419_v63 = vld [vmem:[#allocation11 + $0x768] sm:$0xff]  ;;  %v3083_v2 = vpack.c.bf16 %v402_v58, %v394_v57  ;;  %v3211_v3 = vpack.c.bf16 %v404_v61, %v396_v59  ;;  %v476_v57 = vld [vmem:[#allocation11 + $0x930] sm:$0xff]  ;;  %v3229_v58 = vpack.c.bf16 %v485_v51, %v477_v50  ;;  %v554_v51 = vld [vmem:[#allocation11 + $0xba0] sm:$0xff] }
 0x130   :  { %v3085_v4 = vpack.c.bf16 %v419_v63, %v411_v62  ;;  %v484_v59 = vld [vmem:[#allocation11 + $0x970] sm:$0xff]  ;;  %v499_v61 = vld [vmem:[#allocation11 + $0x9e8] sm:$0xff]  ;;  %v493_v62 = vld [vmem:[#allocation11 + $0x9b8] sm:$0xff] }
 0x131   :  { %3064 = vmatpush1.bf16.msra.mxu0 %v3063_v5  ;;  %v410_v5 = vld [vmem:[#allocation11 + $0x720] sm:$0xff]  ;;  %v501_v63 = vld [vmem:[#allocation11 + $0x9f8] sm:$0xff]  ;;  %v3231_v1 = vpack.c.bf16 %v484_v59, %v476_v57  ;;  %v579_v57 = vld [vmem:[#allocation11 + $0xc68] sm:$0xff] }
 0x132   :  { %3192 = vmatpush1.bf16.msra.mxu1 %v3191_v6  ;;  %3066 = vmatprep.subr.bf16.mxu0 %v3065_v8  ;;  %v418_v6 = vld [vmem:[#allocation11 + $0x760] sm:$0xff]  ;;  %v412_v8 = vld [vmem:[#allocation11 + $0x730] sm:$0xff]  ;;  %v581_v59 = vld [vmem:[#allocation11 + $0xc78] sm:$0xff] }
 0x133   :  { %3194 = vmatprep.subr.bf16.mxu1 %v3193_v11  ;;  %v435_v11 = vld [vmem:[#allocation11 + $0x7e8] sm:$0xff]  ;;  %v3087_v14 = vpack.c.bf16 %v418_v6, %v410_v5  ;;  %v3215_v15 = vpack.c.bf16 %v420_v7, %v412_v8  ;;  %v492_v5 = vld [vmem:[#allocation11 + $0x9b0] sm:$0xff]  ;;  %v3233_v6 = vpack.c.bf16 %v501_v63, %v493_v62  ;;  %v570_v63 = vld [vmem:[#allocation11 + $0xc20] sm:$0xff] }
 0x134   :  { %v3089_v16 = vpack.c.bf16 %v435_v11, %v427_v10  ;;  %v500_v8 = vld [vmem:[#allocation11 + $0x9f0] sm:$0xff]  ;;  %v515_v7 = vld [vmem:[#allocation11 + $0xa68] sm:$0xff]  ;;  %v509_v10 = vld [vmem:[#allocation11 + $0xa38] sm:$0xff] }
 0x135   :  { %3068 = vmatpush1.bf16.msra.mxu0 %v3067_v17  ;;  %v426_v17 = vld [vmem:[#allocation11 + $0x7a0] sm:$0xff]  ;;  %v517_v11 = vld [vmem:[#allocation11 + $0xa78] sm:$0xff] }
 0x136   :  { %3196 = vmatpush1.bf16.msra.mxu1 %v3195_v18  ;;  %3070 = vmatprep.subr.bf16.mxu0 %v3069_v19  ;;  %v434_v18 = vld [vmem:[#allocation11 + $0x7e0] sm:$0xff]  ;;  %v428_v19 = vld [vmem:[#allocation11 + $0x7b0] sm:$0xff] }
 0x137   :  { %3198 = vmatprep.subr.bf16.mxu1 %v3197_v23  ;;  %v451_v23 = vld [vmem:[#allocation11 + $0x868] sm:$0xff]  ;;  %v3091_v26 = vpack.c.bf16 %v434_v18, %v426_v17  ;;  %v3219_v27 = vpack.c.bf16 %v436_v21, %v428_v19  ;;  %v3237_v17 = vpack.c.bf16 %v517_v11, %v509_v10  ;;  %v516_v18 = vld [vmem:[#allocation11 + $0xa70] sm:$0xff]  ;;  %v525_v21 = vld [vmem:[#allocation11 + $0xab8] sm:$0xff] }
 0x138   :  { %v3093_v28 = vpack.c.bf16 %v451_v23, %v443_v22  ;;  %v523_v19 = vld [vmem:[#allocation11 + $0xaa8] sm:$0xff]  ;;  %v533_v22 = vld [vmem:[#allocation11 + $0xaf8] sm:$0xff]  ;;  %v586_v11 = vld [vmem:[#allocation11 + $0xca0] sm:$0xff] }
 0x139   :  { %3072 = vmatpush1.bf16.msra.mxu0 %v3071_v29  ;;  %v442_v29 = vld [vmem:[#allocation11 + $0x820] sm:$0xff] }
 0x13a   :  { %3200 = vmatpush1.bf16.msra.mxu1 %v3199_v30  ;;  %3074 = vmatprep.subr.bf16.mxu0 %v3073_v31  ;;  %v450_v30 = vld [vmem:[#allocation11 + $0x860] sm:$0xff]  ;;  %v444_v31 = vld [vmem:[#allocation11 + $0x830] sm:$0xff] }
 0x13b   :  { %3202 = vmatprep.subr.bf16.mxu1 %v3201_v35  ;;  %v467_v35 = vld [vmem:[#allocation11 + $0x8e8] sm:$0xff]  ;;  %v3095_v39 = vpack.c.bf16 %v450_v30, %v442_v29  ;;  %v3223_v40 = vpack.c.bf16 %v452_v33, %v444_v31  ;;  %v3241_v29 = vpack.c.bf16 %v533_v22, %v525_v21  ;;  %v532_v30 = vld [vmem:[#allocation11 + $0xaf0] sm:$0xff]  ;;  %v541_v33 = vld [vmem:[#allocation11 + $0xb38] sm:$0xff] }
 0x13c   :  { %v3097_v41 = vpack.c.bf16 %v467_v35, %v459_v34  ;;  %v539_v31 = vld [vmem:[#allocation11 + $0xb28] sm:$0xff]  ;;  %v549_v34 = vld [vmem:[#allocation11 + $0xb78] sm:$0xff]  ;;  %v602_v22 = vld [vmem:[#allocation11 + $0xd20] sm:$0xff] }
 0x13d   :  { %3076 = vmatpush1.bf16.msra.mxu0 %v3075_v42  ;;  %v458_v42 = vld [vmem:[#allocation11 + $0x8a0] sm:$0xff] }
 0x13e   :  { %3204 = vmatpush1.bf16.msra.mxu1 %v3203_v43  ;;  %3078 = vmatprep.subr.bf16.mxu0 %v3077_v44  ;;  %v466_v43 = vld [vmem:[#allocation11 + $0x8e0] sm:$0xff]  ;;  %v460_v44 = vld [vmem:[#allocation11 + $0x8b0] sm:$0xff] }
 0x13f   :  { %3206 = vmatprep.subr.bf16.mxu1 %v3205_v48  ;;  %v483_v48 = vld [vmem:[#allocation11 + $0x968] sm:$0xff]  ;;  %v3099_v52 = vpack.c.bf16 %v466_v43, %v458_v42  ;;  %v3227_v53 = vpack.c.bf16 %v468_v46, %v460_v44  ;;  %v3245_v42 = vpack.c.bf16 %v549_v34, %v541_v33  ;;  %v548_v43 = vld [vmem:[#allocation11 + $0xb70] sm:$0xff]  ;;  %v557_v46 = vld [vmem:[#allocation11 + $0xbb8] sm:$0xff] }
 0x140   :  { %v555_v44 = vld [vmem:[#allocation11 + $0xba8] sm:$0xff]  ;;  %v618_v34 = vld [vmem:[#allocation11 + $0xda0] sm:$0xff] }
 0x141   :  { %3080 = vmatpush1.bf16.msra.mxu0 %v3079_v54  ;;  %v3101_v54 = vpack.c.bf16 %v483_v48, %v475_v47  ;;  %v565_v47 = vld [vmem:[#allocation11 + $0xbf8] sm:$0xff] }
 0x142   :  { %3208 = vmatpush1.bf16.msra.mxu1 %v3207_v55  ;;  %3082 = vmatprep.subr.bf16.mxu0 %v3081_v56  ;;  %v474_v55 = vld [vmem:[#allocation11 + $0x920] sm:$0xff] }
 0x143   :  { %3210 = vmatprep.subr.bf16.mxu1 %v3209_v60  ;;  %v482_v56 = vld [vmem:[#allocation11 + $0x960] sm:$0xff]  ;;  %v491_v60 = vld [vmem:[#allocation11 + $0x9a8] sm:$0xff] }
 0x144   :  { %v3103_v0 = vpack.c.bf16 %v482_v56, %v474_v55  ;;  %v564_v55 = vld [vmem:[#allocation11 + $0xbf0] sm:$0xff]  ;;  %v571_v56 = vld [vmem:[#allocation11 + $0xc28] sm:$0xff] }
 0x145   :  { %3084 = vmatpush1.bf16.msra.mxu0 %v3083_v2  ;;  %v3105_v2 = vpack.c.bf16 %v499_v61, %v491_v60  ;;  %v3125_v62 = vpack.c.bf16 %v579_v57, %v571_v56 }
 0x146   :  { %3212 = vmatpush1.bf16.msra.mxu1 %v3211_v3  ;;  %3086 = vmatprep.subr.bf16.mxu0 %v3085_v4  ;;  %v490_v3 = vld [vmem:[#allocation11 + $0x9a0] sm:$0xff] }
 0x147   :  { %3214 = vmatprep.subr.bf16.mxu1 %v3213_v9  ;;  %v498_v4 = vld [vmem:[#allocation11 + $0x9e0] sm:$0xff]  ;;  %v507_v9 = vld [vmem:[#allocation11 + $0xa28] sm:$0xff] }
 0x148   :  { %v3107_v12 = vpack.c.bf16 %v498_v4, %v490_v3  ;;  %v3109_v13 = vpack.c.bf16 %v515_v7, %v507_v9  ;;  %v580_v3 = vld [vmem:[#allocation11 + $0xc70] sm:$0xff]  ;;  %v587_v4 = vld [vmem:[#allocation11 + $0xca8] sm:$0xff] }
 0x149   :  { %3088 = vmatpush1.bf16.msra.mxu0 %v3087_v14  ;;  %v506_v14 = vld [vmem:[#allocation11 + $0xa20] sm:$0xff] }
 0x14a   :  { %3216 = vmatpush1.bf16.msra.mxu1 %v3215_v15  ;;  %3090 = vmatprep.subr.bf16.mxu0 %v3089_v16  ;;  %v514_v15 = vld [vmem:[#allocation11 + $0xa60] sm:$0xff]  ;;  %v508_v16 = vld [vmem:[#allocation11 + $0xa30] sm:$0xff] }
 0x14b   :  { %3218 = vmatprep.subr.bf16.mxu1 %v3217_v20  ;;  %v531_v20 = vld [vmem:[#allocation11 + $0xae8] sm:$0xff]  ;;  %v3111_v23 = vpack.c.bf16 %v514_v15, %v506_v14  ;;  %v3239_v24 = vpack.c.bf16 %v516_v18, %v508_v16  ;;  %v596_v14 = vld [vmem:[#allocation11 + $0xcf0] sm:$0xff]  ;;  %v613_v18 = vld [vmem:[#allocation11 + $0xd78] sm:$0xff] }
 0x14c   :  { %v3113_v25 = vpack.c.bf16 %v531_v20, %v523_v19  ;;  %v603_v15 = vld [vmem:[#allocation11 + $0xd28] sm:$0xff] }
 0x14d   :  { %3092 = vmatpush1.bf16.msra.mxu0 %v3091_v26  ;;  %v522_v26 = vld [vmem:[#allocation11 + $0xaa0] sm:$0xff]  ;;  %v611_v16 = vld [vmem:[#allocation11 + $0xd68] sm:$0xff] }
 0x14e   :  { %3220 = vmatpush1.bf16.msra.mxu1 %v3219_v27  ;;  %3094 = vmatprep.subr.bf16.mxu0 %v3093_v28  ;;  %v530_v27 = vld [vmem:[#allocation11 + $0xae0] sm:$0xff]  ;;  %v524_v28 = vld [vmem:[#allocation11 + $0xab0] sm:$0xff]  ;;  %v3133_v21 = vpack.c.bf16 %v611_v16, %v603_v15 }
 0x14f   :  { %3222 = vmatprep.subr.bf16.mxu1 %v3221_v32  ;;  %v547_v32 = vld [vmem:[#allocation11 + $0xb68] sm:$0xff]  ;;  %v3115_v35 = vpack.c.bf16 %v530_v27, %v522_v26  ;;  %v3243_v36 = vpack.c.bf16 %v532_v30, %v524_v28  ;;  %v612_v26 = vld [vmem:[#allocation11 + $0xd70] sm:$0xff]  ;;  %v629_v30 = vld [vmem:[#allocation11 + $0xdf8] sm:$0xff] }
 0x150   :  { %1085 = vmatmul.mubr.f32.vlgmr.msra.gmra.mrb[2].mxu0 %v3943_v49  ;;  %v3117_v37 = vpack.c.bf16 %v547_v32, %v539_v31  ;;  %v619_v27 = vld [vmem:[#allocation11 + $0xda8] sm:$0xff] }
 0x151   :  { %3096 = vmatpush1.bf16.msra.mxu0 %v3095_v39  ;;  %1227 = vmatmul.mubr.f32.vlgmr.msra.gmra.mrb[2].mxu1 %v3943_v49  ;;  %v538_v39 = vld [vmem:[#allocation11 + $0xb20] sm:$0xff]  ;;  %v627_v28 = vld [vmem:[#allocation11 + $0xde8] sm:$0xff] }
 0x152   :  { %3224 = vmatpush1.bf16.msra.mxu1 %v3223_v40  ;;  %3098 = vmatprep.subr.bf16.mxu0 %v3097_v41  ;;  %v546_v40 = vld [vmem:[#allocation11 + $0xb60] sm:$0xff]  ;;  %v540_v41 = vld [vmem:[#allocation11 + $0xb30] sm:$0xff]  ;;  %v3137_v33 = vpack.c.bf16 %v627_v28, %v619_v27 }
 0x153   :  { %3226 = vmatprep.subr.bf16.mxu1 %v3225_v45  ;;  %1155 = vmatprep.mubr.f32.mxu0 %v4402_v38  ;;  %v563_v45 = vld [vmem:[#allocation11 + $0xbe8] sm:$0xff]  ;;  %v3119_v48 = vpack.c.bf16 %v546_v40, %v538_v39  ;;  %v3247_v49 = vpack.c.bf16 %v548_v43, %v540_v41  ;;  %v628_v39 = vld [vmem:[#allocation11 + $0xdf0] sm:$0xff]  ;;  %v645_v43 = vld [vmem:[#allocation11 + $0xe78] sm:$0xff] }
 0x154   :  { %1297 = vmatprep.mubr.f32.mxu1 %v4402_v38  ;;  %v3235_v38 = vpack.c.bf16 %v500_v8, %v492_v5  ;;  %v3121_v50 = vpack.c.bf16 %v563_v45, %v555_v44  ;;  %v595_v5 = vld [vmem:[#allocation11 + $0xce8] sm:$0xff]  ;;  %v597_v8 = vld [vmem:[#allocation11 + $0xcf8] sm:$0xff] }
 0x155   :  { %3100 = vmatpush1.bf16.msra.mxu0 %v3099_v52  ;;  %v562_v52 = vld [vmem:[#allocation11 + $0xbe0] sm:$0xff]  ;;  %v3129_v10 = vpack.c.bf16 %v595_v5, %v587_v4  ;;  %v635_v40 = vld [vmem:[#allocation11 + $0xe28] sm:$0xff] }
 0x156   :  { %3228 = vmatpush1.bf16.msra.mxu1 %v3227_v53  ;;  %3102 = vmatprep.subr.bf16.mxu0 %v3101_v54  ;;  %v556_v53 = vld [vmem:[#allocation11 + $0xbb0] sm:$0xff]  ;;  %v3249_v54 = vpack.c.bf16 %v565_v47, %v557_v46  ;;  %v3123_v60 = vpack.c.bf16 %v562_v52, %v554_v51  ;;  %v643_v41 = vld [vmem:[#allocation11 + $0xe68] sm:$0xff]  ;;  %v634_v47 = vld [vmem:[#allocation11 + $0xe20] sm:$0xff] }
 0x157   :  { %3230 = vmatprep.subr.bf16.mxu1 %v3229_v58  ;;  %v573_v58 = vld [vmem:[#allocation11 + $0xc38] sm:$0xff]  ;;  %v3251_v61 = vpack.c.bf16 %v564_v55, %v556_v53  ;;  %v3141_v46 = vpack.c.bf16 %v643_v41, %v635_v40  ;;  %v644_v51 = vld [vmem:[#allocation11 + $0xe70] sm:$0xff]  ;;  %v651_v52 = vld [vmem:[#allocation11 + $0xea8] sm:$0xff] }
 0x158   :  { %v659_v53 = vld [vmem:[#allocation11 + $0xee8] sm:$0xff]  ;;  %v661_v55 = vld [vmem:[#allocation11 + $0xef8] sm:$0xff] }
 0x159   :  { %3104 = vmatpush1.bf16.msra.mxu0 %v3103_v0  ;;  %v578_v0 = vld [vmem:[#allocation11 + $0xc60] sm:$0xff] }
 0x15a   :  { %3232 = vmatpush1.bf16.msra.mxu1 %v3231_v1  ;;  %3106 = vmatprep.subr.bf16.mxu0 %v3105_v2  ;;  %v572_v1 = vld [vmem:[#allocation11 + $0xc30] sm:$0xff]  ;;  %v3253_v2 = vpack.c.bf16 %v581_v59, %v573_v58  ;;  %v3127_v9 = vpack.c.bf16 %v578_v0, %v570_v63  ;;  %v3145_v58 = vpack.c.bf16 %v659_v53, %v651_v52  ;;  %v650_v59 = vld [vmem:[#allocation11 + $0xea0] sm:$0xff]  ;;  %v667_v0 = vld [vmem:[#allocation11 + $0xf28] sm:$0xff] }
 0x15b   :  { %3234 = vmatprep.subr.bf16.mxu1 %v3233_v6  ;;  %v589_v6 = vld [vmem:[#allocation11 + $0xcb8] sm:$0xff]  ;;  %v3255_v7 = vpack.c.bf16 %v580_v3, %v572_v1  ;;  %v660_v63 = vld [vmem:[#allocation11 + $0xef0] sm:$0xff]  ;;  %v675_v1 = vld [vmem:[#allocation11 + $0xf68] sm:$0xff] }
 0x15c   :  { %v677_v3 = vld [vmem:[#allocation11 + $0xf78] sm:$0xff] }
 0x15d   :  { %3108 = vmatpush1.bf16.msra.mxu0 %v3107_v12  ;;  %v594_v12 = vld [vmem:[#allocation11 + $0xce0] sm:$0xff]  ;;  %v1413_v52 = vld [vmem:[#allocation11 + $0x1158] sm:$0xff] }
 0x15e   :  { %3236 = vmatpush1.bf16.msra.mxu1 %v3235_v38  ;;  %3110 = vmatprep.subr.bf16.mxu0 %v3109_v13  ;;  %v588_v38 = vld [vmem:[#allocation11 + $0xcb0] sm:$0xff]  ;;  %v3257_v13 = vpack.c.bf16 %v597_v8, %v589_v6  ;;  %v3131_v19 = vpack.c.bf16 %v594_v12, %v586_v11  ;;  %v3149_v6 = vpack.c.bf16 %v675_v1, %v667_v0  ;;  %v666_v8 = vld [vmem:[#allocation11 + $0xf20] sm:$0xff]  ;;  %v683_v12 = vld [vmem:[#allocation11 + $0xfa8] sm:$0xff] }
 0x15f   :  { %3238 = vmatprep.subr.bf16.mxu1 %v3237_v17  ;;  %v605_v17 = vld [vmem:[#allocation11 + $0xd38] sm:$0xff]  ;;  %v3259_v20 = vpack.c.bf16 %v596_v14, %v588_v38  ;;  %v676_v11 = vld [vmem:[#allocation11 + $0xf70] sm:$0xff]  ;;  %v691_v38 = vld [vmem:[#allocation11 + $0xfe8] sm:$0xff] }
 0x160   :  { %v693_v14 = vld [vmem:[#allocation11 + $0xff8] sm:$0xff] }
 0x161   :  { %3112 = vmatpush1.bf16.msra.mxu0 %v3111_v23  ;;  %v610_v23 = vld [vmem:[#allocation11 + $0xd60] sm:$0xff]  ;;  %v1429_v0 = vld [vmem:[#allocation11 + $0x11d8] sm:$0xff] }
 0x162   :  { %3240 = vmatpush1.bf16.msra.mxu1 %v3239_v24  ;;  %3114 = vmatprep.subr.bf16.mxu0 %v3113_v25  ;;  %v604_v24 = vld [vmem:[#allocation11 + $0xd30] sm:$0xff]  ;;  %v3261_v25 = vpack.c.bf16 %v613_v18, %v605_v17  ;;  %v3135_v31 = vpack.c.bf16 %v610_v23, %v602_v22  ;;  %v3153_v17 = vpack.c.bf16 %v691_v38, %v683_v12  ;;  %v682_v18 = vld [vmem:[#allocation11 + $0xfa0] sm:$0xff]  ;;  %v1371_v23 = vld [vmem:[#allocation11 + $0x1008] sm:$0xff] }
 0x163   :  { %3242 = vmatprep.subr.bf16.mxu1 %v3241_v29  ;;  %v621_v29 = vld [vmem:[#allocation11 + $0xdb8] sm:$0xff]  ;;  %v3263_v32 = vpack.c.bf16 %v612_v26, %v604_v24  ;;  %v692_v22 = vld [vmem:[#allocation11 + $0xff0] sm:$0xff]  ;;  %v1379_v24 = vld [vmem:[#allocation11 + $0x1048] sm:$0xff] }
 0x164   :  { %v1381_v26 = vld [vmem:[#allocation11 + $0x1058] sm:$0xff] }
 0x165   :  { %3116 = vmatpush1.bf16.msra.mxu0 %v3115_v35  ;;  %v626_v35 = vld [vmem:[#allocation11 + $0xde0] sm:$0xff]  ;;  %v1445_v12 = vld [vmem:[#allocation11 + $0x1258] sm:$0xff] }
 0x166   :  { %3244 = vmatpush1.bf16.msra.mxu1 %v3243_v36  ;;  %3118 = vmatprep.subr.bf16.mxu0 %v3117_v37  ;;  %v620_v36 = vld [vmem:[#allocation11 + $0xdb0] sm:$0xff]  ;;  %v3265_v37 = vpack.c.bf16 %v629_v30, %v621_v29  ;;  %v3139_v44 = vpack.c.bf16 %v626_v35, %v618_v34  ;;  %v3285_v29 = vpack.c.bf16 %v1379_v24, %v1371_v23  ;;  %v1370_v30 = vld [vmem:[#allocation11 + $0x1000] sm:$0xff]  ;;  %v1387_v35 = vld [vmem:[#allocation11 + $0x1088] sm:$0xff] }
 0x167   :  { %3246 = vmatprep.subr.bf16.mxu1 %v3245_v42  ;;  %v637_v42 = vld [vmem:[#allocation11 + $0xe38] sm:$0xff]  ;;  %v3267_v45 = vpack.c.bf16 %v628_v39, %v620_v36  ;;  %v1380_v34 = vld [vmem:[#allocation11 + $0x1050] sm:$0xff]  ;;  %v1395_v36 = vld [vmem:[#allocation11 + $0x10c8] sm:$0xff] }
 0x168   :  { %v1397_v39 = vld [vmem:[#allocation11 + $0x10d8] sm:$0xff] }
 0x169   :  { %3120 = vmatpush1.bf16.msra.mxu0 %v3119_v48  ;;  %v642_v48 = vld [vmem:[#allocation11 + $0xe60] sm:$0xff]  ;;  %v1461_v23 = vld [vmem:[#allocation11 + $0x12d8] sm:$0xff] }
 0x16a   :  { %3248 = vmatpush1.bf16.msra.mxu1 %v3247_v49  ;;  %3122 = vmatprep.subr.bf16.mxu0 %v3121_v50  ;;  %v636_v49 = vld [vmem:[#allocation11 + $0xe30] sm:$0xff]  ;;  %v3269_v50 = vpack.c.bf16 %v645_v43, %v637_v42  ;;  %v3143_v56 = vpack.c.bf16 %v642_v48, %v634_v47  ;;  %v3289_v42 = vpack.c.bf16 %v1395_v36, %v1387_v35  ;;  %v1386_v43 = vld [vmem:[#allocation11 + $0x1080] sm:$0xff]  ;;  %v1403_v48 = vld [vmem:[#allocation11 + $0x1108] sm:$0xff] }
 0x16b   :  { %3250 = vmatprep.subr.bf16.mxu1 %v3249_v54  ;;  %v653_v54 = vld [vmem:[#allocation11 + $0xeb8] sm:$0xff]  ;;  %v3271_v57 = vpack.c.bf16 %v644_v51, %v636_v49  ;;  %v1396_v47 = vld [vmem:[#allocation11 + $0x10d0] sm:$0xff]  ;;  %v1411_v49 = vld [vmem:[#allocation11 + $0x1148] sm:$0xff] }
 0x16c   :  { %v1405_v51 = vld [vmem:[#allocation11 + $0x1118] sm:$0xff]  ;;  %v1475_v35 = vld [vmem:[#allocation11 + $0x1348] sm:$0xff] }
 0x16d   :  { %3124 = vmatpush1.bf16.msra.mxu0 %v3123_v60  ;;  %v658_v60 = vld [vmem:[#allocation11 + $0xee0] sm:$0xff]  ;;  %v1469_v36 = vld [vmem:[#allocation11 + $0x1318] sm:$0xff] }
 0x16e   :  { %3252 = vmatpush1.bf16.msra.mxu1 %v3251_v61  ;;  %3126 = vmatprep.subr.bf16.mxu0 %v3125_v62  ;;  %v652_v61 = vld [vmem:[#allocation11 + $0xeb0] sm:$0xff]  ;;  %v3273_v62 = vpack.c.bf16 %v661_v55, %v653_v54  ;;  %v3147_v4 = vpack.c.bf16 %v658_v60, %v650_v59  ;;  %v3293_v55 = vpack.c.bf16 %v1411_v49, %v1403_v48  ;;  %v1491_v48 = vld [vmem:[#allocation11 + $0x13c8] sm:$0xff]  ;;  %v1485_v49 = vld [vmem:[#allocation11 + $0x1398] sm:$0xff] }
 0x16f   :  { %3254 = vmatprep.subr.bf16.mxu1 %v3253_v2  ;;  %v669_v2 = vld [vmem:[#allocation11 + $0xf38] sm:$0xff]  ;;  %v3275_v5 = vpack.c.bf16 %v660_v63, %v652_v61  ;;  %v3421_v59 = vpack.c.bf16 %v1413_v52, %v1405_v51  ;;  %v1412_v60 = vld [vmem:[#allocation11 + $0x1150] sm:$0xff]  ;;  %v1419_v61 = vld [vmem:[#allocation11 + $0x1188] sm:$0xff] }
 0x170   :  { %v1421_v63 = vld [vmem:[#allocation11 + $0x1198] sm:$0xff]  ;;  %v1482_v52 = vld [vmem:[#allocation11 + $0x1380] sm:$0xff] }
 0x171   :  { %3128 = vmatpush1.bf16.msra.mxu0 %v3127_v9  ;;  %v674_v9 = vld [vmem:[#allocation11 + $0xf60] sm:$0xff]  ;;  %v1493_v51 = vld [vmem:[#allocation11 + $0x13d8] sm:$0xff] }
 0x172   :  { %3256 = vmatpush1.bf16.msra.mxu1 %v3255_v7  ;;  %3130 = vmatprep.subr.bf16.mxu0 %v3129_v10  ;;  %v668_v7 = vld [vmem:[#allocation11 + $0xf30] sm:$0xff]  ;;  %v3277_v10 = vpack.c.bf16 %v677_v3, %v669_v2  ;;  %v3151_v15 = vpack.c.bf16 %v674_v9, %v666_v8  ;;  %v3425_v8 = vpack.c.bf16 %v1429_v0, %v1421_v63  ;;  %v1509_v0 = vld [vmem:[#allocation11 + $0x1458] sm:$0xff] }
 0x173   :  { %3258 = vmatprep.subr.bf16.mxu1 %v3257_v13  ;;  %v685_v13 = vld [vmem:[#allocation11 + $0xfb8] sm:$0xff]  ;;  %v3279_v16 = vpack.c.bf16 %v676_v11, %v668_v7  ;;  %v1428_v9 = vld [vmem:[#allocation11 + $0x11d0] sm:$0xff]  ;;  %v1435_v7 = vld [vmem:[#allocation11 + $0x1208] sm:$0xff] }
 0x174   :  { %v1437_v11 = vld [vmem:[#allocation11 + $0x1218] sm:$0xff] }
 0x175   :  { %3132 = vmatpush1.bf16.msra.mxu0 %v3131_v19  ;;  %v690_v19 = vld [vmem:[#allocation11 + $0xfe0] sm:$0xff] }
 0x176   :  { %3260 = vmatpush1.bf16.msra.mxu1 %v3259_v20  ;;  %3134 = vmatprep.subr.bf16.mxu0 %v3133_v21  ;;  %v684_v20 = vld [vmem:[#allocation11 + $0xfb0] sm:$0xff]  ;;  %v3281_v21 = vpack.c.bf16 %v693_v14, %v685_v13  ;;  %v3155_v27 = vpack.c.bf16 %v690_v19, %v682_v18  ;;  %v3429_v18 = vpack.c.bf16 %v1445_v12, %v1437_v11  ;;  %v1515_v11 = vld [vmem:[#allocation11 + $0x1488] sm:$0xff] }
 0x177   :  { %3262 = vmatprep.subr.bf16.mxu1 %v3261_v25  ;;  %v1373_v25 = vld [vmem:[#allocation11 + $0x1018] sm:$0xff]  ;;  %v3283_v28 = vpack.c.bf16 %v692_v22, %v684_v20  ;;  %v1444_v19 = vld [vmem:[#allocation11 + $0x1250] sm:$0xff]  ;;  %v1451_v20 = vld [vmem:[#allocation11 + $0x1288] sm:$0xff] }
 0x178   :  { %v1453_v22 = vld [vmem:[#allocation11 + $0x1298] sm:$0xff]  ;;  %v1523_v12 = vld [vmem:[#allocation11 + $0x14c8] sm:$0xff] }
 0x179   :  { %3136 = vmatpush1.bf16.msra.mxu0 %v3135_v31  ;;  %v1378_v31 = vld [vmem:[#allocation11 + $0x1040] sm:$0xff] }
 0x17a   :  { %3264 = vmatpush1.bf16.msra.mxu1 %v3263_v32  ;;  %3138 = vmatprep.subr.bf16.mxu0 %v3137_v33  ;;  %v1372_v32 = vld [vmem:[#allocation11 + $0x1010] sm:$0xff]  ;;  %v3413_v33 = vpack.c.bf16 %v1381_v26, %v1373_v25  ;;  %v3287_v40 = vpack.c.bf16 %v1378_v31, %v1370_v30 }
 0x17b   :  { %3266 = vmatprep.subr.bf16.mxu1 %v3265_v37  ;;  %v1389_v37 = vld [vmem:[#allocation11 + $0x1098] sm:$0xff]  ;;  %v3415_v41 = vpack.c.bf16 %v1380_v34, %v1372_v32  ;;  %v1452_v30 = vld [vmem:[#allocation11 + $0x1290] sm:$0xff]  ;;  %v1467_v34 = vld [vmem:[#allocation11 + $0x1308] sm:$0xff] }
 0x17c   :  { %v1460_v31 = vld [vmem:[#allocation11 + $0x12d0] sm:$0xff] }
 0x17d   :  { %3140 = vmatpush1.bf16.msra.mxu0 %v3139_v44  ;;  %v1394_v44 = vld [vmem:[#allocation11 + $0x10c0] sm:$0xff] }
 0x17e   :  { %3268 = vmatpush1.bf16.msra.mxu1 %v3267_v45  ;;  %3142 = vmatprep.subr.bf16.mxu0 %v3141_v46  ;;  %v1388_v45 = vld [vmem:[#allocation11 + $0x1090] sm:$0xff]  ;;  %v3417_v46 = vpack.c.bf16 %v1397_v39, %v1389_v37  ;;  %v3291_v53 = vpack.c.bf16 %v1394_v44, %v1386_v43  ;;  %v3309_v37 = vpack.c.bf16 %v1475_v35, %v1467_v34  ;;  %v1477_v39 = vld [vmem:[#allocation11 + $0x1358] sm:$0xff]  ;;  %v1547_v34 = vld [vmem:[#allocation11 + $0x1588] sm:$0xff] }
 0x17f   :  { %3270 = vmatprep.subr.bf16.mxu1 %v3269_v50  ;;  %v3944_v50 = vld [vmem:[#allocation8] sm:$0xff]  ;;  %v3419_v54 = vpack.c.bf16 %v1396_v47, %v1388_v45  ;;  %v1468_v44 = vld [vmem:[#allocation11 + $0x1310] sm:$0xff]  ;;  %v1483_v47 = vld [vmem:[#allocation11 + $0x1388] sm:$0xff] }
 0x180   :  { %v1476_v45 = vld [vmem:[#allocation11 + $0x1350] sm:$0xff]  ;;  %v1555_v35 = vld [vmem:[#allocation11 + $0x15c8] sm:$0xff] }
 0x181   :  { %3144 = vmatpush1.bf16.msra.mxu0 %v3143_v56  ;;  %v1402_v56 = vld [vmem:[#allocation11 + $0x1100] sm:$0xff] }
 0x182   :  { %3272 = vmatpush1.bf16.msra.mxu1 %v3271_v57  ;;  %3146 = vmatprep.subr.bf16.mxu0 %v3145_v58  ;;  %v1410_v57 = vld [vmem:[#allocation11 + $0x1140] sm:$0xff]  ;;  %v1404_v58 = vld [vmem:[#allocation11 + $0x1110] sm:$0xff] }
 0x183   :  { %3274 = vmatprep.subr.bf16.mxu1 %v3273_v62  ;;  %v1427_v62 = vld [vmem:[#allocation11 + $0x11c8] sm:$0xff]  ;;  %v3295_v1 = vpack.c.bf16 %v1410_v57, %v1402_v56  ;;  %v3423_v2 = vpack.c.bf16 %v1412_v60, %v1404_v58  ;;  %v1484_v56 = vld [vmem:[#allocation11 + $0x1390] sm:$0xff] }
 0x184   :  { %v3297_v3 = vpack.c.bf16 %v1427_v62, %v1419_v61  ;;  %v1492_v57 = vld [vmem:[#allocation11 + $0x13d0] sm:$0xff]  ;;  %v1507_v60 = vld [vmem:[#allocation11 + $0x1448] sm:$0xff]  ;;  %v1501_v61 = vld [vmem:[#allocation11 + $0x1418] sm:$0xff] }
 0x185   :  { %3148 = vmatpush1.bf16.msra.mxu0 %v3147_v4  ;;  %v1418_v4 = vld [vmem:[#allocation11 + $0x1180] sm:$0xff]  ;;  %v3443_v58 = vpack.c.bf16 %v1492_v57, %v1484_v56  ;;  %v1564_v56 = vld [vmem:[#allocation11 + $0x1610] sm:$0xff] }
 0x186   :  { %3276 = vmatpush1.bf16.msra.mxu1 %v3275_v5  ;;  %3150 = vmatprep.subr.bf16.mxu0 %v3149_v6  ;;  %v1426_v5 = vld [vmem:[#allocation11 + $0x11c0] sm:$0xff]  ;;  %v1420_v6 = vld [vmem:[#allocation11 + $0x1190] sm:$0xff] }
 0x187   :  { %3278 = vmatprep.subr.bf16.mxu1 %v3277_v10  ;;  %v1443_v10 = vld [vmem:[#allocation11 + $0x1248] sm:$0xff]  ;;  %v3299_v38 = vpack.c.bf16 %v1426_v5, %v1418_v4  ;;  %v3427_v13 = vpack.c.bf16 %v1428_v9, %v1420_v6  ;;  %v3445_v5 = vpack.c.bf16 %v1509_v0, %v1501_v61  ;;  %v1508_v9 = vld [vmem:[#allocation11 + $0x1450] sm:$0xff]  ;;  %v1581_v61 = vld [vmem:[#allocation11 + $0x1698] sm:$0xff] }
 0x188   :  { %v3301_v14 = vpack.c.bf16 %v1443_v10, %v1435_v7  ;;  %v1572_v57 = vld [vmem:[#allocation11 + $0x1650] sm:$0xff]  ;;  %v1589_v0 = vld [vmem:[#allocation11 + $0x16d8] sm:$0xff] }
 0x189   :  { %3152 = vmatpush1.bf16.msra.mxu0 %v3151_v15  ;;  %v1434_v15 = vld [vmem:[#allocation11 + $0x1200] sm:$0xff] }
 0x18a   :  { %3280 = vmatpush1.bf16.msra.mxu1 %v3279_v16  ;;  %3154 = vmatprep.subr.bf16.mxu0 %v3153_v17  ;;  %v1442_v16 = vld [vmem:[#allocation11 + $0x1240] sm:$0xff]  ;;  %v1436_v17 = vld [vmem:[#allocation11 + $0x1210] sm:$0xff] }
 0x18b   :  { %3282 = vmatprep.subr.bf16.mxu1 %v3281_v21  ;;  %v1459_v21 = vld [vmem:[#allocation11 + $0x12c8] sm:$0xff]  ;;  %v3303_v24 = vpack.c.bf16 %v1442_v16, %v1434_v15  ;;  %v3431_v25 = vpack.c.bf16 %v1444_v19, %v1436_v17  ;;  %v1514_v15 = vld [vmem:[#allocation11 + $0x1480] sm:$0xff]  ;;  %v1524_v19 = vld [vmem:[#allocation11 + $0x14d0] sm:$0xff] }
 0x18c   :  { %v3305_v26 = vpack.c.bf16 %v1459_v21, %v1451_v20  ;;  %v1522_v17 = vld [vmem:[#allocation11 + $0x14c0] sm:$0xff] }
 0x18d   :  { %3156 = vmatpush1.bf16.msra.mxu0 %v3155_v27  ;;  %v1450_v27 = vld [vmem:[#allocation11 + $0x1280] sm:$0xff]  ;;  %v3323_v20 = vpack.c.bf16 %v1522_v17, %v1514_v15 }
 0x18e   :  { %3284 = vmatpush1.bf16.msra.mxu1 %v3283_v28  ;;  %3286 = vmatprep.subr.bf16.mxu0 %v3285_v29  ;;  %v1458_v28 = vld [vmem:[#allocation11 + $0x12c0] sm:$0xff]  ;;  %v3433_v29 = vpack.c.bf16 %v1461_v23, %v1453_v22  ;;  %v1531_v22 = vld [vmem:[#allocation11 + $0x1508] sm:$0xff] }
 0x18f   :  { %3414 = vmatprep.subr.bf16.mxu1 %v3413_v33  ;;  %v3307_v32 = vpack.c.bf16 %v1458_v28, %v1450_v27  ;;  %v3435_v33 = vpack.c.bf16 %v1460_v31, %v1452_v30  ;;  %v1539_v23 = vld [vmem:[#allocation11 + $0x1548] sm:$0xff]  ;;  %v1530_v27 = vld [vmem:[#allocation11 + $0x1500] sm:$0xff]  ;;  %v1532_v31 = vld [vmem:[#allocation11 + $0x1510] sm:$0xff] }
 0x190   :  { %1156 = vmatmul.mubr.f32.vlgmr.msra.gmra.mrb[2].mxu0 %v3944_v50  ;;  %v1538_v28 = vld [vmem:[#allocation11 + $0x1540] sm:$0xff] }
 0x191   :  { %1298 = vmatmul.mubr.f32.vlgmr.msra.gmra.mrb[2].mxu1 %v3944_v50  ;;  %3288 = vmatpush1.bf16.msra.mxu0 %v3287_v40  ;;  %v1466_v40 = vld [vmem:[#allocation11 + $0x1300] sm:$0xff]  ;;  %v3313_v50 = vpack.c.bf16 %v1491_v48, %v1483_v47  ;;  %v3327_v30 = vpack.c.bf16 %v1538_v28, %v1530_v27  ;;  %v1563_v47 = vld [vmem:[#allocation11 + $0x1608] sm:$0xff] }
 0x192   :  { %3416 = vmatpush1.bf16.msra.mxu1 %v3415_v41  ;;  %3290 = vmatprep.subr.bf16.mxu0 %v3289_v42  ;;  %v1474_v41 = vld [vmem:[#allocation11 + $0x1340] sm:$0xff]  ;;  %v3437_v42 = vpack.c.bf16 %v1477_v39, %v1469_v36  ;;  %v1549_v36 = vld [vmem:[#allocation11 + $0x1598] sm:$0xff]  ;;  %v1571_v48 = vld [vmem:[#allocation11 + $0x1648] sm:$0xff] }
 0x193   :  { %3418 = vmatprep.subr.bf16.mxu1 %v3417_v46  ;;  %v3311_v43 = vpack.c.bf16 %v1474_v41, %v1466_v40  ;;  %v3439_v46 = vpack.c.bf16 %v1476_v45, %v1468_v44  ;;  %v1557_v39 = vld [vmem:[#allocation11 + $0x15d8] sm:$0xff]  ;;  %v1546_v40 = vld [vmem:[#allocation11 + $0x1580] sm:$0xff]  ;;  %v1548_v44 = vld [vmem:[#allocation11 + $0x1590] sm:$0xff] }
 0x194   :  { %v1554_v41 = vld [vmem:[#allocation11 + $0x15c0] sm:$0xff]  ;;  %v1556_v45 = vld [vmem:[#allocation11 + $0x15d0] sm:$0xff] }
 0x195   :  { %3292 = vmatpush1.bf16.msra.mxu0 %v3291_v53  ;;  %v1490_v53 = vld [vmem:[#allocation11 + $0x13c0] sm:$0xff] }
 0x196   :  { %3420 = vmatpush1.bf16.msra.mxu1 %v3419_v54  ;;  %3294 = vmatprep.subr.bf16.mxu0 %v3293_v55  ;;  %v3441_v54 = vpack.c.bf16 %v1493_v51, %v1485_v49  ;;  %v3315_v55 = vpack.c.bf16 %v1490_v53, %v1482_v52  ;;  %v1565_v49 = vld [vmem:[#allocation11 + $0x1618] sm:$0xff]  ;;  %v1562_v52 = vld [vmem:[#allocation11 + $0x1600] sm:$0xff] }
 0x197   :  { %3422 = vmatprep.subr.bf16.mxu1 %v3421_v59  ;;  %v1499_v59 = vld [vmem:[#allocation11 + $0x1408] sm:$0xff]  ;;  %v1573_v51 = vld [vmem:[#allocation11 + $0x1658] sm:$0xff]  ;;  %v1570_v53 = vld [vmem:[#allocation11 + $0x1640] sm:$0xff] }
 0x198   :  { %v3317_v63 = vpack.c.bf16 %v1507_v60, %v1499_v59  ;;  %v1579_v59 = vld [vmem:[#allocation11 + $0x1688] sm:$0xff]  ;;  %v1594_v15 = vld [vmem:[#allocation11 + $0x1700] sm:$0xff] }
 0x199   :  { %3296 = vmatpush1.bf16.msra.mxu0 %v3295_v1  ;;  %v1498_v1 = vld [vmem:[#allocation11 + $0x1400] sm:$0xff]  ;;  %v1587_v60 = vld [vmem:[#allocation11 + $0x16c8] sm:$0xff] }
 0x19a   :  { %3424 = vmatpush1.bf16.msra.mxu1 %v3423_v2  ;;  %3298 = vmatprep.subr.bf16.mxu0 %v3297_v3  ;;  %v1506_v2 = vld [vmem:[#allocation11 + $0x1440] sm:$0xff] }
 0x19b   :  { %3426 = vmatprep.subr.bf16.mxu1 %v3425_v8  ;;  %v3319_v6 = vpack.c.bf16 %v1506_v2, %v1498_v1  ;;  %v1500_v8 = vld [vmem:[#allocation11 + $0x1410] sm:$0xff]  ;;  %v1578_v1 = vld [vmem:[#allocation11 + $0x1680] sm:$0xff] }
 0x19c   :  { %v3447_v10 = vpack.c.bf16 %v1508_v9, %v1500_v8  ;;  %v1586_v2 = vld [vmem:[#allocation11 + $0x16c0] sm:$0xff]  ;;  %v1580_v8 = vld [vmem:[#allocation11 + $0x1690] sm:$0xff] }
 0x19d   :  { %3300 = vmatpush1.bf16.msra.mxu0 %v3299_v38  ;;  %v1517_v38 = vld [vmem:[#allocation11 + $0x1498] sm:$0xff]  ;;  %v1588_v9 = vld [vmem:[#allocation11 + $0x16d0] sm:$0xff]  ;;  %v1610_v27 = vld [vmem:[#allocation11 + $0x1780] sm:$0xff] }
 0x19e   :  { %3428 = vmatpush1.bf16.msra.mxu1 %v3427_v13  ;;  %3302 = vmatprep.subr.bf16.mxu0 %v3301_v14  ;;  %v3321_v13 = vpack.c.bf16 %v1523_v12, %v1515_v11  ;;  %v1525_v14 = vld [vmem:[#allocation11 + $0x14d8] sm:$0xff]  ;;  %v1595_v11 = vld [vmem:[#allocation11 + $0x1708] sm:$0xff]  ;;  %v1618_v28 = vld [vmem:[#allocation11 + $0x17c0] sm:$0xff] }
 0x19f   :  { %3430 = vmatprep.subr.bf16.mxu1 %v3429_v18  ;;  %v3449_v16 = vpack.c.bf16 %v1525_v14, %v1517_v38  ;;  %v1516_v18 = vld [vmem:[#allocation11 + $0x1490] sm:$0xff]  ;;  %v1603_v12 = vld [vmem:[#allocation11 + $0x1748] sm:$0xff]  ;;  %v1597_v38 = vld [vmem:[#allocation11 + $0x1718] sm:$0xff] }
 0x1a0   :  { %v3451_v21 = vpack.c.bf16 %v1524_v19, %v1516_v18  ;;  %v1605_v14 = vld [vmem:[#allocation11 + $0x1758] sm:$0xff]  ;;  %v1596_v19 = vld [vmem:[#allocation11 + $0x1710] sm:$0xff] }
 0x1a1   :  { %3304 = vmatpush1.bf16.msra.mxu0 %v3303_v24  ;;  %v1533_v24 = vld [vmem:[#allocation11 + $0x1518] sm:$0xff]  ;;  %v3469_v17 = vpack.c.bf16 %v1605_v14, %v1597_v38 }
 0x1a2   :  { %3432 = vmatpush1.bf16.msra.mxu1 %v3431_v25  ;;  %3306 = vmatprep.subr.bf16.mxu0 %v3305_v26  ;;  %v3325_v25 = vpack.c.bf16 %v1539_v23, %v1531_v22  ;;  %v1541_v26 = vld [vmem:[#allocation11 + $0x1558] sm:$0xff]  ;;  %v1611_v22 = vld [vmem:[#allocation11 + $0x1788] sm:$0xff] }
 0x1a3   :  { %3434 = vmatprep.subr.bf16.mxu1 %v3433_v29  ;;  %v3453_v29 = vpack.c.bf16 %v1541_v26, %v1533_v24  ;;  %v1619_v23 = vld [vmem:[#allocation11 + $0x17c8] sm:$0xff]  ;;  %v1613_v24 = vld [vmem:[#allocation11 + $0x1798] sm:$0xff] }
 0x1a4   :  { %v1621_v26 = vld [vmem:[#allocation11 + $0x17d8] sm:$0xff] }
 0x1a5   :  { %3308 = vmatpush1.bf16.msra.mxu0 %v3307_v32  ;;  %v1540_v32 = vld [vmem:[#allocation11 + $0x1550] sm:$0xff] }
 0x1a6   :  { %3436 = vmatpush1.bf16.msra.mxu1 %v3435_v33  ;;  %3310 = vmatprep.subr.bf16.mxu0 %v3309_v37  ;;  %v3455_v33 = vpack.c.bf16 %v1540_v32, %v1532_v31  ;;  %v3329_v37 = vpack.c.bf16 %v1555_v35, %v1547_v34  ;;  %v1612_v31 = vld [vmem:[#allocation11 + $0x1790] sm:$0xff]  ;;  %v1627_v34 = vld [vmem:[#allocation11 + $0x1808] sm:$0xff] }
 0x1a7   :  { %3438 = vmatprep.subr.bf16.mxu1 %v3437_v42  ;;  %v3457_v42 = vpack.c.bf16 %v1557_v39, %v1549_v36  ;;  %v1620_v32 = vld [vmem:[#allocation11 + $0x17d0] sm:$0xff]  ;;  %v1635_v35 = vld [vmem:[#allocation11 + $0x1848] sm:$0xff]  ;;  %v1629_v36 = vld [vmem:[#allocation11 + $0x1818] sm:$0xff] }
 0x1a8   :  { %v1637_v39 = vld [vmem:[#allocation11 + $0x1858] sm:$0xff] }
 0x1a9   :  { %3312 = vmatpush1.bf16.msra.mxu0 %v3311_v43  ;;  %v3331_v43 = vpack.c.bf16 %v1554_v41, %v1546_v40  ;;  %v3477_v40 = vpack.c.bf16 %v1637_v39, %v1629_v36  ;;  %v696_v41 = vlaneseq }
 0x1aa   :  { %3440 = vmatpush1.bf16.msra.mxu1 %v3439_v46  ;;  %3314 = vmatprep.subr.bf16.mxu0 %v3313_v50  ;;  %v3459_v46 = vpack.c.bf16 %v1556_v45, %v1548_v44  ;;  %v3333_v50 = vpack.c.bf16 %v1571_v48, %v1563_v47  ;;  %v694_v44 = vld [vmem:[#allocation13] sm:$0xff] }
 0x1ab   :  { %3442 = vmatprep.subr.bf16.mxu1 %v3441_v54  ;;  %v3461_v54 = vpack.c.bf16 %v1573_v51, %v1565_v49 }
 0x1ad   :  { %3316 = vmatpush1.bf16.msra.mxu0 %v3315_v55  ;;  %v3335_v55 = vpack.c.bf16 %v1570_v53, %v1562_v52 }
 0x1ae   :  { %3444 = vmatpush1.bf16.msra.mxu1 %v3443_v58  ;;  %3318 = vmatprep.subr.bf16.mxu0 %v3317_v63  ;;  %v3463_v58 = vpack.c.bf16 %v1572_v57, %v1564_v56  ;;  %v3337_v63 = vpack.c.bf16 %v1587_v60, %v1579_v59 }
 0x1af   :  { %3446 = vmatprep.subr.bf16.mxu1 %v3445_v5  ;;  %v3465_v5 = vpack.c.bf16 %v1589_v0, %v1581_v61 }
 0x1b1   :  { %3320 = vmatpush1.bf16.msra.mxu0 %v3319_v6  ;;  %v3339_v6 = vpack.c.bf16 %v1586_v2, %v1578_v1 }
 0x1b2   :  { %3448 = vmatpush1.bf16.msra.mxu1 %v3447_v10  ;;  %3322 = vmatprep.subr.bf16.mxu0 %v3321_v13  ;;  %v3467_v10 = vpack.c.bf16 %v1588_v9, %v1580_v8  ;;  %v3341_v13 = vpack.c.bf16 %v1603_v12, %v1595_v11 }
 0x1b3   :  { %3450 = vmatprep.subr.bf16.mxu1 %v3449_v16  ;;  %v1602_v16 = vld [vmem:[#allocation11 + $0x1740] sm:$0xff] }
 0x1b4   :  { %v3343_v18 = vpack.c.bf16 %v1602_v16, %v1594_v15 }
 0x1b5   :  { %3324 = vmatpush1.bf16.msra.mxu0 %v3323_v20  ;;  %v1604_v20 = vld [vmem:[#allocation11 + $0x1750] sm:$0xff] }
 0x1b6   :  { %3452 = vmatpush1.bf16.msra.mxu1 %v3451_v21  ;;  %3326 = vmatprep.subr.bf16.mxu0 %v3325_v25  ;;  %v3471_v21 = vpack.c.bf16 %v1604_v20, %v1596_v19  ;;  %v3345_v25 = vpack.c.bf16 %v1619_v23, %v1611_v22 }
 0x1b7   :  { %3454 = vmatprep.subr.bf16.mxu1 %v3453_v29  ;;  %v3473_v29 = vpack.c.bf16 %v1621_v26, %v1613_v24  ;;  %v1342_v24 = vld [vmem:[#allocation10] sm:$0xff]  ;;  %v1343_v26 = vld [vmem:[#allocation10 + $0x8] sm:$0xff] }
 0x1b9   :  { %3328 = vmatpush1.bf16.msra.mxu0 %v3327_v30  ;;  %v3347_v30 = vpack.c.bf16 %v1618_v28, %v1610_v27 }
 0x1ba   :  { %3456 = vmatpush1.bf16.msra.mxu1 %v3455_v33  ;;  %3330 = vmatprep.subr.bf16.mxu0 %v3329_v37  ;;  %v3475_v33 = vpack.c.bf16 %v1620_v32, %v1612_v31  ;;  %v3349_v37 = vpack.c.bf16 %v1635_v35, %v1627_v34 }
 0x1bb   :  { %3458 = vmatprep.subr.bf16.mxu1 %v3457_v42  ;;  %v4418_v42 = vshrl.u32 %v696_v41, 7  ;;  %v1626_v41 = vld [vmem:[#allocation11 + $0x1800] sm:$0xff] }
 0x1bd   :  { %3332 = vmatpush1.bf16.msra.mxu0 %v3331_v43  ;;  %v698_v43 = vsub.s32 0, %v4418_v42  ;;  %v706_v45 = vsub.s32 2, %v4418_v42  ;;  %v710_v47 = vsub.s32 3, %v4418_v42 }
 0x1be   :  { %3460 = vmatpush1.bf16.msra.mxu1 %v3459_v46  ;;  %3334 = vmatprep.subr.bf16.mxu0 %v3333_v50  ;;  %v702_v46 = vsub.s32 1, %v4418_v42 }
 0x1bf   :  { %3462 = vmatprep.subr.bf16.mxu1 %v3461_v54  ;;  %v699_v48 = vrot.slane %v694_v44, %v698_v43  ;;  %v707_v49 = vrot.slane %v694_v44, %v706_v45  ;;  %v711_v51 = vrot.slane %v694_v44, %v710_v47 }
 0x1c0   :  { %v703_v50 = vrot.slane %v694_v44, %v702_v46 }
 0x1c1   :  { %3336 = vmatpush1.bf16.msra.mxu0 %v3335_v55 }
 0x1c2   :  { %3464 = vmatpush1.bf16.msra.mxu1 %v3463_v58  ;;  %3338 = vmatprep.subr.bf16.mxu0 %v3337_v63  ;;  %v714_v63 = vsub.s32 4, %v4418_v42 }
 0x1c3   :  { %3466 = vmatprep.subr.bf16.mxu1 %v3465_v5 }
 0x1c5   :  { %3340 = vmatpush1.bf16.msra.mxu0 %v3339_v6  ;;  %v715_v6 = vrot.slane %v694_v44, %v714_v63 }
 0x1c6   :  { %3468 = vmatpush1.bf16.msra.mxu1 %v3467_v10  ;;  %3342 = vmatprep.subr.bf16.mxu0 %v3341_v13 }
 0x1c7   :  { %3470 = vmatprep.subr.bf16.mxu1 %v3469_v17 }
 0x1c9   :  { %3344 = vmatpush1.bf16.msra.mxu0 %v3343_v18 }
 0x1ca   :  { %3472 = vmatpush1.bf16.msra.mxu1 %v3471_v21  ;;  %3346 = vmatprep.subr.bf16.mxu0 %v3345_v25 }
 0x1cb   :  { %3474 = vmatprep.subr.bf16.mxu1 %v3473_v29 }
 0x1cd   :  { %3348 = vmatpush1.bf16.msra.mxu0 %v3347_v30 }
 0x1ce   :  { %3476 = vmatpush1.bf16.msra.mxu1 %v3475_v33  ;;  %3350 = vmatprep.subr.bf16.mxu0 %v3349_v37 }
 0x1cf   :  { %3478 = vmatprep.subr.bf16.mxu1 %v3477_v40 }
 0x1e3   :  { %v4410_v62 = vpop.f32.mrb[0].mxu0 }
 0x1e4   :  { %v4412_v3 = vpop.f32.mrb[0].mxu1  ;;  %v4414_v4 = vpop.f32.mrb[1].mxu0  ;;  %v3829_v52 = vadd.f32 %v4410_v62, %v699_v48  ;;  %v722_v62 = vsub.s32 6, %v4418_v42 }
 0x1e5   :  { %v4416_v7 = vpop.f32.mrb[1].mxu1  ;;  %v3831_v53 = vadd.f32 %v4412_v3, %v707_v49  ;;  %v3830_v54 = vadd.f32 %v4414_v4, %v703_v50  ;;  %v718_v3 = vsub.s32 5, %v4418_v42  ;;  %v1628_v49 = vld [vmem:[#allocation11 + $0x1810] sm:$0xff] }
 0x1e6   :  { %v3832_v55 = vadd.f32 %v4416_v7, %v711_v51  ;;  %v2725_v56 = vmul.f32 -1.442695, %v3829_v52  ;;  %v726_v7 = vsub.s32 7, %v4418_v42  ;;  %v723_v9 = vrot.slane %v694_v44, %v722_v62  ;;  %v1636_v50 = vld [vmem:[#allocation11 + $0x1850] sm:$0xff]  ;;  %v1643_v51 = vld [vmem:[#allocation11 + $0x1888] sm:$0xff] }
 0x1e7   :  { %v2727_v57 = vmul.f32 -1.442695, %v3831_v53  ;;  %v2726_v58 = vmul.f32 -1.442695, %v3830_v54  ;;  %v719_v10 = vrot.slane %v694_v44, %v718_v3  ;;  %v1651_v54 = vld [vmem:[#allocation11 + $0x18c8] sm:$0xff] }
 0x1e8   :  { %v2728_v59 = vmul.f32 -1.442695, %v3832_v55  ;;  %3879 = vpow2.f32 %v2725_v56  ;;  %v727_v11 = vrot.slane %v694_v44, %v726_v7  ;;  %v1634_v44 = vld [vmem:[#allocation11 + $0x1840] sm:$0xff]  ;;  %v1645_v55 = vld [vmem:[#allocation11 + $0x1898] sm:$0xff] }
 0x1e9   :  { %3881 = vpow2.f32 %v2727_v57  ;;  %v1653_v56 = vld [vmem:[#allocation11 + $0x18d8] sm:$0xff] }
 0x1ea   :  { %3883 = vpow2.f32 %v2726_v58 }
 0x1eb   :  { %3885 = vpow2.f32 %v2728_v59  ;;  %v3351_v59 = vpack.c.bf16 %v1634_v44, %v1626_v41  ;;  %v1692_v44 = vld [vmem:[#allocation11 + $0x1a10] sm:$0xff] }
 0x1f2   :  { %v3880_v60 = vpop.eup %3879 }
 0x1f3   :  { %v3882_v61 = vpop.eup %3881  ;;  %v1310_v1 = vadd.f32 1.0, %v3880_v60  ;;  %v3479_v60 = vpack.c.bf16 %v1636_v50, %v1628_v49  ;;  %v1707_v49 = vld [vmem:[#allocation11 + $0x1a88] sm:$0xff] }
 0x1f4   :  { %v3884_v0 = vpop.eup %3883  ;;  %v1322_v2 = vadd.f32 1.0, %v3882_v61  ;;  %v1642_v61 = vld [vmem:[#allocation11 + $0x1880] sm:$0xff]  ;;  %v1715_v50 = vld [vmem:[#allocation11 + $0x1ac8] sm:$0xff] }
 0x1f5   :  { %v3886_v4 = vpop.eup %3885  ;;  %v1311_v5 = vadd.f32 1.0, %v3884_v0  ;;  %3887 = vrcp.f32 %v1310_v1  ;;  %v1650_v0 = vld [vmem:[#allocation11 + $0x18c0] sm:$0xff]  ;;  %v3481_v1 = vpack.c.bf16 %v1653_v56, %v1645_v55 }
 0x1f6   :  { %v1323_v8 = vadd.f32 1.0, %v3886_v4  ;;  %3889 = vrcp.f32 %v1322_v2  ;;  %v3353_v4 = vpack.c.bf16 %v1651_v54, %v1643_v51  ;;  %v1644_v2 = vld [vmem:[#allocation11 + $0x1890] sm:$0xff]  ;;  %v1709_v51 = vld [vmem:[#allocation11 + $0x1a98] sm:$0xff]  ;;  %v1706_v55 = vld [vmem:[#allocation11 + $0x1a80] sm:$0xff] }
 0x1f7   :  { %3891 = vrcp.f32 %v1311_v5  ;;  %v1652_v5 = vld [vmem:[#allocation11 + $0x18d0] sm:$0xff]  ;;  %v1714_v56 = vld [vmem:[#allocation11 + $0x1ac0] sm:$0xff] }
 0x1f8   :  { %3893 = vrcp.f32 %v1323_v8  ;;  %v1667_v8 = vld [vmem:[#allocation11 + $0x1948] sm:$0xff] }
 0x1ff   :  { %v3888_v21 = vpop.eup %3887 }
 0x200   :  { %v3890_v22 = vpop.eup %3889 }
 0x201   :  { %v3892_v23 = vpop.eup %3891  ;;  %v1344_v29 = vmul.f32 %v3890_v22, %v1342_v24  ;;  %v1685_v22 = vld [vmem:[#allocation11 + $0x19d8] sm:$0xff] }
 0x202   :  { %v3894_v25 = vpop.eup %3893 }
 0x203   :  { %v1345_v31 = vmul.f32 %v3894_v25, %v1343_v26  ;;  %v1674_v25 = vld [vmem:[#allocation11 + $0x1980] sm:$0xff] }
 0x204   :  { %v1682_v26 = vld [vmem:[#allocation11 + $0x19c0] sm:$0xff] }
 0x263   :  { %v1157_v12 = vpop.f32.mrb[2].mxu0 }
 0x264   :  { %v3833_v38 = vadd.f32 %v1157_v12, %v715_v6  ;;  %v1299_v13 = vpop.f32.mrb[2].mxu1  ;;  %v1159_v14 = vpop.f32.mrb[3].mxu0  ;;  %v1659_v6 = vld [vmem:[#allocation11 + $0x1908] sm:$0xff]  ;;  %v3355_v12 = vpack.c.bf16 %v1650_v0, %v1642_v61  ;;  %v1716_v61 = vld [vmem:[#allocation11 + $0x1ad0] sm:$0xff] }
 0x265   :  { %v3835_v15 = vadd.f32 %v1299_v13, %v723_v9  ;;  %v3834_v16 = vadd.f32 %v1159_v14, %v719_v10  ;;  %v1301_v17 = vpop.f32.mrb[3].mxu1  ;;  %v1661_v9 = vld [vmem:[#allocation11 + $0x1918] sm:$0xff]  ;;  %v1658_v13 = vld [vmem:[#allocation11 + $0x1900] sm:$0xff]  ;;  %v1723_v0 = vld [vmem:[#allocation11 + $0x1b08] sm:$0xff] }
 0x266   :  { %3895 = vtanh.f32 %v3833_v38  ;;  %v3836_v18 = vadd.f32 %v1301_v17, %v727_v11  ;;  %v1669_v10 = vld [vmem:[#allocation11 + $0x1958] sm:$0xff]  ;;  %v3483_v38 = vpack.c.bf16 %v1652_v5, %v1644_v2  ;;  %v1666_v14 = vld [vmem:[#allocation11 + $0x1940] sm:$0xff]  ;;  %v1660_v17 = vld [vmem:[#allocation11 + $0x1910] sm:$0xff]  ;;  %v3371_v5 = vpack.c.bf16 %v1714_v56, %v1706_v55 }
 0x267   :  { %v2729_v19 = vmul.f32 -1.442695, %v3835_v15  ;;  %3897 = vtanh.f32 %v3834_v16  ;;  %v1368_v11 = vld [vmem:[#allocation2 + $0x18] sm:$0xff]  ;;  %v3357_v15 = vpack.c.bf16 %v1667_v8, %v1659_v6  ;;  %v3485_v16 = vpack.c.bf16 %v1669_v10, %v1661_v9  ;;  %v1722_v8 = vld [vmem:[#allocation11 + $0x1b00] sm:$0xff]  ;;  %v1787_v55 = vld [vmem:[#allocation11 + $0x1d08] sm:$0xff] }
 0x268   :  { %v2730_v20 = vmul.f32 -1.442695, %v3836_v18  ;;  %v1668_v18 = vld [vmem:[#allocation11 + $0x1950] sm:$0xff]  ;;  %v1733_v2 = vld [vmem:[#allocation11 + $0x1b58] sm:$0xff]  ;;  %v1730_v9 = vld [vmem:[#allocation11 + $0x1b40] sm:$0xff] }
 0x269   :  { %3899 = vpow2.f32 %v2729_v19  ;;  %v1675_v19 = vld [vmem:[#allocation11 + $0x1988] sm:$0xff]  ;;  %v3487_v24 = vpack.c.bf16 %v1668_v18, %v1660_v17  ;;  %v3375_v17 = vpack.c.bf16 %v1730_v9, %v1722_v8 }
 0x26a   :  { %3901 = vpow2.f32 %v2730_v20  ;;  %v1683_v20 = vld [vmem:[#allocation11 + $0x19c8] sm:$0xff] }
 0x26b   :  { %v1795_v56 = vld [vmem:[#allocation11 + $0x1d48] sm:$0xff] }
 0x26c   :  { %v1803_v8 = vld [vmem:[#allocation11 + $0x1d88] sm:$0xff] }
 0x26d   :  { %v1811_v9 = vld [vmem:[#allocation11 + $0x1dc8] sm:$0xff] }
 0x270   :  { %v3896_v27 = vpop.eup %3895 }
 0x271   :  { %v3898_v28 = vpop.eup %3897  ;;  %v1346_v30 = vmul.f32 %v3896_v27, %v3888_v21  ;;  %v1677_v21 = vld [vmem:[#allocation11 + $0x1998] sm:$0xff]  ;;  %v3361_v27 = vpack.c.bf16 %v1683_v20, %v1675_v19  ;;  %v1738_v19 = vld [vmem:[#allocation11 + $0x1b80] sm:$0xff] }
 0x272   :  { %v1347_v32 = vmul.f32 %v3898_v28, %v3892_v23  ;;  %v3359_v23 = vpack.c.bf16 %v1666_v14, %v1658_v13  ;;  %v3489_v28 = vpack.c.bf16 %v1685_v22, %v1677_v21  ;;  %v1739_v13 = vld [vmem:[#allocation11 + $0x1b88] sm:$0xff]  ;;  %v1746_v20 = vld [vmem:[#allocation11 + $0x1bc0] sm:$0xff] }
 0x273   :  { %v3900_v33 = vpop.eup %3899  ;;  %v1348_v34 = vadd.f32 %v1346_v30, %v1344_v29  ;;  %v1676_v29 = vld [vmem:[#allocation11 + $0x1990] sm:$0xff]  ;;  %v1747_v14 = vld [vmem:[#allocation11 + $0x1bc8] sm:$0xff] }
 0x274   :  { %v3902_v35 = vpop.eup %3901  ;;  %v1336_v36 = vadd.f32 1.0, %v3900_v33  ;;  %v1349_v37 = vadd.f32 %v1347_v32, %v1345_v31  ;;  %v1684_v30 = vld [vmem:[#allocation11 + $0x19d0] sm:$0xff]  ;;  %v1691_v31 = vld [vmem:[#allocation11 + $0x1a08] sm:$0xff]  ;;  %v1693_v33 = vld [vmem:[#allocation11 + $0x1a18] sm:$0xff]  ;;  %v3377_v21 = vpack.c.bf16 %v1747_v14, %v1739_v13 }
 0x275   :  { %3903 = vtanh.f32 %v1348_v34  ;;  %1354 = vst [vmem:[#allocation20] sm:$0xff] %v1348_v34  ;;  %v1337_v39 = vadd.f32 1.0, %v3902_v35  ;;  %v1699_v32 = vld [vmem:[#allocation11 + $0x1a48] sm:$0xff]  ;;  %v1701_v34 = vld [vmem:[#allocation11 + $0x1a58] sm:$0xff]  ;;  %v3363_v35 = vpack.c.bf16 %v1682_v26, %v1674_v25  ;;  %v1802_v13 = vld [vmem:[#allocation11 + $0x1d80] sm:$0xff] }
 0x276   :  { %3905 = vrcp.f32 %v1336_v36  ;;  %1355 = vst [vmem:[#allocation20 + $0x8] sm:$0xff] %v1349_v37  ;;  %v3491_v36 = vpack.c.bf16 %v1684_v30, %v1676_v29  ;;  %v3493_v41 = vpack.c.bf16 %v1701_v34, %v1693_v33  ;;  %v1755_v25 = vld [vmem:[#allocation11 + $0x1c08] sm:$0xff]  ;;  %v3379_v29 = vpack.c.bf16 %v1746_v20, %v1738_v19  ;;  %v1810_v14 = vld [vmem:[#allocation11 + $0x1dc0] sm:$0xff] }
 0x277   :  { %3907 = vtanh.f32 %v1349_v37  ;;  %v1690_v37 = vld [vmem:[#allocation11 + $0x1a00] sm:$0xff]  ;;  %v1763_v26 = vld [vmem:[#allocation11 + $0x1c48] sm:$0xff] }
 0x278   :  { %3909 = vrcp.f32 %v1337_v39  ;;  %v1698_v39 = vld [vmem:[#allocation11 + $0x1a40] sm:$0xff]  ;;  %v3381_v33 = vpack.c.bf16 %v1763_v26, %v1755_v25  ;;  %v1819_v19 = vld [vmem:[#allocation11 + $0x1e08] sm:$0xff] }
 0x279   :  { %v1827_v20 = vld [vmem:[#allocation11 + $0x1e48] sm:$0xff]  ;;  %v1818_v25 = vld [vmem:[#allocation11 + $0x1e00] sm:$0xff] }
 0x27a   :  { %v1826_v26 = vld [vmem:[#allocation11 + $0x1e40] sm:$0xff] }
 0x27f   :  { %v3904_v40 = vpop.eup %3903 }
 0x280   :  { %v3906_v48 = vpop.eup %3905 }
 0x281   :  { %v3908_v52 = vpop.eup %3907  ;;  %v1352_v53 = vmul.f32 %v3906_v48, %v3904_v40  ;;  %v3365_v40 = vpack.c.bf16 %v1699_v32, %v1691_v31  ;;  %v1700_v48 = vld [vmem:[#allocation11 + $0x1a50] sm:$0xff]  ;;  %v1754_v31 = vld [vmem:[#allocation11 + $0x1c00] sm:$0xff] }
 0x282   :  { %v3910_v57 = vpop.eup %3909  ;;  %v3495_v54 = vpack.c.bf16 %v1700_v48, %v1692_v44  ;;  %v1762_v32 = vld [vmem:[#allocation11 + $0x1c40] sm:$0xff] }
 0x283   :  { %1356 = vst [vmem:[#allocation18] sm:$0xff] %v1352_v53  ;;  %1358 = vst [vmem:[#allocation2] sm:$0xff] %v1352_v53  ;;  %v4448_v58 = vmul.f32 %v3910_v57, %v3908_v52  ;;  %v1717_v52 = vld [vmem:[#allocation11 + $0x1ad8] sm:$0xff]  ;;  %v3369_v57 = vpack.c.bf16 %v1715_v50, %v1707_v49  ;;  %v3383_v44 = vpack.c.bf16 %v1762_v32, %v1754_v31  ;;  %v1770_v49 = vld [vmem:[#allocation11 + $0x1c80] sm:$0xff] }
 0x284   :  { %v1778_v50 = vld [vmem:[#allocation11 + $0x1cc0] sm:$0xff]  ;;  %v1835_v31 = vld [vmem:[#allocation11 + $0x1e88] sm:$0xff] }
 0x285   :  { %1357 = vst [vmem:[#allocation18 + $0x8] sm:$0xff] %v4448_v58  ;;  %1989 = vmatprep.mubr.f32.mxu0 %v4448_v58  ;;  %2131 = vmatprep.mubr.f32.mxu1 %v4448_v58  ;;  %v1843_v32 = vld [vmem:[#allocation11 + $0x1ec8] sm:$0xff] }
 0x286   :  { %1990 = vmatmul.mubr.f32.vlgmr.msra.gmra.mrb[4].mxu0 %v1352_v53  ;;  %2132 = vmatmul.mubr.f32.vlgmr.msra.gmra.mrb[4].mxu1 %v1352_v53  ;;  %v3367_v53 = vpack.c.bf16 %v1698_v39, %v1690_v37  ;;  %v1771_v37 = vld [vmem:[#allocation11 + $0x1c88] sm:$0xff] }
 0x287   :  { %3352 = vmatpush1.bf16.msra.mxu0 %v3351_v59  ;;  %3480 = vmatpush1.bf16.msra.mxu1 %v3479_v60  ;;  %v3497_v59 = vpack.c.bf16 %v1717_v52, %v1709_v51  ;;  %v1708_v60 = vld [vmem:[#allocation11 + $0x1a90] sm:$0xff]  ;;  %v1779_v39 = vld [vmem:[#allocation11 + $0x1cc8] sm:$0xff] }
 0x288   :  { %3354 = vmatprep.subr.bf16.mxu0 %v3353_v4  ;;  %3482 = vmatprep.subr.bf16.mxu1 %v3481_v1  ;;  %v1731_v4 = vld [vmem:[#allocation11 + $0x1b48] sm:$0xff]  ;;  %v1725_v1 = vld [vmem:[#allocation11 + $0x1b18] sm:$0xff]  ;;  %v3499_v6 = vpack.c.bf16 %v1716_v61, %v1708_v60  ;;  %v3385_v51 = vpack.c.bf16 %v1779_v39, %v1771_v37  ;;  %v3387_v60 = vpack.c.bf16 %v1778_v50, %v1770_v49  ;;  %v1834_v37 = vld [vmem:[#allocation11 + $0x1e80] sm:$0xff] }
 0x289   :  { %2060 = vmatprep.mubr.f32.mxu0 %v1368_v11  ;;  %2202 = vmatprep.mubr.f32.mxu1 %v1368_v11  ;;  %v3373_v10 = vpack.c.bf16 %v1731_v4, %v1723_v0  ;;  %v3501_v11 = vpack.c.bf16 %v1733_v2, %v1725_v1  ;;  %v1786_v0 = vld [vmem:[#allocation11 + $0x1d00] sm:$0xff]  ;;  %v3389_v1 = vpack.c.bf16 %v1795_v56, %v1787_v55  ;;  %v1851_v49 = vld [vmem:[#allocation11 + $0x1f08] sm:$0xff] }
 0x28a   :  { %v1794_v4 = vld [vmem:[#allocation11 + $0x1d40] sm:$0xff]  ;;  %v1859_v50 = vld [vmem:[#allocation11 + $0x1f48] sm:$0xff] }
 0x28b   :  { %3356 = vmatpush1.bf16.msra.mxu0 %v3355_v12  ;;  %3484 = vmatpush1.bf16.msra.mxu1 %v3483_v38  ;;  %v1724_v12 = vld [vmem:[#allocation11 + $0x1b10] sm:$0xff]  ;;  %v1842_v39 = vld [vmem:[#allocation11 + $0x1ec0] sm:$0xff] }
 0x28c   :  { %3358 = vmatprep.subr.bf16.mxu0 %v3357_v15  ;;  %3486 = vmatprep.subr.bf16.mxu1 %v3485_v16  ;;  %v1732_v38 = vld [vmem:[#allocation11 + $0x1b50] sm:$0xff]  ;;  %v1741_v15 = vld [vmem:[#allocation11 + $0x1b98] sm:$0xff]  ;;  %v1850_v55 = vld [vmem:[#allocation11 + $0x1f00] sm:$0xff] }
 0x28d   :  { %v1749_v16 = vld [vmem:[#allocation11 + $0x1bd8] sm:$0xff]  ;;  %v3503_v18 = vpack.c.bf16 %v1732_v38, %v1724_v12  ;;  %v3391_v12 = vpack.c.bf16 %v1794_v4, %v1786_v0  ;;  %v1858_v56 = vld [vmem:[#allocation11 + $0x1f40] sm:$0xff]  ;;  %v1867_v0 = vld [vmem:[#allocation11 + $0x1f88] sm:$0xff] }
 0x28e   :  { %v3505_v22 = vpack.c.bf16 %v1749_v16, %v1741_v15  ;;  %v3393_v15 = vpack.c.bf16 %v1811_v9, %v1803_v8  ;;  %v1875_v4 = vld [vmem:[#allocation11 + $0x1fc8] sm:$0xff]  ;;  %v1866_v8 = vld [vmem:[#allocation11 + $0x1f80] sm:$0xff] }
 0x28f   :  { %3360 = vmatpush1.bf16.msra.mxu0 %v3359_v23  ;;  %3488 = vmatpush1.bf16.msra.mxu1 %v3487_v24  ;;  %v1740_v23 = vld [vmem:[#allocation11 + $0x1b90] sm:$0xff]  ;;  %v1874_v9 = vld [vmem:[#allocation11 + $0x1fc0] sm:$0xff] }
 0x290   :  { %3362 = vmatprep.subr.bf16.mxu0 %v3361_v27  ;;  %3490 = vmatprep.subr.bf16.mxu1 %v3489_v28  ;;  %v1748_v24 = vld [vmem:[#allocation11 + $0x1bd0] sm:$0xff]  ;;  %v1757_v27 = vld [vmem:[#allocation11 + $0x1c18] sm:$0xff] }
 0x291   :  { %v1765_v28 = vld [vmem:[#allocation11 + $0x1c58] sm:$0xff]  ;;  %v3507_v30 = vpack.c.bf16 %v1748_v24, %v1740_v23  ;;  %v3395_v23 = vpack.c.bf16 %v1810_v14, %v1802_v13  ;;  %v1375_v13 = vld [vmem:[#allocation11 + $0x1028] sm:$0xff] }
 0x292   :  { %v3509_v34 = vpack.c.bf16 %v1765_v28, %v1757_v27  ;;  %v3397_v27 = vpack.c.bf16 %v1827_v20, %v1819_v19  ;;  %v1383_v14 = vld [vmem:[#allocation11 + $0x1068] sm:$0xff] }
 0x293   :  { %3364 = vmatpush1.bf16.msra.mxu0 %v3363_v35  ;;  %3492 = vmatpush1.bf16.msra.mxu1 %v3491_v36  ;;  %v1756_v35 = vld [vmem:[#allocation11 + $0x1c10] sm:$0xff]  ;;  %v3541_v19 = vpack.c.bf16 %v1383_v14, %v1375_v13  ;;  %v1438_v14 = vld [vmem:[#allocation11 + $0x1220] sm:$0xff] }
 0x294   :  { %3366 = vmatprep.subr.bf16.mxu0 %v3365_v40  ;;  %3494 = vmatprep.subr.bf16.mxu1 %v3493_v41  ;;  %v1764_v36 = vld [vmem:[#allocation11 + $0x1c50] sm:$0xff]  ;;  %v1773_v40 = vld [vmem:[#allocation11 + $0x1c98] sm:$0xff] }
 0x295   :  { %v1781_v41 = vld [vmem:[#allocation11 + $0x1cd8] sm:$0xff]  ;;  %v3511_v48 = vpack.c.bf16 %v1764_v36, %v1756_v35  ;;  %v3399_v35 = vpack.c.bf16 %v1826_v26, %v1818_v25  ;;  %v1391_v25 = vld [vmem:[#allocation11 + $0x10a8] sm:$0xff] }
 0x296   :  { %v3513_v52 = vpack.c.bf16 %v1781_v41, %v1773_v40  ;;  %v3401_v40 = vpack.c.bf16 %v1843_v32, %v1835_v31  ;;  %v1399_v26 = vld [vmem:[#allocation11 + $0x10e8] sm:$0xff]  ;;  %v1390_v32 = vld [vmem:[#allocation11 + $0x10a0] sm:$0xff] }
 0x297   :  { %3368 = vmatpush1.bf16.msra.mxu0 %v3367_v53  ;;  %3496 = vmatpush1.bf16.msra.mxu1 %v3495_v54  ;;  %v1772_v53 = vld [vmem:[#allocation11 + $0x1c90] sm:$0xff] }
 0x298   :  { %3370 = vmatprep.subr.bf16.mxu0 %v3369_v57  ;;  %3498 = vmatprep.subr.bf16.mxu1 %v3497_v59  ;;  %v1780_v54 = vld [vmem:[#allocation11 + $0x1cd0] sm:$0xff]  ;;  %v1789_v57 = vld [vmem:[#allocation11 + $0x1d18] sm:$0xff] }
 0x299   :  { %v1797_v59 = vld [vmem:[#allocation11 + $0x1d58] sm:$0xff]  ;;  %v3515_v61 = vpack.c.bf16 %v1780_v54, %v1772_v53  ;;  %v3403_v53 = vpack.c.bf16 %v1842_v39, %v1834_v37  ;;  %v1400_v37 = vld [vmem:[#allocation11 + $0x10f0] sm:$0xff]  ;;  %v1407_v39 = vld [vmem:[#allocation11 + $0x1128] sm:$0xff] }
 0x29a   :  { %v3517_v2 = vpack.c.bf16 %v1797_v59, %v1789_v57  ;;  %v3405_v57 = vpack.c.bf16 %v1859_v50, %v1851_v49 }
 0x29b   :  { %3372 = vmatpush1.bf16.msra.mxu0 %v3371_v5  ;;  %3500 = vmatpush1.bf16.msra.mxu1 %v3499_v6  ;;  %v1788_v5 = vld [vmem:[#allocation11 + $0x1d10] sm:$0xff] }
 0x29c   :  { %3374 = vmatprep.subr.bf16.mxu0 %v3373_v10  ;;  %3502 = vmatprep.subr.bf16.mxu1 %v3501_v11  ;;  %v1796_v6 = vld [vmem:[#allocation11 + $0x1d50] sm:$0xff]  ;;  %v1805_v10 = vld [vmem:[#allocation11 + $0x1d98] sm:$0xff] }
 0x29d   :  { %v1813_v11 = vld [vmem:[#allocation11 + $0x1dd8] sm:$0xff]  ;;  %v3519_v38 = vpack.c.bf16 %v1796_v6, %v1788_v5  ;;  %v3407_v5 = vpack.c.bf16 %v1858_v56, %v1850_v55  ;;  %v1416_v55 = vld [vmem:[#allocation11 + $0x1170] sm:$0xff]  ;;  %v1423_v56 = vld [vmem:[#allocation11 + $0x11a8] sm:$0xff] }
 0x29e   :  { %v3521_v16 = vpack.c.bf16 %v1813_v11, %v1805_v10  ;;  %v3409_v10 = vpack.c.bf16 %v1875_v4, %v1867_v0 }
 0x29f   :  { %3376 = vmatpush1.bf16.msra.mxu0 %v3375_v17  ;;  %3504 = vmatpush1.bf16.msra.mxu1 %v3503_v18  ;;  %v1804_v17 = vld [vmem:[#allocation11 + $0x1d90] sm:$0xff] }
 0x2a0   :  { %3378 = vmatprep.subr.bf16.mxu0 %v3377_v21  ;;  %3506 = vmatprep.subr.bf16.mxu1 %v3505_v22  ;;  %v1812_v18 = vld [vmem:[#allocation11 + $0x1dd0] sm:$0xff]  ;;  %v1821_v21 = vld [vmem:[#allocation11 + $0x1e18] sm:$0xff] }
 0x2a1   :  { %v1829_v22 = vld [vmem:[#allocation11 + $0x1e58] sm:$0xff]  ;;  %v3523_v24 = vpack.c.bf16 %v1812_v18, %v1804_v17  ;;  %v3411_v17 = vpack.c.bf16 %v1874_v9, %v1866_v8  ;;  %v1439_v8 = vld [vmem:[#allocation11 + $0x1228] sm:$0xff] }
 0x2a2   :  { %v3525_v28 = vpack.c.bf16 %v1829_v22, %v1821_v21  ;;  %v1374_v21 = vld [vmem:[#allocation11 + $0x1020] sm:$0xff]  ;;  %v1447_v9 = vld [vmem:[#allocation11 + $0x1268] sm:$0xff] }
 0x2a3   :  { %3380 = vmatpush1.bf16.msra.mxu0 %v3379_v29  ;;  %3508 = vmatpush1.bf16.msra.mxu1 %v3507_v30  ;;  %v1820_v29 = vld [vmem:[#allocation11 + $0x1e10] sm:$0xff]  ;;  %v1382_v22 = vld [vmem:[#allocation11 + $0x1060] sm:$0xff]  ;;  %v3557_v13 = vpack.c.bf16 %v1447_v9, %v1439_v8 }
 0x2a4   :  { %3382 = vmatprep.subr.bf16.mxu0 %v3381_v33  ;;  %3510 = vmatprep.subr.bf16.mxu1 %v3509_v34  ;;  %v1828_v30 = vld [vmem:[#allocation11 + $0x1e50] sm:$0xff]  ;;  %v1837_v33 = vld [vmem:[#allocation11 + $0x1e98] sm:$0xff]  ;;  %v1502_v9 = vld [vmem:[#allocation11 + $0x1420] sm:$0xff] }
 0x2a5   :  { %v1845_v34 = vld [vmem:[#allocation11 + $0x1ed8] sm:$0xff]  ;;  %v3527_v36 = vpack.c.bf16 %v1828_v30, %v1820_v29  ;;  %v4453_v29 = vld [vmem:[#allocation2 + $0x10] sm:$0xff]  ;;  %v3543_v30 = vpack.c.bf16 %v1382_v22, %v1374_v21 }
 0x2a6   :  { %v3529_v41 = vpack.c.bf16 %v1845_v34, %v1837_v33  ;;  %v1398_v33 = vld [vmem:[#allocation11 + $0x10e0] sm:$0xff]  ;;  %v1392_v34 = vld [vmem:[#allocation11 + $0x10b0] sm:$0xff]  ;;  %v1457_v21 = vld [vmem:[#allocation11 + $0x12b8] sm:$0xff] }
 0x2a7   :  { %3384 = vmatpush1.bf16.msra.mxu0 %v3383_v44  ;;  %3512 = vmatpush1.bf16.msra.mxu1 %v3511_v48  ;;  %v1836_v44 = vld [vmem:[#allocation11 + $0x1e90] sm:$0xff]  ;;  %v3675_v49 = vpack.c.bf16 %v1400_v37, %v1392_v34  ;;  %v1465_v22 = vld [vmem:[#allocation11 + $0x12f8] sm:$0xff] }
 0x2a8   :  { %3386 = vmatprep.subr.bf16.mxu0 %v3385_v51  ;;  %3514 = vmatprep.subr.bf16.mxu1 %v3513_v52  ;;  %v1844_v48 = vld [vmem:[#allocation11 + $0x1ed0] sm:$0xff]  ;;  %v1853_v51 = vld [vmem:[#allocation11 + $0x1f18] sm:$0xff] }
 0x2a9   :  { %v1861_v52 = vld [vmem:[#allocation11 + $0x1f58] sm:$0xff]  ;;  %v3531_v54 = vpack.c.bf16 %v1844_v48, %v1836_v44  ;;  %v3547_v48 = vpack.c.bf16 %v1398_v33, %v1390_v32  ;;  %v1471_v32 = vld [vmem:[#allocation11 + $0x1328] sm:$0xff] }
 0x2aa   :  { %v3533_v59 = vpack.c.bf16 %v1861_v52, %v1853_v51  ;;  %v1417_v44 = vld [vmem:[#allocation11 + $0x1178] sm:$0xff]  ;;  %v1406_v51 = vld [vmem:[#allocation11 + $0x1120] sm:$0xff]  ;;  %v1479_v33 = vld [vmem:[#allocation11 + $0x1368] sm:$0xff] }
 0x2ab   :  { %3388 = vmatpush1.bf16.msra.mxu0 %v3387_v60  ;;  %3516 = vmatpush1.bf16.msra.mxu1 %v3515_v61  ;;  %v1852_v60 = vld [vmem:[#allocation11 + $0x1f10] sm:$0xff]  ;;  %v1414_v52 = vld [vmem:[#allocation11 + $0x1160] sm:$0xff]  ;;  %v1473_v34 = vld [vmem:[#allocation11 + $0x1338] sm:$0xff] }
 0x2ac   :  { %3390 = vmatprep.subr.bf16.mxu0 %v3389_v1  ;;  %3518 = vmatprep.subr.bf16.mxu1 %v3517_v2  ;;  %v1860_v61 = vld [vmem:[#allocation11 + $0x1f50] sm:$0xff]  ;;  %v1869_v1 = vld [vmem:[#allocation11 + $0x1f98] sm:$0xff] }
 0x2ad   :  { %v1877_v2 = vld [vmem:[#allocation11 + $0x1fd8] sm:$0xff]  ;;  %v3535_v6 = vpack.c.bf16 %v1860_v61, %v1852_v60  ;;  %v3551_v61 = vpack.c.bf16 %v1414_v52, %v1406_v51  ;;  %v1495_v51 = vld [vmem:[#allocation11 + $0x13e8] sm:$0xff] }
 0x2ae   :  { %v3537_v11 = vpack.c.bf16 %v1877_v2, %v1869_v1  ;;  %v1433_v60 = vld [vmem:[#allocation11 + $0x11f8] sm:$0xff]  ;;  %v1430_v1 = vld [vmem:[#allocation11 + $0x11e0] sm:$0xff]  ;;  %v1424_v2 = vld [vmem:[#allocation11 + $0x11b0] sm:$0xff] }
 0x2af   :  { %3392 = vmatpush1.bf16.msra.mxu0 %v3391_v12  ;;  %3520 = vmatpush1.bf16.msra.mxu1 %v3519_v38  ;;  %v1868_v12 = vld [vmem:[#allocation11 + $0x1f90] sm:$0xff]  ;;  %v1489_v52 = vld [vmem:[#allocation11 + $0x13b8] sm:$0xff] }
 0x2b0   :  { %3394 = vmatprep.subr.bf16.mxu0 %v3393_v15  ;;  %3522 = vmatprep.subr.bf16.mxu1 %v3521_v16  ;;  %v1876_v38 = vld [vmem:[#allocation11 + $0x1fd0] sm:$0xff]  ;;  %v1377_v15 = vld [vmem:[#allocation11 + $0x1038] sm:$0xff] }
 0x2b1   :  { %v1385_v16 = vld [vmem:[#allocation11 + $0x1078] sm:$0xff]  ;;  %v3539_v18 = vpack.c.bf16 %v1876_v38, %v1868_v12 }
 0x2b2   :  { %v3669_v20 = vpack.c.bf16 %v1385_v16, %v1377_v15  ;;  %v1446_v15 = vld [vmem:[#allocation11 + $0x1260] sm:$0xff]  ;;  %v1440_v16 = vld [vmem:[#allocation11 + $0x1230] sm:$0xff] }
 0x2b3   :  { %3396 = vmatpush1.bf16.msra.mxu0 %v3395_v23  ;;  %3524 = vmatpush1.bf16.msra.mxu1 %v3523_v24  ;;  %v1376_v23 = vld [vmem:[#allocation11 + $0x1030] sm:$0xff] }
 0x2b4   :  { %3398 = vmatprep.subr.bf16.mxu0 %v3397_v27  ;;  %3526 = vmatprep.subr.bf16.mxu1 %v3525_v28  ;;  %v1384_v24 = vld [vmem:[#allocation11 + $0x1070] sm:$0xff]  ;;  %v1393_v27 = vld [vmem:[#allocation11 + $0x10b8] sm:$0xff] }
 0x2b5   :  { %v1401_v28 = vld [vmem:[#allocation11 + $0x10f8] sm:$0xff]  ;;  %v3671_v31 = vpack.c.bf16 %v1384_v24, %v1376_v23  ;;  %v3559_v23 = vpack.c.bf16 %v1446_v15, %v1438_v14  ;;  %v1527_v14 = vld [vmem:[#allocation11 + $0x14e8] sm:$0xff] }
 0x2b6   :  { %v1521_v15 = vld [vmem:[#allocation11 + $0x14b8] sm:$0xff] }
 0x2b7   :  { %3400 = vmatpush1.bf16.msra.mxu0 %v3399_v35  ;;  %3528 = vmatpush1.bf16.msra.mxu1 %v3527_v36  ;;  %v3545_v35 = vpack.c.bf16 %v1399_v26, %v1391_v25  ;;  %v3673_v36 = vpack.c.bf16 %v1401_v28, %v1393_v27  ;;  %v1454_v26 = vld [vmem:[#allocation11 + $0x12a0] sm:$0xff]  ;;  %v1456_v28 = vld [vmem:[#allocation11 + $0x12b0] sm:$0xff] }
 0x2b8   :  { %3402 = vmatprep.subr.bf16.mxu0 %v3401_v40  ;;  %3530 = vmatprep.subr.bf16.mxu1 %v3529_v41  ;;  %v1415_v40 = vld [vmem:[#allocation11 + $0x1168] sm:$0xff]  ;;  %v1409_v41 = vld [vmem:[#allocation11 + $0x1138] sm:$0xff]  ;;  %v1462_v27 = vld [vmem:[#allocation11 + $0x12e0] sm:$0xff] }
 0x2b9   :  { %v3549_v50 = vpack.c.bf16 %v1415_v40, %v1407_v39  ;;  %v3565_v39 = vpack.c.bf16 %v1479_v33, %v1471_v32  ;;  %v1470_v40 = vld [vmem:[#allocation11 + $0x1320] sm:$0xff] }
 0x2ba   :  { %v1534_v33 = vld [vmem:[#allocation11 + $0x1520] sm:$0xff] }
 0x2bb   :  { %3404 = vmatpush1.bf16.msra.mxu0 %v3403_v53  ;;  %3532 = vmatpush1.bf16.msra.mxu1 %v3531_v54  ;;  %v1408_v53 = vld [vmem:[#allocation11 + $0x1130] sm:$0xff]  ;;  %v3677_v54 = vpack.c.bf16 %v1417_v44, %v1409_v41  ;;  %v1478_v41 = vld [vmem:[#allocation11 + $0x1360] sm:$0xff] }
 0x2bc   :  { %3406 = vmatprep.subr.bf16.mxu0 %v3405_v57  ;;  %3534 = vmatprep.subr.bf16.mxu1 %v3533_v59  ;;  %v1431_v57 = vld [vmem:[#allocation11 + $0x11e8] sm:$0xff]  ;;  %v1425_v59 = vld [vmem:[#allocation11 + $0x11b8] sm:$0xff]  ;;  %v3679_v0 = vpack.c.bf16 %v1416_v55, %v1408_v53  ;;  %v1472_v44 = vld [vmem:[#allocation11 + $0x1330] sm:$0xff] }
 0x2bd   :  { %v3553_v4 = vpack.c.bf16 %v1431_v57, %v1423_v56  ;;  %v1497_v53 = vld [vmem:[#allocation11 + $0x13f8] sm:$0xff]  ;;  %v1486_v57 = vld [vmem:[#allocation11 + $0x13a0] sm:$0xff] }
 0x2bf   :  { %3408 = vmatpush1.bf16.msra.mxu0 %v3407_v5  ;;  %3536 = vmatpush1.bf16.msra.mxu1 %v3535_v6  ;;  %v3681_v5 = vpack.c.bf16 %v1433_v60, %v1425_v59  ;;  %v1432_v6 = vld [vmem:[#allocation11 + $0x11f0] sm:$0xff]  ;;  %v1494_v59 = vld [vmem:[#allocation11 + $0x13e0] sm:$0xff] }
 0x2c0   :  { %3410 = vmatprep.subr.bf16.mxu0 %v3409_v10  ;;  %3538 = vmatprep.subr.bf16.mxu1 %v3537_v11  ;;  %v1441_v10 = vld [vmem:[#allocation11 + $0x1238] sm:$0xff]  ;;  %v3683_v38 = vpack.c.bf16 %v1432_v6, %v1424_v2  ;;  %v1488_v60 = vld [vmem:[#allocation11 + $0x13b0] sm:$0xff] }
 0x2c1   :  { %v1449_v11 = vld [vmem:[#allocation11 + $0x1278] sm:$0xff] }
 0x2c2   :  { %v1513_v2 = vld [vmem:[#allocation11 + $0x1478] sm:$0xff] }
 0x2c3   :  { %3412 = vmatpush1.bf16.msra.mxu0 %v3411_v17  ;;  %3540 = vmatpush1.bf16.msra.mxu1 %v3539_v18  ;;  %v3685_v17 = vpack.c.bf16 %v1449_v11, %v1441_v10  ;;  %v1448_v18 = vld [vmem:[#allocation11 + $0x1270] sm:$0xff]  ;;  %v1510_v10 = vld [vmem:[#allocation11 + $0x1460] sm:$0xff] }
 0x2c4   :  { %3542 = vmatprep.subr.bf16.mxu0 %v3541_v19  ;;  %3670 = vmatprep.subr.bf16.mxu1 %v3669_v20  ;;  %v1455_v19 = vld [vmem:[#allocation11 + $0x12a8] sm:$0xff]  ;;  %v3687_v24 = vpack.c.bf16 %v1448_v18, %v1440_v16  ;;  %v1504_v11 = vld [vmem:[#allocation11 + $0x1430] sm:$0xff]  ;;  %v1529_v16 = vld [vmem:[#allocation11 + $0x14f8] sm:$0xff] }
 0x2c5   :  { %v1463_v20 = vld [vmem:[#allocation11 + $0x12e8] sm:$0xff] }
 0x2c6   :  { %2061 = vmatmul.mubr.f32.vlgmr.msra.gmra.mrb[4].mxu0 %v4453_v29  ;;  %2203 = vmatmul.mubr.f32.vlgmr.msra.gmra.mrb[4].mxu1 %v4453_v29  ;;  %v3561_v25 = vpack.c.bf16 %v1463_v20, %v1455_v19  ;;  %v1518_v20 = vld [vmem:[#allocation11 + $0x14a0] sm:$0xff] }
 0x2c7   :  { %3544 = vmatpush1.bf16.msra.mxu0 %v3543_v30  ;;  %2273 = vmatprep.mubr.f32.mxu0 %v4448_v58  ;;  %v3689_v30 = vpack.c.bf16 %v1465_v22, %v1457_v21  ;;  %v1526_v21 = vld [vmem:[#allocation11 + $0x14e0] sm:$0xff]  ;;  %v1520_v22 = vld [vmem:[#allocation11 + $0x14b0] sm:$0xff] }
 0x2c8   :  { %3672 = vmatpush1.bf16.msra.mxu1 %v3671_v31  ;;  %2415 = vmatprep.mubr.f32.mxu1 %v4448_v58  ;;  %v1422_v58 = vld [vmem:[#allocation11 + $0x11a0] sm:$0xff]  ;;  %v1464_v31 = vld [vmem:[#allocation11 + $0x12f0] sm:$0xff] }
 0x2c9   :  { %3546 = vmatprep.subr.bf16.mxu0 %v3545_v35  ;;  %3674 = vmatprep.subr.bf16.mxu1 %v3673_v36  ;;  %v3555_v12 = vpack.c.bf16 %v1430_v1, %v1422_v58  ;;  %v1481_v35 = vld [vmem:[#allocation11 + $0x1378] sm:$0xff]  ;;  %v3563_v36 = vpack.c.bf16 %v1462_v27, %v1454_v26  ;;  %v3691_v37 = vpack.c.bf16 %v1464_v31, %v1456_v28  ;;  %v1511_v58 = vld [vmem:[#allocation11 + $0x1468] sm:$0xff] }
 0x2ca   :  { %v1505_v1 = vld [vmem:[#allocation11 + $0x1438] sm:$0xff]  ;;  %v1543_v26 = vld [vmem:[#allocation11 + $0x1568] sm:$0xff] }
 0x2cb   :  { %3548 = vmatpush1.bf16.msra.mxu0 %v3547_v48  ;;  %v3693_v48 = vpack.c.bf16 %v1481_v35, %v1473_v34  ;;  %v1537_v27 = vld [vmem:[#allocation11 + $0x1538] sm:$0xff]  ;;  %v1542_v34 = vld [vmem:[#allocation11 + $0x1560] sm:$0xff]  ;;  %v1536_v35 = vld [vmem:[#allocation11 + $0x1530] sm:$0xff] }
 0x2cc   :  { %3676 = vmatpush1.bf16.msra.mxu1 %v3675_v49  ;;  %3550 = vmatprep.subr.bf16.mxu0 %v3549_v50  ;;  %v1480_v49 = vld [vmem:[#allocation11 + $0x1370] sm:$0xff]  ;;  %v1487_v50 = vld [vmem:[#allocation11 + $0x13a8] sm:$0xff]  ;;  %v1545_v28 = vld [vmem:[#allocation11 + $0x1578] sm:$0xff] }
 0x2cd   :  { %3678 = vmatprep.subr.bf16.mxu1 %v3677_v54  ;;  %v3567_v54 = vpack.c.bf16 %v1478_v41, %v1470_v40  ;;  %v3695_v55 = vpack.c.bf16 %v1480_v49, %v1472_v44  ;;  %v3569_v56 = vpack.c.bf16 %v1495_v51, %v1487_v50  ;;  %v1559_v40 = vld [vmem:[#allocation11 + $0x15e8] sm:$0xff]  ;;  %v1553_v41 = vld [vmem:[#allocation11 + $0x15b8] sm:$0xff]  ;;  %v1550_v51 = vld [vmem:[#allocation11 + $0x15a0] sm:$0xff] }
 0x2ce   :  { %v1561_v44 = vld [vmem:[#allocation11 + $0x15f8] sm:$0xff] }
 0x2cf   :  { %3552 = vmatpush1.bf16.msra.mxu0 %v3551_v61  ;;  %v3697_v61 = vpack.c.bf16 %v1497_v53, %v1489_v52  ;;  %v1558_v52 = vld [vmem:[#allocation11 + $0x15e0] sm:$0xff]  ;;  %v1552_v53 = vld [vmem:[#allocation11 + $0x15b0] sm:$0xff] }
 0x2d0   :  { %3680 = vmatpush1.bf16.msra.mxu1 %v3679_v0  ;;  %3554 = vmatprep.subr.bf16.mxu0 %v3553_v4  ;;  %v1496_v0 = vld [vmem:[#allocation11 + $0x13f0] sm:$0xff]  ;;  %v1503_v4 = vld [vmem:[#allocation11 + $0x1428] sm:$0xff] }
 0x2d1   :  { %3682 = vmatprep.subr.bf16.mxu1 %v3681_v5  ;;  %v3571_v5 = vpack.c.bf16 %v1494_v59, %v1486_v57  ;;  %v3699_v6 = vpack.c.bf16 %v1496_v0, %v1488_v60  ;;  %v3573_v8 = vpack.c.bf16 %v1511_v58, %v1503_v4  ;;  %v1575_v57 = vld [vmem:[#allocation11 + $0x1668] sm:$0xff]  ;;  %v1569_v59 = vld [vmem:[#allocation11 + $0x1638] sm:$0xff]  ;;  %v1566_v58 = vld [vmem:[#allocation11 + $0x1620] sm:$0xff] }
 0x2d2   :  { %v1577_v60 = vld [vmem:[#allocation11 + $0x1678] sm:$0xff] }
 0x2d3   :  { %3556 = vmatpush1.bf16.msra.mxu0 %v3555_v12  ;;  %v3701_v12 = vpack.c.bf16 %v1513_v2, %v1505_v1  ;;  %v1574_v1 = vld [vmem:[#allocation11 + $0x1660] sm:$0xff]  ;;  %v1568_v2 = vld [vmem:[#allocation11 + $0x1630] sm:$0xff] }
 0x2d4   :  { %3684 = vmatpush1.bf16.msra.mxu1 %v3683_v38  ;;  %3558 = vmatprep.subr.bf16.mxu0 %v3557_v13  ;;  %v1512_v38 = vld [vmem:[#allocation11 + $0x1470] sm:$0xff]  ;;  %v1519_v13 = vld [vmem:[#allocation11 + $0x14a8] sm:$0xff] }
 0x2d5   :  { %3686 = vmatprep.subr.bf16.mxu1 %v3685_v17  ;;  %v3575_v17 = vpack.c.bf16 %v1510_v10, %v1502_v9  ;;  %v3703_v18 = vpack.c.bf16 %v1512_v38, %v1504_v11  ;;  %v3577_v19 = vpack.c.bf16 %v1527_v14, %v1519_v13  ;;  %v1591_v9 = vld [vmem:[#allocation11 + $0x16e8] sm:$0xff]  ;;  %v1585_v10 = vld [vmem:[#allocation11 + $0x16b8] sm:$0xff]  ;;  %v1582_v14 = vld [vmem:[#allocation11 + $0x16a0] sm:$0xff] }
 0x2d6   :  { %v1593_v11 = vld [vmem:[#allocation11 + $0x16f8] sm:$0xff] }
 0x2d7   :  { %3560 = vmatpush1.bf16.msra.mxu0 %v3559_v23  ;;  %v3705_v23 = vpack.c.bf16 %v1529_v16, %v1521_v15  ;;  %v1590_v15 = vld [vmem:[#allocation11 + $0x16e0] sm:$0xff]  ;;  %v1584_v16 = vld [vmem:[#allocation11 + $0x16b0] sm:$0xff] }
 0x2d8   :  { %3688 = vmatpush1.bf16.msra.mxu1 %v3687_v24  ;;  %3562 = vmatprep.subr.bf16.mxu0 %v3561_v25  ;;  %v1528_v24 = vld [vmem:[#allocation11 + $0x14f0] sm:$0xff]  ;;  %v1535_v25 = vld [vmem:[#allocation11 + $0x1528] sm:$0xff] }
 0x2d9   :  { %3690 = vmatprep.subr.bf16.mxu1 %v3689_v30  ;;  %v3579_v30 = vpack.c.bf16 %v1526_v21, %v1518_v20  ;;  %v3707_v31 = vpack.c.bf16 %v1528_v24, %v1520_v22  ;;  %v3581_v32 = vpack.c.bf16 %v1543_v26, %v1535_v25  ;;  %v1607_v20 = vld [vmem:[#allocation11 + $0x1768] sm:$0xff]  ;;  %v1601_v21 = vld [vmem:[#allocation11 + $0x1738] sm:$0xff]  ;;  %v1598_v26 = vld [vmem:[#allocation11 + $0x1720] sm:$0xff] }
 0x2da   :  { %v1609_v22 = vld [vmem:[#allocation11 + $0x1778] sm:$0xff] }
 0x2db   :  { %3564 = vmatpush1.bf16.msra.mxu0 %v3563_v36  ;;  %v3709_v36 = vpack.c.bf16 %v1545_v28, %v1537_v27  ;;  %v1606_v27 = vld [vmem:[#allocation11 + $0x1760] sm:$0xff]  ;;  %v1600_v28 = vld [vmem:[#allocation11 + $0x1730] sm:$0xff] }
 0x2dc   :  { %3692 = vmatpush1.bf16.msra.mxu1 %v3691_v37  ;;  %3566 = vmatprep.subr.bf16.mxu0 %v3565_v39  ;;  %v1544_v37 = vld [vmem:[#allocation11 + $0x1570] sm:$0xff]  ;;  %v1551_v39 = vld [vmem:[#allocation11 + $0x15a8] sm:$0xff] }
 0x2dd   :  { %3694 = vmatprep.subr.bf16.mxu1 %v3693_v48  ;;  %v3583_v48 = vpack.c.bf16 %v1542_v34, %v1534_v33  ;;  %v3711_v49 = vpack.c.bf16 %v1544_v37, %v1536_v35  ;;  %v3585_v50 = vpack.c.bf16 %v1559_v40, %v1551_v39  ;;  %v1623_v33 = vld [vmem:[#allocation11 + $0x17e8] sm:$0xff]  ;;  %v1617_v34 = vld [vmem:[#allocation11 + $0x17b8] sm:$0xff]  ;;  %v1614_v40 = vld [vmem:[#allocation11 + $0x17a0] sm:$0xff] }
 0x2de   :  { %v1625_v35 = vld [vmem:[#allocation11 + $0x17f8] sm:$0xff] }
 0x2df   :  { %3568 = vmatpush1.bf16.msra.mxu0 %v3567_v54  ;;  %v3713_v54 = vpack.c.bf16 %v1561_v44, %v1553_v41  ;;  %v1622_v41 = vld [vmem:[#allocation11 + $0x17e0] sm:$0xff]  ;;  %v1616_v44 = vld [vmem:[#allocation11 + $0x17b0] sm:$0xff] }
 0x2e0   :  { %3696 = vmatpush1.bf16.msra.mxu1 %v3695_v55  ;;  %3570 = vmatprep.subr.bf16.mxu0 %v3569_v56  ;;  %v1560_v55 = vld [vmem:[#allocation11 + $0x15f0] sm:$0xff]  ;;  %v1567_v56 = vld [vmem:[#allocation11 + $0x1628] sm:$0xff] }
 0x2e1   :  { %3698 = vmatprep.subr.bf16.mxu1 %v3697_v61  ;;  %v3587_v61 = vpack.c.bf16 %v1558_v52, %v1550_v51  ;;  %v3715_v0 = vpack.c.bf16 %v1560_v55, %v1552_v53  ;;  %v3589_v4 = vpack.c.bf16 %v1575_v57, %v1567_v56  ;;  %v1639_v51 = vld [vmem:[#allocation11 + $0x1868] sm:$0xff]  ;;  %v1633_v52 = vld [vmem:[#allocation11 + $0x1838] sm:$0xff]  ;;  %v1630_v57 = vld [vmem:[#allocation11 + $0x1820] sm:$0xff] }
 0x2e2   :  { %v1641_v53 = vld [vmem:[#allocation11 + $0x1878] sm:$0xff] }
 0x2e3   :  { %3572 = vmatpush1.bf16.msra.mxu0 %v3571_v5  ;;  %v3717_v5 = vpack.c.bf16 %v1577_v60, %v1569_v59  ;;  %v1638_v59 = vld [vmem:[#allocation11 + $0x1860] sm:$0xff]  ;;  %v1632_v60 = vld [vmem:[#allocation11 + $0x1830] sm:$0xff] }
 0x2e4   :  { %3700 = vmatpush1.bf16.msra.mxu1 %v3699_v6  ;;  %3574 = vmatprep.subr.bf16.mxu0 %v3573_v8  ;;  %v1576_v6 = vld [vmem:[#allocation11 + $0x1670] sm:$0xff]  ;;  %v1583_v8 = vld [vmem:[#allocation11 + $0x16a8] sm:$0xff] }
 0x2e5   :  { %3702 = vmatprep.subr.bf16.mxu1 %v3701_v12  ;;  %v3591_v12 = vpack.c.bf16 %v1574_v1, %v1566_v58  ;;  %v3719_v38 = vpack.c.bf16 %v1576_v6, %v1568_v2  ;;  %v3593_v13 = vpack.c.bf16 %v1591_v9, %v1583_v8  ;;  %v1655_v58 = vld [vmem:[#allocation11 + $0x18e8] sm:$0xff]  ;;  %v1649_v1 = vld [vmem:[#allocation11 + $0x18b8] sm:$0xff]  ;;  %v1646_v9 = vld [vmem:[#allocation11 + $0x18a0] sm:$0xff] }
 0x2e6   :  { %v1657_v2 = vld [vmem:[#allocation11 + $0x18f8] sm:$0xff] }
 0x2e7   :  { %3576 = vmatpush1.bf16.msra.mxu0 %v3575_v17  ;;  %v3721_v17 = vpack.c.bf16 %v1593_v11, %v1585_v10  ;;  %v1654_v10 = vld [vmem:[#allocation11 + $0x18e0] sm:$0xff]  ;;  %v1648_v11 = vld [vmem:[#allocation11 + $0x18b0] sm:$0xff] }
 0x2e8   :  { %3704 = vmatpush1.bf16.msra.mxu1 %v3703_v18  ;;  %3578 = vmatprep.subr.bf16.mxu0 %v3577_v19  ;;  %v1592_v18 = vld [vmem:[#allocation11 + $0x16f0] sm:$0xff]  ;;  %v1599_v19 = vld [vmem:[#allocation11 + $0x1728] sm:$0xff] }
 0x2e9   :  { %3706 = vmatprep.subr.bf16.mxu1 %v3705_v23  ;;  %v3595_v23 = vpack.c.bf16 %v1590_v15, %v1582_v14  ;;  %v3723_v24 = vpack.c.bf16 %v1592_v18, %v1584_v16  ;;  %v3597_v25 = vpack.c.bf16 %v1607_v20, %v1599_v19  ;;  %v1671_v14 = vld [vmem:[#allocation11 + $0x1968] sm:$0xff]  ;;  %v3945_v15 = vld [vmem:[#allocation18] sm:$0xff]  ;;  %v3611_v18 = vpack.c.bf16 %v1654_v10, %v1646_v9  ;;  %v1720_v9 = vld [vmem:[#allocation11 + $0x1af0] sm:$0xff] }
 0x2ea   :  { %v1665_v16 = vld [vmem:[#allocation11 + $0x1938] sm:$0xff]  ;;  %v1727_v10 = vld [vmem:[#allocation11 + $0x1b28] sm:$0xff] }
 0x2eb   :  { %3580 = vmatpush1.bf16.msra.mxu0 %v3579_v30  ;;  %v3725_v30 = vpack.c.bf16 %v1609_v22, %v1601_v21  ;;  %v1662_v21 = vld [vmem:[#allocation11 + $0x1920] sm:$0xff] }
 0x2ec   :  { %3708 = vmatpush1.bf16.msra.mxu1 %v3707_v31  ;;  %3582 = vmatprep.subr.bf16.mxu0 %v3581_v32  ;;  %v1608_v31 = vld [vmem:[#allocation11 + $0x1770] sm:$0xff]  ;;  %v1615_v32 = vld [vmem:[#allocation11 + $0x17a8] sm:$0xff]  ;;  %v1670_v22 = vld [vmem:[#allocation11 + $0x1960] sm:$0xff] }
 0x2ed   :  { %3710 = vmatprep.subr.bf16.mxu1 %v3709_v36  ;;  %v3599_v36 = vpack.c.bf16 %v1606_v27, %v1598_v26  ;;  %v3727_v37 = vpack.c.bf16 %v1608_v31, %v1600_v28  ;;  %v3601_v39 = vpack.c.bf16 %v1623_v33, %v1615_v32  ;;  %v1679_v26 = vld [vmem:[#allocation11 + $0x19a8] sm:$0xff]  ;;  %v3946_v28 = vld [vmem:[#allocation2 + $0x18] sm:$0xff]  ;;  %v3615_v32 = vpack.c.bf16 %v1670_v22, %v1662_v21 }
 0x2ee   :  { %v1687_v27 = vld [vmem:[#allocation11 + $0x19e8] sm:$0xff]  ;;  %v1689_v31 = vld [vmem:[#allocation11 + $0x19f8] sm:$0xff] }
 0x2ef   :  { %3584 = vmatpush1.bf16.msra.mxu0 %v3583_v48  ;;  %v3729_v48 = vpack.c.bf16 %v1625_v35, %v1617_v34  ;;  %v3617_v34 = vpack.c.bf16 %v1687_v27, %v1679_v26  ;;  %v1678_v35 = vld [vmem:[#allocation11 + $0x19a0] sm:$0xff]  ;;  %v1743_v21 = vld [vmem:[#allocation11 + $0x1ba8] sm:$0xff] }
 0x2f0   :  { %3712 = vmatpush1.bf16.msra.mxu1 %v3711_v49  ;;  %3586 = vmatprep.subr.bf16.mxu0 %v3585_v50  ;;  %v1624_v49 = vld [vmem:[#allocation11 + $0x17f0] sm:$0xff]  ;;  %v1631_v50 = vld [vmem:[#allocation11 + $0x1828] sm:$0xff] }
 0x2f1   :  { %3714 = vmatprep.subr.bf16.mxu1 %v3713_v54  ;;  %v3603_v54 = vpack.c.bf16 %v1622_v41, %v1614_v40  ;;  %v3731_v55 = vpack.c.bf16 %v1624_v49, %v1616_v44  ;;  %v3605_v56 = vpack.c.bf16 %v1639_v51, %v1631_v50  ;;  %v1688_v40 = vld [vmem:[#allocation11 + $0x19f0] sm:$0xff]  ;;  %v1695_v41 = vld [vmem:[#allocation11 + $0x1a28] sm:$0xff]  ;;  %v1705_v49 = vld [vmem:[#allocation11 + $0x1a78] sm:$0xff] }
 0x2f2   :  { %v1703_v44 = vld [vmem:[#allocation11 + $0x1a68] sm:$0xff] }
 0x2f3   :  { %3588 = vmatpush1.bf16.msra.mxu0 %v3587_v61  ;;  %v3733_v61 = vpack.c.bf16 %v1641_v53, %v1633_v52  ;;  %v3621_v52 = vpack.c.bf16 %v1703_v44, %v1695_v41  ;;  %v1694_v53 = vld [vmem:[#allocation11 + $0x1a20] sm:$0xff]  ;;  %v1751_v22 = vld [vmem:[#allocation11 + $0x1be8] sm:$0xff] }
 0x2f4   :  { %3716 = vmatpush1.bf16.msra.mxu1 %v3715_v0  ;;  %3590 = vmatprep.subr.bf16.mxu0 %v3589_v4  ;;  %v1640_v0 = vld [vmem:[#allocation11 + $0x1870] sm:$0xff]  ;;  %v1647_v4 = vld [vmem:[#allocation11 + $0x18a8] sm:$0xff]  ;;  %v3633_v27 = vpack.c.bf16 %v1751_v22, %v1743_v21  ;;  %v1758_v44 = vld [vmem:[#allocation11 + $0x1c20] sm:$0xff] }
 0x2f5   :  { %3718 = vmatprep.subr.bf16.mxu1 %v3717_v5  ;;  %v3607_v5 = vpack.c.bf16 %v1638_v59, %v1630_v57  ;;  %v3735_v6 = vpack.c.bf16 %v1640_v0, %v1632_v60  ;;  %v3609_v8 = vpack.c.bf16 %v1655_v58, %v1647_v4  ;;  %v1704_v57 = vld [vmem:[#allocation11 + $0x1a70] sm:$0xff]  ;;  %v1711_v59 = vld [vmem:[#allocation11 + $0x1aa8] sm:$0xff]  ;;  %v1721_v0 = vld [vmem:[#allocation11 + $0x1af8] sm:$0xff] }
 0x2f6   :  { %v1719_v60 = vld [vmem:[#allocation11 + $0x1ae8] sm:$0xff]  ;;  %v1806_v22 = vld [vmem:[#allocation11 + $0x1da0] sm:$0xff] }
 0x2f7   :  { %3592 = vmatpush1.bf16.msra.mxu0 %v3591_v12  ;;  %v3737_v12 = vpack.c.bf16 %v1657_v2, %v1649_v1  ;;  %v3625_v1 = vpack.c.bf16 %v1719_v60, %v1711_v59  ;;  %v1710_v2 = vld [vmem:[#allocation11 + $0x1aa0] sm:$0xff] }
 0x2f8   :  { %3720 = vmatpush1.bf16.msra.mxu1 %v3719_v38  ;;  %3594 = vmatprep.subr.bf16.mxu0 %v3593_v13  ;;  %v1656_v38 = vld [vmem:[#allocation11 + $0x18f0] sm:$0xff]  ;;  %v1663_v13 = vld [vmem:[#allocation11 + $0x1928] sm:$0xff]  ;;  %v1774_v60 = vld [vmem:[#allocation11 + $0x1ca0] sm:$0xff] }
 0x2f9   :  { %3722 = vmatprep.subr.bf16.mxu1 %v3721_v17  ;;  %v1673_v17 = vld [vmem:[#allocation11 + $0x1978] sm:$0xff]  ;;  %v3739_v19 = vpack.c.bf16 %v1656_v38, %v1648_v11  ;;  %v3613_v20 = vpack.c.bf16 %v1671_v14, %v1663_v13  ;;  %v1735_v11 = vld [vmem:[#allocation11 + $0x1b68] sm:$0xff] }
 0x2fa   :  { %v1737_v38 = vld [vmem:[#allocation11 + $0x1b78] sm:$0xff] }
 0x2fb   :  { %3596 = vmatpush1.bf16.msra.mxu0 %v3595_v23  ;;  %v1664_v23 = vld [vmem:[#allocation11 + $0x1930] sm:$0xff] }
 0x2fc   :  { %3724 = vmatpush1.bf16.msra.mxu1 %v3723_v24  ;;  %3598 = vmatprep.subr.bf16.mxu0 %v3597_v25  ;;  %v3741_v24 = vpack.c.bf16 %v1673_v17, %v1665_v16  ;;  %v1672_v25 = vld [vmem:[#allocation11 + $0x1970] sm:$0xff]  ;;  %v1726_v16 = vld [vmem:[#allocation11 + $0x1b20] sm:$0xff] }
 0x2fd   :  { %3726 = vmatprep.subr.bf16.mxu1 %v3725_v30  ;;  %v1681_v30 = vld [vmem:[#allocation11 + $0x19b8] sm:$0xff]  ;;  %v3743_v33 = vpack.c.bf16 %v1672_v25, %v1664_v23  ;;  %v1734_v17 = vld [vmem:[#allocation11 + $0x1b60] sm:$0xff] }
 0x2fe   :  { %v1745_v23 = vld [vmem:[#allocation11 + $0x1bb8] sm:$0xff]  ;;  %v3631_v25 = vpack.c.bf16 %v1734_v17, %v1726_v16  ;;  %v1815_v16 = vld [vmem:[#allocation11 + $0x1de8] sm:$0xff] }
 0x2ff   :  { %3600 = vmatpush1.bf16.msra.mxu0 %v3599_v36  ;;  %v1686_v36 = vld [vmem:[#allocation11 + $0x19e0] sm:$0xff]  ;;  %v1809_v17 = vld [vmem:[#allocation11 + $0x1db8] sm:$0xff] }
 0x300   :  { %3728 = vmatpush1.bf16.msra.mxu1 %v3727_v37  ;;  %3602 = vmatprep.subr.bf16.mxu0 %v3601_v39  ;;  %v1680_v37 = vld [vmem:[#allocation11 + $0x19b0] sm:$0xff]  ;;  %v3745_v39 = vpack.c.bf16 %v1689_v31, %v1681_v30  ;;  %v3619_v50 = vpack.c.bf16 %v1686_v36, %v1678_v35  ;;  %v1750_v30 = vld [vmem:[#allocation11 + $0x1be0] sm:$0xff]  ;;  %v1767_v35 = vld [vmem:[#allocation11 + $0x1c68] sm:$0xff] }
 0x301   :  { %3730 = vmatprep.subr.bf16.mxu1 %v3729_v48  ;;  %v1697_v48 = vld [vmem:[#allocation11 + $0x1a38] sm:$0xff]  ;;  %v3747_v51 = vpack.c.bf16 %v1688_v40, %v1680_v37  ;;  %v1744_v31 = vld [vmem:[#allocation11 + $0x1bb0] sm:$0xff] }
 0x302   :  { %v1761_v36 = vld [vmem:[#allocation11 + $0x1c38] sm:$0xff] }
 0x303   :  { %3604 = vmatpush1.bf16.msra.mxu0 %v3603_v54  ;;  %v1702_v54 = vld [vmem:[#allocation11 + $0x1a60] sm:$0xff]  ;;  %v1769_v37 = vld [vmem:[#allocation11 + $0x1c78] sm:$0xff] }
 0x304   :  { %3732 = vmatpush1.bf16.msra.mxu1 %v3731_v55  ;;  %3606 = vmatprep.subr.bf16.mxu0 %v3605_v56  ;;  %v1696_v55 = vld [vmem:[#allocation11 + $0x1a30] sm:$0xff]  ;;  %v3749_v56 = vpack.c.bf16 %v1705_v49, %v1697_v48  ;;  %v3623_v4 = vpack.c.bf16 %v1702_v54, %v1694_v53  ;;  %v1766_v48 = vld [vmem:[#allocation11 + $0x1c60] sm:$0xff]  ;;  %v1783_v53 = vld [vmem:[#allocation11 + $0x1ce8] sm:$0xff] }
 0x305   :  { %3734 = vmatprep.subr.bf16.mxu1 %v3733_v61  ;;  %v1713_v61 = vld [vmem:[#allocation11 + $0x1ab8] sm:$0xff]  ;;  %v3751_v58 = vpack.c.bf16 %v1704_v57, %v1696_v55  ;;  %v1760_v49 = vld [vmem:[#allocation11 + $0x1c30] sm:$0xff] }
 0x306   :  { %2274 = vmatmul.mubr.f32.vlgmr.msra.gmra.mrb[6].mxu0 %v3945_v15  ;;  %v1777_v54 = vld [vmem:[#allocation11 + $0x1cb8] sm:$0xff] }
 0x307   :  { %2416 = vmatmul.mubr.f32.vlgmr.msra.gmra.mrb[6].mxu1 %v3945_v15  ;;  %3608 = vmatpush1.bf16.msra.mxu0 %v3607_v5  ;;  %v1718_v5 = vld [vmem:[#allocation11 + $0x1ae0] sm:$0xff]  ;;  %v3629_v15 = vpack.c.bf16 %v1735_v11, %v1727_v10  ;;  %v1785_v55 = vld [vmem:[#allocation11 + $0x1cf8] sm:$0xff] }
 0x308   :  { %3736 = vmatpush1.bf16.msra.mxu1 %v3735_v6  ;;  %3610 = vmatprep.subr.bf16.mxu0 %v3609_v8  ;;  %v1712_v6 = vld [vmem:[#allocation11 + $0x1ab0] sm:$0xff]  ;;  %v3753_v8 = vpack.c.bf16 %v1721_v0, %v1713_v61  ;;  %v3627_v13 = vpack.c.bf16 %v1718_v5, %v1710_v2  ;;  %v1782_v61 = vld [vmem:[#allocation11 + $0x1ce0] sm:$0xff]  ;;  %v1799_v2 = vld [vmem:[#allocation11 + $0x1d68] sm:$0xff] }
 0x309   :  { %3738 = vmatprep.subr.bf16.mxu1 %v3737_v12  ;;  %2344 = vmatprep.mubr.f32.mxu0 %v3946_v28  ;;  %v1729_v12 = vld [vmem:[#allocation11 + $0x1b38] sm:$0xff]  ;;  %v3755_v14 = vpack.c.bf16 %v1720_v9, %v1712_v6  ;;  %v1776_v0 = vld [vmem:[#allocation11 + $0x1cb0] sm:$0xff]  ;;  %v1790_v11 = vld [vmem:[#allocation11 + $0x1d20] sm:$0xff] }
 0x30a   :  { %2486 = vmatprep.mubr.f32.mxu1 %v3946_v28  ;;  %v1742_v28 = vld [vmem:[#allocation11 + $0x1ba0] sm:$0xff]  ;;  %v1793_v5 = vld [vmem:[#allocation11 + $0x1d38] sm:$0xff] }
 0x30b   :  { %3612 = vmatpush1.bf16.msra.mxu0 %v3611_v18  ;;  %v1728_v18 = vld [vmem:[#allocation11 + $0x1b30] sm:$0xff]  ;;  %v1801_v6 = vld [vmem:[#allocation11 + $0x1d78] sm:$0xff] }
 0x30c   :  { %3740 = vmatpush1.bf16.msra.mxu1 %v3739_v19  ;;  %3614 = vmatprep.subr.bf16.mxu0 %v3613_v20  ;;  %v3757_v19 = vpack.c.bf16 %v1737_v38, %v1729_v12  ;;  %v1736_v20 = vld [vmem:[#allocation11 + $0x1b70] sm:$0xff]  ;;  %v1798_v12 = vld [vmem:[#allocation11 + $0x1d60] sm:$0xff] }
 0x30d   :  { %3742 = vmatprep.subr.bf16.mxu1 %v3741_v24  ;;  %v1753_v24 = vld [vmem:[#allocation11 + $0x1bf8] sm:$0xff]  ;;  %v3759_v26 = vpack.c.bf16 %v1736_v20, %v1728_v18  ;;  %v1792_v38 = vld [vmem:[#allocation11 + $0x1d30] sm:$0xff] }
 0x30e   :  { %v1817_v18 = vld [vmem:[#allocation11 + $0x1df8] sm:$0xff] }
 0x30f   :  { %3616 = vmatpush1.bf16.msra.mxu0 %v3615_v32  ;;  %v3761_v32 = vpack.c.bf16 %v1753_v24, %v1745_v23  ;;  %v1814_v23 = vld [vmem:[#allocation11 + $0x1de0] sm:$0xff]  ;;  %v1808_v24 = vld [vmem:[#allocation11 + $0x1db0] sm:$0xff] }
 0x310   :  { %3744 = vmatpush1.bf16.msra.mxu1 %v3743_v33  ;;  %3618 = vmatprep.subr.bf16.mxu0 %v3617_v34  ;;  %v1752_v33 = vld [vmem:[#allocation11 + $0x1bf0] sm:$0xff]  ;;  %v1759_v34 = vld [vmem:[#allocation11 + $0x1c28] sm:$0xff] }
 0x311   :  { %3746 = vmatprep.subr.bf16.mxu1 %v3745_v39  ;;  %v3635_v39 = vpack.c.bf16 %v1750_v30, %v1742_v28  ;;  %v3763_v40 = vpack.c.bf16 %v1752_v33, %v1744_v31  ;;  %v3637_v41 = vpack.c.bf16 %v1767_v35, %v1759_v34  ;;  %v1831_v28 = vld [vmem:[#allocation11 + $0x1e68] sm:$0xff]  ;;  %v1825_v30 = vld [vmem:[#allocation11 + $0x1e38] sm:$0xff]  ;;  %v1822_v35 = vld [vmem:[#allocation11 + $0x1e20] sm:$0xff] }
 0x312   :  { %v1833_v31 = vld [vmem:[#allocation11 + $0x1e78] sm:$0xff] }
 0x313   :  { %3620 = vmatpush1.bf16.msra.mxu0 %v3619_v50  ;;  %v3765_v50 = vpack.c.bf16 %v1769_v37, %v1761_v36  ;;  %v1830_v36 = vld [vmem:[#allocation11 + $0x1e60] sm:$0xff]  ;;  %v1824_v37 = vld [vmem:[#allocation11 + $0x1e30] sm:$0xff] }
 0x314   :  { %3748 = vmatpush1.bf16.msra.mxu1 %v3747_v51  ;;  %3622 = vmatprep.subr.bf16.mxu0 %v3621_v52  ;;  %v1768_v51 = vld [vmem:[#allocation11 + $0x1c70] sm:$0xff]  ;;  %v1775_v52 = vld [vmem:[#allocation11 + $0x1ca8] sm:$0xff] }
 0x315   :  { %3750 = vmatprep.subr.bf16.mxu1 %v3749_v56  ;;  %v3639_v56 = vpack.c.bf16 %v1766_v48, %v1758_v44  ;;  %v3767_v57 = vpack.c.bf16 %v1768_v51, %v1760_v49  ;;  %v3641_v59 = vpack.c.bf16 %v1783_v53, %v1775_v52  ;;  %v1847_v44 = vld [vmem:[#allocation11 + $0x1ee8] sm:$0xff]  ;;  %v1841_v48 = vld [vmem:[#allocation11 + $0x1eb8] sm:$0xff]  ;;  %v1838_v53 = vld [vmem:[#allocation11 + $0x1ea0] sm:$0xff] }
 0x316   :  { %v1849_v49 = vld [vmem:[#allocation11 + $0x1ef8] sm:$0xff] }
 0x317   :  { %3624 = vmatpush1.bf16.msra.mxu0 %v3623_v4  ;;  %v3769_v4 = vpack.c.bf16 %v1785_v55, %v1777_v54  ;;  %v1846_v54 = vld [vmem:[#allocation11 + $0x1ee0] sm:$0xff]  ;;  %v1840_v55 = vld [vmem:[#allocation11 + $0x1eb0] sm:$0xff] }
 0x318   :  { %3752 = vmatpush1.bf16.msra.mxu1 %v3751_v58  ;;  %3626 = vmatprep.subr.bf16.mxu0 %v3625_v1  ;;  %v1784_v58 = vld [vmem:[#allocation11 + $0x1cf0] sm:$0xff]  ;;  %v1791_v1 = vld [vmem:[#allocation11 + $0x1d28] sm:$0xff] }
 0x319   :  { %3754 = vmatprep.subr.bf16.mxu1 %v3753_v8  ;;  %v3643_v8 = vpack.c.bf16 %v1782_v61, %v1774_v60  ;;  %v3771_v9 = vpack.c.bf16 %v1784_v58, %v1776_v0  ;;  %v3645_v10 = vpack.c.bf16 %v1799_v2, %v1791_v1  ;;  %v1863_v60 = vld [vmem:[#allocation11 + $0x1f68] sm:$0xff]  ;;  %v1857_v61 = vld [vmem:[#allocation11 + $0x1f38] sm:$0xff]  ;;  %v1854_v2 = vld [vmem:[#allocation11 + $0x1f20] sm:$0xff] }
 0x31a   :  { %v1865_v0 = vld [vmem:[#allocation11 + $0x1f78] sm:$0xff] }
 0x31b   :  { %3628 = vmatpush1.bf16.msra.mxu0 %v3627_v13  ;;  %v3773_v13 = vpack.c.bf16 %v1801_v6, %v1793_v5  ;;  %v1862_v5 = vld [vmem:[#allocation11 + $0x1f60] sm:$0xff]  ;;  %v1856_v6 = vld [vmem:[#allocation11 + $0x1f30] sm:$0xff] }
 0x31c   :  { %3756 = vmatpush1.bf16.msra.mxu1 %v3755_v14  ;;  %3630 = vmatprep.subr.bf16.mxu0 %v3629_v15  ;;  %v1800_v14 = vld [vmem:[#allocation11 + $0x1d70] sm:$0xff]  ;;  %v1807_v15 = vld [vmem:[#allocation11 + $0x1da8] sm:$0xff] }
 0x31d   :  { %3758 = vmatprep.subr.bf16.mxu1 %v3757_v19  ;;  %v3647_v19 = vpack.c.bf16 %v1798_v12, %v1790_v11  ;;  %v3775_v20 = vpack.c.bf16 %v1800_v14, %v1792_v38  ;;  %v3649_v21 = vpack.c.bf16 %v1815_v16, %v1807_v15  ;;  %v1879_v11 = vld [vmem:[#allocation11 + $0x1fe8] sm:$0xff]  ;;  %v1873_v12 = vld [vmem:[#allocation11 + $0x1fb8] sm:$0xff]  ;;  %v1870_v16 = vld [vmem:[#allocation11 + $0x1fa0] sm:$0xff] }
 0x31e   :  { %v1881_v38 = vld [vmem:[#allocation11 + $0x1ff8] sm:$0xff] }
 0x31f   :  { %3632 = vmatpush1.bf16.msra.mxu0 %v3631_v25  ;;  %v3777_v25 = vpack.c.bf16 %v1817_v18, %v1809_v17  ;;  %v1878_v17 = vld [vmem:[#allocation11 + $0x1fe0] sm:$0xff]  ;;  %v3793_v18 = vpack.c.bf16 %v1881_v38, %v1873_v12  ;;  %v2562_v12 = vld [vmem:[#allocation14 + $0x60] sm:$0xff]  ;;  %v2563_v38 = vld [vmem:[#allocation14 + $0x68] sm:$0xff] }
 0x320   :  { %3760 = vmatpush1.bf16.msra.mxu1 %v3759_v26  ;;  %3634 = vmatprep.subr.bf16.mxu0 %v3633_v27  ;;  %v1816_v26 = vld [vmem:[#allocation11 + $0x1df0] sm:$0xff]  ;;  %v1823_v27 = vld [vmem:[#allocation11 + $0x1e28] sm:$0xff] }
 0x321   :  { %3762 = vmatprep.subr.bf16.mxu1 %v3761_v32  ;;  %v3651_v32 = vpack.c.bf16 %v1814_v23, %v1806_v22  ;;  %v3779_v33 = vpack.c.bf16 %v1816_v26, %v1808_v24  ;;  %v3653_v34 = vpack.c.bf16 %v1831_v28, %v1823_v27  ;;  %v2567_v26 = vld [vmem:[#allocation14 + $0x88] sm:$0xff] }
 0x323   :  { %3636 = vmatpush1.bf16.msra.mxu0 %v3635_v39  ;;  %v3781_v39 = vpack.c.bf16 %v1833_v31, %v1825_v30  ;;  %v2550_v31 = vld [vmem:[#allocation14] sm:$0xff] }
 0x324   :  { %3764 = vmatpush1.bf16.msra.mxu1 %v3763_v40  ;;  %3638 = vmatprep.subr.bf16.mxu0 %v3637_v41  ;;  %v1832_v40 = vld [vmem:[#allocation11 + $0x1e70] sm:$0xff]  ;;  %v1839_v41 = vld [vmem:[#allocation11 + $0x1ea8] sm:$0xff] }
 0x325   :  { %3766 = vmatprep.subr.bf16.mxu1 %v3765_v50  ;;  %v3655_v50 = vpack.c.bf16 %v1830_v36, %v1822_v35  ;;  %v3783_v51 = vpack.c.bf16 %v1832_v40, %v1824_v37  ;;  %v3657_v52 = vpack.c.bf16 %v1847_v44, %v1839_v41  ;;  %v2569_v35 = vld [vmem:[#allocation14 + $0x98] sm:$0xff]  ;;  %v2570_v40 = vld [vmem:[#allocation14 + $0xa0] sm:$0xff]  ;;  %v2571_v41 = vld [vmem:[#allocation14 + $0xa8] sm:$0xff] }
 0x326   :  { %v2553_v37 = vld [vmem:[#allocation14 + $0x18] sm:$0xff]  ;;  %v3805_v44 = vpack.c.bf16 %v2571_v41, %v2570_v40 }
 0x327   :  { %3640 = vmatpush1.bf16.msra.mxu0 %v3639_v56  ;;  %v3785_v56 = vpack.c.bf16 %v1849_v49, %v1841_v48  ;;  %v2554_v48 = vld [vmem:[#allocation14 + $0x20] sm:$0xff]  ;;  %v2555_v49 = vld [vmem:[#allocation14 + $0x28] sm:$0xff] }
 0x328   :  { %3768 = vmatpush1.bf16.msra.mxu1 %v3767_v57  ;;  %3642 = vmatprep.subr.bf16.mxu0 %v3641_v59  ;;  %v1848_v57 = vld [vmem:[#allocation11 + $0x1ef0] sm:$0xff]  ;;  %v1855_v59 = vld [vmem:[#allocation11 + $0x1f28] sm:$0xff] }
 0x329   :  { %3770 = vmatprep.subr.bf16.mxu1 %v3769_v4  ;;  %v3659_v4 = vpack.c.bf16 %v1846_v54, %v1838_v53  ;;  %v3787_v58 = vpack.c.bf16 %v1848_v57, %v1840_v55  ;;  %v3661_v1 = vpack.c.bf16 %v1863_v60, %v1855_v59  ;;  %v2556_v54 = vld [vmem:[#allocation14 + $0x30] sm:$0xff]  ;;  %v2557_v55 = vld [vmem:[#allocation14 + $0x38] sm:$0xff]  ;;  %v2574_v57 = vld [vmem:[#allocation14 + $0xc0] sm:$0xff] }
 0x32a   :  { %v2575_v59 = vld [vmem:[#allocation14 + $0xc8] sm:$0xff] }
 0x32b   :  { %3644 = vmatpush1.bf16.msra.mxu0 %v3643_v8  ;;  %v3789_v8 = vpack.c.bf16 %v1865_v0, %v1857_v61  ;;  %v3813_v60 = vpack.c.bf16 %v2575_v59, %v2574_v57  ;;  %v2558_v61 = vld [vmem:[#allocation14 + $0x40] sm:$0xff]  ;;  %v2559_v0 = vld [vmem:[#allocation14 + $0x48] sm:$0xff] }
 0x32c   :  { %3772 = vmatpush1.bf16.msra.mxu1 %v3771_v9  ;;  %3646 = vmatprep.subr.bf16.mxu0 %v3645_v10  ;;  %v1864_v9 = vld [vmem:[#allocation11 + $0x1f70] sm:$0xff]  ;;  %v1871_v10 = vld [vmem:[#allocation11 + $0x1fa8] sm:$0xff]  ;;  %v2533_v57 = vld [vmem:[#allocation10 + $0x18] sm:$0xff] }
 0x32d   :  { %3774 = vmatprep.subr.bf16.mxu1 %v3773_v13  ;;  %v3663_v13 = vpack.c.bf16 %v1862_v5, %v1854_v2  ;;  %v3791_v14 = vpack.c.bf16 %v1864_v9, %v1856_v6  ;;  %v3665_v15 = vpack.c.bf16 %v1879_v11, %v1871_v10  ;;  %v2560_v2 = vld [vmem:[#allocation14 + $0x50] sm:$0xff]  ;;  %v2561_v6 = vld [vmem:[#allocation14 + $0x58] sm:$0xff]  ;;  %v2579_v9 = vld [vmem:[#allocation14 + $0xe8] sm:$0xff] }
 0x32e   :  { %v3819_v10 = vpack.c.bf16 %v2561_v6, %v2560_v2 }
 0x32f   :  { %3648 = vmatpush1.bf16.msra.mxu0 %v3647_v19  ;;  %v1872_v19 = vld [vmem:[#allocation11 + $0x1fb0] sm:$0xff] }
 0x330   :  { %3776 = vmatpush1.bf16.msra.mxu1 %v3775_v20  ;;  %3650 = vmatprep.subr.bf16.mxu0 %v3649_v21  ;;  %v1880_v20 = vld [vmem:[#allocation11 + $0x1ff0] sm:$0xff]  ;;  %v3667_v21 = vpack.c.bf16 %v1878_v17, %v1870_v16  ;;  %v2564_v17 = vld [vmem:[#allocation14 + $0x70] sm:$0xff] }
 0x331   :  { %3778 = vmatprep.subr.bf16.mxu1 %v3777_v25  ;;  %v3795_v22 = vpack.c.bf16 %v1880_v20, %v1872_v19  ;;  %v2566_v25 = vld [vmem:[#allocation14 + $0x80] sm:$0xff]  ;;  %v1883_v20 = vld [vmem:[#allocation13 + $0x8] sm:$0xff] }
 0x332   :  { %v3797_v30 = vpack.c.bf16 %v2567_v26, %v2566_v25  ;;  %v1892_v25 = vrot.slane %v1883_v20, %v702_v46  ;;  %v1900_v26 = vrot.slane %v1883_v20, %v710_v47  ;;  %v1908_v40 = vrot.slane %v1883_v20, %v718_v3 }
 0x333   :  { %3652 = vmatpush1.bf16.msra.mxu0 %v3651_v32  ;;  %v2551_v32 = vld [vmem:[#allocation14 + $0x8] sm:$0xff]  ;;  %v1916_v41 = vrot.slane %v1883_v20, %v726_v7 }
 0x334   :  { %3780 = vmatpush1.bf16.msra.mxu1 %v3779_v33  ;;  %3654 = vmatprep.subr.bf16.mxu0 %v3653_v34  ;;  %v3799_v33 = vpack.c.bf16 %v2551_v32, %v2550_v31  ;;  %v2568_v34 = vld [vmem:[#allocation14 + $0x90] sm:$0xff] }
 0x335   :  { %3782 = vmatprep.subr.bf16.mxu1 %v3781_v39  ;;  %v3801_v36 = vpack.c.bf16 %v2569_v35, %v2568_v34 }
 0x337   :  { %3656 = vmatpush1.bf16.msra.mxu0 %v3655_v50  ;;  %v3807_v50 = vpack.c.bf16 %v2555_v49, %v2554_v48 }
 0x338   :  { %3784 = vmatpush1.bf16.msra.mxu1 %v3783_v51  ;;  %3658 = vmatprep.subr.bf16.mxu0 %v3657_v52  ;;  %v2572_v51 = vld [vmem:[#allocation14 + $0xb0] sm:$0xff]  ;;  %v2573_v52 = vld [vmem:[#allocation14 + $0xb8] sm:$0xff] }
 0x339   :  { %3786 = vmatprep.subr.bf16.mxu1 %v3785_v56  ;;  %v3809_v53 = vpack.c.bf16 %v2573_v52, %v2572_v51  ;;  %v3811_v56 = vpack.c.bf16 %v2557_v55, %v2556_v54  ;;  %v2532_v55 = vld [vmem:[#allocation10 + $0x10] sm:$0xff] }
 0x33b   :  { %3660 = vmatpush1.bf16.msra.mxu0 %v3659_v4  ;;  %v3815_v4 = vpack.c.bf16 %v2559_v0, %v2558_v61 }
 0x33c   :  { %3788 = vmatpush1.bf16.msra.mxu1 %v3787_v58  ;;  %3662 = vmatprep.subr.bf16.mxu0 %v3661_v1  ;;  %v2576_v58 = vld [vmem:[#allocation14 + $0xd0] sm:$0xff]  ;;  %v2577_v1 = vld [vmem:[#allocation14 + $0xd8] sm:$0xff] }
 0x33d   :  { %3790 = vmatprep.subr.bf16.mxu1 %v3789_v8  ;;  %v3817_v5 = vpack.c.bf16 %v2577_v1, %v2576_v58  ;;  %v2578_v8 = vld [vmem:[#allocation14 + $0xe0] sm:$0xff] }
 0x33e   :  { %v3821_v11 = vpack.c.bf16 %v2579_v9, %v2578_v8 }
 0x33f   :  { %3664 = vmatpush1.bf16.msra.mxu0 %v3663_v13  ;;  %v2580_v13 = vld [vmem:[#allocation14 + $0xf0] sm:$0xff] }
 0x340   :  { %3792 = vmatpush1.bf16.msra.mxu1 %v3791_v14  ;;  %3666 = vmatprep.subr.bf16.mxu0 %v3665_v15  ;;  %v2581_v14 = vld [vmem:[#allocation14 + $0xf8] sm:$0xff]  ;;  %v3823_v15 = vpack.c.bf16 %v2563_v38, %v2562_v12 }
 0x341   :  { %3794 = vmatprep.subr.bf16.mxu1 %v3793_v18  ;;  %v3825_v16 = vpack.c.bf16 %v2581_v14, %v2580_v13  ;;  %v2565_v18 = vld [vmem:[#allocation14 + $0x78] sm:$0xff] }
 0x342   :  { %v3827_v19 = vpack.c.bf16 %v2565_v18, %v2564_v17 }
 0x343   :  { %3668 = vmatpush1.bf16.msra.mxu0 %v3667_v21  ;;  %v1888_v21 = vrot.slane %v1883_v20, %v698_v43 }
 0x344   :  { %3796 = vmatpush1.bf16.msra.mxu1 %v3795_v22  ;;  %3798 = vmatprep.subr.bf16.mxu0 %v3797_v30  ;;  %v1896_v22 = vrot.slane %v1883_v20, %v706_v45 }
 0x346   :  { %2345 = vmatmul.mubr.f32.vlgmr.msra.gmra.mrb[6].mxu0 %v4453_v29 }
 0x347   :  { %2487 = vmatmul.mubr.f32.vlgmr.msra.gmra.mrb[6].mxu1 %v4453_v29  ;;  %3800 = vmatpush3.bf16.msra.mxu0 %v3799_v33  ;;  %v2552_v29 = vld [vmem:[#allocation14 + $0x10] sm:$0xff] }
 0x348   :  { %v3803_v39 = vpack.c.bf16 %v2553_v37, %v2552_v29  ;;  %3802 = vmatprep.subr.bf16.mxu0 %v3801_v36 }
 0x34b   :  { %3804 = vmatpush3.bf16.msra.mxu0 %v3803_v39 }
 0x34c   :  { %3806 = vmatprep.subr.bf16.mxu0 %v3805_v44 }
 0x34f   :  { %3808 = vmatpush3.bf16.msra.mxu0 %v3807_v50 }
 0x350   :  { %3810 = vmatprep.subr.bf16.mxu0 %v3809_v53 }
 0x353   :  { %3812 = vmatpush3.bf16.msra.mxu0 %v3811_v56 }
 0x354   :  { %3814 = vmatprep.subr.bf16.mxu0 %v3813_v60 }
 0x357   :  { %3816 = vmatpush3.bf16.msra.mxu0 %v3815_v4 }
 0x358   :  { %3818 = vmatprep.subr.bf16.mxu0 %v3817_v5 }
 0x35b   :  { %3820 = vmatpush3.bf16.msra.mxu0 %v3819_v10 }
 0x35c   :  { %3822 = vmatprep.subr.bf16.mxu0 %v3821_v11 }
 0x35f   :  { %3824 = vmatpush3.bf16.msra.mxu0 %v3823_v15 }
 0x360   :  { %3826 = vmatprep.subr.bf16.mxu0 %v3825_v16 }
 0x363   :  { %3828 = vmatpush3.bf16.msra.mxu0 %v3827_v19 }
 0x399   :  { %v4461_v23 = vpop.f32.mrb[4].mxu0  ;;  %v4463_v24 = vpop.f32.mrb[4].mxu1 }
 0x39a   :  { %v4465_v27 = vpop.f32.mrb[5].mxu0  ;;  %v4467_v28 = vpop.f32.mrb[5].mxu1  ;;  %v3837_v30 = vadd.f32 %v4461_v23, %v1888_v21  ;;  %v3839_v31 = vadd.f32 %v4463_v24, %v1896_v22  ;;  %v1904_v24 = vrot.slane %v1883_v20, %v714_v63 }
 0x39b   :  { %v3838_v32 = vadd.f32 %v4465_v27, %v1892_v25  ;;  %v3840_v33 = vadd.f32 %v4467_v28, %v1900_v26  ;;  %v1912_v28 = vrot.slane %v1883_v20, %v722_v62 }
 0x39c   :  { %v2731_v34 = vmul.f32 -1.442695, %v3837_v30  ;;  %v2733_v35 = vmul.f32 -1.442695, %v3839_v31 }
 0x39d   :  { %v2732_v43 = vmul.f32 -1.442695, %v3838_v32  ;;  %v2734_v36 = vmul.f32 -1.442695, %v3840_v33 }
 0x39e   :  { %3911 = vpow2.f32 %v2731_v34 }
 0x39f   :  { %3913 = vpow2.f32 %v2733_v35 }
 0x3a0   :  { %3915 = vpow2.f32 %v2732_v43 }
 0x3a1   :  { %3917 = vpow2.f32 %v2734_v36 }
 0x3a8   :  { %v3912_v45 = vpop.eup %3911 }
 0x3a9   :  { %v3914_v46 = vpop.eup %3913  ;;  %v2499_v37 = vadd.f32 1.0, %v3912_v45 }
 0x3aa   :  { %v3916_v29 = vpop.eup %3915  ;;  %v2511_v23 = vadd.f32 1.0, %v3914_v46 }
 0x3ab   :  { %v3918_v47 = vpop.eup %3917  ;;  %v2500_v39 = vadd.f32 1.0, %v3916_v29  ;;  %3919 = vrcp.f32 %v2499_v37 }
 0x3ac   :  { %v2512_v27 = vadd.f32 1.0, %v3918_v47  ;;  %3921 = vrcp.f32 %v2511_v23 }
 0x3ad   :  { %3923 = vrcp.f32 %v2500_v39 }
 0x3ae   :  { %3925 = vrcp.f32 %v2512_v27 }
 0x3b5   :  { %v3920_v3 = vpop.eup %3919 }
 0x3b6   :  { %v3922_v42 = vpop.eup %3921 }
 0x3b7   :  { %v3924_v7 = vpop.eup %3923  ;;  %v2534_v61 = vmul.f32 %v3922_v42, %v2532_v55 }
 0x3b8   :  { %v3926_v56 = vpop.eup %3925 }
 0x3b9   :  { %v2535_v4 = vmul.f32 %v3926_v56, %v2533_v57 }
 0x419   :  { %v2346_v44 = vpop.f32.mrb[6].mxu0 }
 0x41a   :  { %v3841_v48 = vadd.f32 %v2346_v44, %v1904_v24  ;;  %v2488_v49 = vpop.f32.mrb[6].mxu1  ;;  %v2348_v50 = vpop.f32.mrb[7].mxu0 }
 0x41b   :  { %v3843_v51 = vadd.f32 %v2488_v49, %v1912_v28  ;;  %v3842_v63 = vadd.f32 %v2348_v50, %v1908_v40  ;;  %v2490_v52 = vpop.f32.mrb[7].mxu1 }
 0x41c   :  { %3927 = vtanh.f32 %v3841_v48  ;;  %v3844_v53 = vadd.f32 %v2490_v52, %v1916_v41 }
 0x41d   :  { %v2735_v62 = vmul.f32 -1.442695, %v3843_v51  ;;  %3929 = vtanh.f32 %v3842_v63 }
 0x41e   :  { %v2736_v54 = vmul.f32 -1.442695, %v3844_v53 }
 0x41f   :  { %3931 = vpow2.f32 %v2735_v62 }
 0x420   :  { %3933 = vpow2.f32 %v2736_v54 }
 0x426   :  { %v3928_v59 = vpop.eup %3927 }
 0x427   :  { %v3930_v60 = vpop.eup %3929  ;;  %v2536_v0 = vmul.f32 %v3928_v59, %v3920_v3 }
 0x428   :  { %v2537_v58 = vmul.f32 %v3930_v60, %v3924_v7 }
 0x429   :  { %v3932_v1 = vpop.eup %3931  ;;  %v2538_v2 = vadd.f32 %v2536_v0, %v2534_v61 }
 0x42a   :  { %v3934_v5 = vpop.eup %3933  ;;  %v2525_v6 = vadd.f32 1.0, %v3932_v1  ;;  %v2539_v8 = vadd.f32 %v2537_v58, %v2535_v4 }
 0x42b   :  { %3935 = vtanh.f32 %v2538_v2  ;;  %2545 = vst [vmem:[#allocation20 + $0x10] sm:$0xff] %v2538_v2  ;;  %v2526_v9 = vadd.f32 1.0, %v3934_v5 }
 0x42c   :  { %3937 = vrcp.f32 %v2525_v6  ;;  %2546 = vst [vmem:[#allocation20 + $0x18] sm:$0xff] %v2539_v8 }
 0x42d   :  { %3939 = vrcp.f32 %v2526_v9 }
 0x42e   :  { %3941 = vtanh.f32 %v2539_v8 }
 0x435   :  { %v3936_v10 = vpop.eup %3935 }
 0x436   :  { %v3938_v11 = vpop.eup %3937 }
 0x437   :  { %v3940_v12 = vpop.eup %3939  ;;  %v2542_v38 = vmul.f32 %v3938_v11, %v3936_v10 }
 0x438   :  { %v3942_v13 = vpop.eup %3941 }
 0x439   :  { %v2543_v14 = vmul.f32 %v3942_v13, %v3940_v12  ;;  %2548 = vst [vmem:[#allocation18 + $0x10] sm:$0xff] %v2542_v38 }
 0x43b   :  { %2653 = vmatprep.mubr.f32.mxu0 %v2543_v14  ;;  %2549 = vst [vmem:[#allocation18 + $0x18] sm:$0xff] %v2543_v14 }
 0x43c   :  { %2654 = vmatmul.mubr.f32.vlgmr.msra.gmra.mrb[8].mxu0 %v2542_v38 }
 0x43d   :  { %4122 = shalt.err (!%p4119_p7)
}
 0x43e   :  { %s4123_s1 = scalar_lea.hbm %s4540_s9, 512 }
 0x43f   :  { %p4124_p8 = scmp.ne.s32.totalorder %s4540_s9, %s4123_s1  ;;  %p4127_p9 = scmp.lt.u32.totalorder %s4123_s1, %s4540_s9 }
 0x441   :  { %p4129_p10 = pnand %p4127_p9, %p4124_p8 }
 0x443   :  { %4132 = shalt.err (!%p4129_p10)
}
 0x444   :  { %2681 = dma.vmem_to_hbm [thread:$0]  %s2676_s29, 512, %s4540_s9, [#allocation19], %s4192_s23, %s4192_s23, %s4193_s24  }
 0x445   :  { %s4207_s11 = smov [#allocation20]  }
 0x446   :  { %s2687_s12 = sshll.u32 %s4207_s11, 4  ;;  %s2688_s12 = int_to_ptr.vmem [resolvable:$true] %s2687_s12 }
 0x447   :  { %s4133_s13 = scalar_lea.vmem %s2688_s12, 512  ;;  %p4138_p12 = scmp.lt.s32.totalorder %s2688_s12, %s2688_s12 }
 0x448   :  { %p4134_p11 = scmp.ne.s32.totalorder %s2688_s12, %s4133_s13  ;;  %p4139_p13 = scmp.lt.s32.totalorder %s4133_s13, %s4133_s13 }
 0x44a   :  { %p4140_p0 = por %p4139_p13, %p4138_p12 }
 0x44c   :  { %p4141_p1 = pnand %p4140_p0, %p4134_p11 }
 0x44e   :  { %4144 = shalt.err (!%p4141_p1)
}
 0x44f   :  { %s4145_s17 = scalar_lea.hbm %s4541_s10, 512 }
 0x450   :  { %p4146_p2 = scmp.ne.s32.totalorder %s4541_s10, %s4145_s17  ;;  %p4149_p3 = scmp.lt.u32.totalorder %s4145_s17, %s4541_s10 }
 0x452   :  { %p4151_p4 = pnand %p4149_p3, %p4146_p2 }
 0x454   :  { %4154 = shalt.err (!%p4151_p4)
}
 0x455   :  { %2693 = dma.vmem_to_hbm [thread:$0]  %s2688_s12, 512, %s4541_s10, [#allocation19], %s4192_s23, %s4192_s23, %s4193_s24   ;;  %v2737_v17 = vld [vmem:[#allocation16] ss:$0 sm:$0xff] }
 0x456   :  { %s4208_s19 = smov [#allocation17]  }
 0x457   :  { %s2666_s22 = sshll.u32 %s4208_s19, 4  ;;  %s2667_s22 = int_to_ptr.vmem [resolvable:$true] %s2666_s22 }
 0x458   :  { %s4155_s26 = scalar_lea.vmem %s2667_s22, 128  ;;  %p4160_p6 = scmp.lt.s32.totalorder %s2667_s22, %s2667_s22 }
 0x459   :  { %p4156_p5 = scmp.ne.s32.totalorder %s2667_s22, %s4155_s26  ;;  %p4161_p7 = scmp.lt.s32.totalorder %s4155_s26, %s4155_s26 }
 0x45b   :  { %p4162_p8 = por %p4161_p7, %p4160_p6 }
 0x45d   :  { %p4163_p9 = pnand %p4162_p8, %p4156_p5 }
 0x50f   :  { %v2770_v15 = vpop.f32.mrb[8].mxu0 }
 0x510   :  { %v2771_v16 = vpop.f32.mrb[9].mxu0 }
 0x511   :  { %v2772_v18 = vadd.f32 %v2771_v16, %v2770_v15 }
 0x513   :  { %v2656_v19 = vadd.f32 %v2772_v18, %v2737_v17 }
 0x515   :  { %2659 = vst [vmem:[#allocation17] sm:$0xff] %v2656_v19 }
 0x516   :  { %4166 = shalt.err (!%p4163_p9)
}
 0x517   :  { %s4167_s10 = scalar_lea.hbm %s4539_s8, 128 }
 0x518   :  { %p4168_p10 = scmp.ne.s32.totalorder %s4539_s8, %s4167_s10  ;;  %p4171_p11 = scmp.lt.u32.totalorder %s4167_s10, %s4539_s8 }
 0x51a   :  { %p4173_p12 = pnand %p4171_p11, %p4168_p10 }
 0x51c   :  { %4176 = shalt.err (!%p4173_p12)
}
 0x51d   :  { %2669 = dma.vmem_to_hbm [thread:$0]  %s2667_s22, 128, %s4539_s8, [#allocation5]  }
 0x51e   :  { %4187 = dma.done.wait [#allocation5], 128  }
 0x51f   :  { %4188 = vsyncadd [#allocation5], 4294967168 }
 0x520   :  { %4189 = dma.done.wait [#allocation19], 1024  }
 0x521   :  { %4190 = vsyncadd [#allocation19], 4294966272 }
 0x522   :  { %2703 = vsyncpa [#allocation4], 1 }
 0x523   :  { %2704 = vsyncpa [#allocation9], 1 }
 0x524   :  { %2705 = vsyncpa [#allocation12], 1 }
 0x525   :  { %2706 = vsyncpa [#allocation15], 1 }
 0x526   :  { %2707 = vsyncpa [#allocation5], 1 }
 0x527   :  { %2708 = vsyncpa [#allocation19], 1 }
 0x528   :  { %2709 = vsyncpa [#allocation6], 1 }

</bundles_post_ra>
